<compile_context>
chip_gen: v5e
topology: v5e:2x2
jax: 0.10.0
libtpu: 0.0.40
codegen_flags: <defaults>
</compile_context>

<pallas_src>
import math
import numpy as np
import jax
import jax.numpy as jnp
from jax.experimental import pallas as pl
from jax.experimental.pallas import tpu as pltpu

# ---------------- configuration (matches SCDModel defaults, small sizes) ------
SEG_NUM   = 5
D_CLASS   = 4
EVENT_DIM = 512
HIDDEN    = 64
N_HEADS   = 8
HEAD_DIM  = EVENT_DIM // N_HEADS          # 64
POOL_K    = 4
SED_LATENT = EVENT_DIM * POOL_K           # 2048 (so pool(k=4) -> event_dim=512)
B_GROUPS  = 2                             # bs // seg_num
BS        = B_GROUPS * SEG_NUM            # 10
T         = 16
F_IN      = 64


# ------------------------------- Pallas kernel --------------------------------
def scd_kernel(x_ref, wsed_ref, bsed_ref, wqkv_ref, bqkv_ref, wo_ref, bo_ref,
               bias_ref, avg_ref, wfc_ref, bfc_ref, wcls_ref, bcls_ref, out_ref):
    # (1) latent_sed.mean(dim=1): mean over time commutes with the linear proj.
    x_mean = jnp.mean(x_ref[...], axis=1)                      # (BS, F_IN) f32
    xm_bf = x_mean.astype(jnp.bfloat16)

    # (2) SED projection fused with MaxPool1d(kernel_size=4):
    #     pooled[:, i] = max_j (x_mean @ W_sed + b_sed)[:, 4*i + j]
    #     wsed_ref[j] holds the column-strided slice W_sed[:, j::4]  (bf16).
    pooled = None
    for j in range(POOL_K):
        pj = jnp.dot(xm_bf, wsed_ref[j],
                     preferred_element_type=jnp.float32) + bsed_ref[j]
        pooled = pj if pooled is None else jnp.maximum(pooled, pj)
    # pooled: (BS, EVENT_DIM) f32  == latent_sed after .mean(dim=1) and pool.

    # (3) Fused QKV projection: one (BS,512) x (512,1536) bf16 MXU push.
    qkv = jnp.dot(pooled.astype(jnp.bfloat16), wqkv_ref[...],
                  preferred_element_type=jnp.float32) + bqkv_ref[...]
    scale = 1.0 / math.sqrt(HEAD_DIM)
    q_all = qkv[:, 0:EVENT_DIM] * scale           # lane-tile-aligned splits
    k_all = qkv[:, EVENT_DIM:2 * EVENT_DIM]
    v_all = qkv[:, 2 * EVENT_DIM:3 * EVENT_DIM]

    # (4) Multi-head attention over all 10 rows at once. Cross-group and
    #     diagonal interactions are killed by the precomputed additive bias
    #     (0 for same-group off-diagonal, -1e9 otherwise) == masked_fill.
    bias = bias_ref[...]                                        # (BS, BS) f32
    ctx_parts = []
    for h in range(N_HEADS):                                    # unrolled, 8x
        sl = slice(h * HEAD_DIM, (h + 1) * HEAD_DIM)
        qh, kh, vh = q_all[:, sl], k_all[:, sl], v_all[:, sl]
        s = jnp.einsum('qd,kd->qk', qh, kh,
                       preferred_element_type=jnp.float32) + bias
        s = s - jnp.max(s, axis=-1, keepdims=True)
        e = jnp.exp(s)
        p = e * pl.reciprocal(jnp.sum(e, axis=-1, keepdims=True), approx=True)
        ctx_parts.append(jnp.dot(p, vh, preferred_element_type=jnp.float32))
    ctx = jnp.concatenate(ctx_parts, axis=-1)                   # (BS, EVENT_DIM)

    # (5) Single full-width output projection (concat(heads) @ Wo).
    attn = jnp.dot(ctx.astype(jnp.bfloat16), wo_ref[...],
                   preferred_element_type=jnp.float32) + bo_ref[...]

    # (6) attention_fc -> ReLU, per-group segment mean (one tiny matmul with a
    #     precomputed (B_GROUPS, BS) averaging matrix), dropout=identity (eval),
    #     classifier. One store of the full (B_GROUPS, D_CLASS) output.
    fc = jnp.maximum(
        jnp.dot(attn, wfc_ref[...], preferred_element_type=jnp.float32)
        + bfc_ref[...], 0.0)                                    # (BS, HIDDEN)
    feat = jnp.dot(avg_ref[...], fc,
                   preferred_element_type=jnp.float32)          # (B_GROUPS, HIDDEN)
    out_ref[...] = (jnp.dot(feat, wcls_ref[...],
                            preferred_element_type=jnp.float32)
                    + bcls_ref[...])                            # (B_GROUPS, D_CLASS)


# ------------------------------- wrapper ---------------------------------------
def _full_spec(shape):
    nd = len(shape)
    return pl.BlockSpec(shape, lambda i, _nd=nd: (0,) * _nd)


def scd_forward(x_feat, params):
    ins = (x_feat,) + tuple(params)
    return pl.pallas_call(
        scd_kernel,
        out_shape=jax.ShapeDtypeStruct((B_GROUPS, D_CLASS), jnp.float32),
        grid=(1,),
        in_specs=[_full_spec(a.shape) for a in ins],
        out_specs=_full_spec((B_GROUPS, D_CLASS)),
        compiler_params=pltpu.CompilerParams(
            dimension_semantics=("arbitrary",),
            vmem_limit_bytes=16 * 1024 * 1024),
    )(*ins)


# ------------------------------- reference (plain JAX, f32) -------------------
def scd_reference(x_feat, w_sed, b_sed, w_qkvo, b_qkvo, mask, w_fc, b_fc,
                  w_cls, b_cls):
    latent_sed = jnp.einsum('btf,fd->btd', x_feat, w_sed) + b_sed      # (BS,T,2048)
    m = latent_sed.mean(axis=1)                                        # (BS,2048)
    pooled = m.reshape(BS, EVENT_DIM, POOL_K).max(axis=-1)             # MaxPool1d(4)
    seg = pooled.reshape(B_GROUPS, SEG_NUM, EVENT_DIM)

    wq, wk, wv, wo = w_qkvo
    bq, bk, bv, bo = b_qkvo
    q = seg @ wq + bq
    k = seg @ wk + bk
    v = seg @ wv + bv

    def split(t):  # (B,S,E) -> (B,H,S,HD)
        return t.reshape(B_GROUPS, SEG_NUM, N_HEADS, HEAD_DIM).transpose(0, 2, 1, 3)

    qh, kh, vh = split(q), split(k), split(v)
    scores = jnp.einsum('bhqd,bhkd->bhqk', qh, kh) / math.sqrt(HEAD_DIM)
    scores = jnp.where(mask[None, None] == 0, -1e9, scores)
    p = jax.nn.softmax(scores, axis=-1)
    ctx = jnp.einsum('bhqk,bhkd->bhqd', p, vh)
    ctx = ctx.transpose(0, 2, 1, 3).reshape(B_GROUPS, SEG_NUM, EVENT_DIM)
    out = ctx @ wo + bo

    out = jax.nn.relu(out @ w_fc + b_fc).mean(axis=1)                  # (B, HIDDEN)
    return out @ w_cls + b_cls                                         # (B, D_CLASS)


# ------------------------------- main -------------------------------------------
if __name__ == "__main__":
    key = jax.random.PRNGKey(0)
    ks = jax.random.split(key, 16)

    x_feat = jax.random.normal(ks[0], (BS, T, F_IN), jnp.float32)

    std = 0.02
    # Large weights stored in bf16 (model quantized to bf16 weights); biases &
    # small tail weights stay f32. The reference uses the same quantized values.
    w_sed = (std * jax.random.normal(ks[1], (F_IN, SED_LATENT))).astype(jnp.bfloat16)
    b_sed = std * jax.random.normal(ks[2], (SED_LATENT,), jnp.float32)

    wq = (std * jax.random.normal(ks[3], (EVENT_DIM, EVENT_DIM))).astype(jnp.bfloat16)
    wk = (std * jax.random.normal(ks[4], (EVENT_DIM, EVENT_DIM))).astype(jnp.bfloat16)
    wv = (std * jax.random.normal(ks[5], (EVENT_DIM, EVENT_DIM))).astype(jnp.bfloat16)
    wo = (std * jax.random.normal(ks[6], (EVENT_DIM, EVENT_DIM))).astype(jnp.bfloat16)
    bq = std * jax.random.normal(ks[7], (1, EVENT_DIM), jnp.float32)
    bk = std * jax.random.normal(ks[8], (1, EVENT_DIM), jnp.float32)
    bv = std * jax.random.normal(ks[9], (1, EVENT_DIM), jnp.float32)
    bo = std * jax.random.normal(ks[10], (1, EVENT_DIM), jnp.float32)

    w_fc = std * jax.random.normal(ks[11], (EVENT_DIM, HIDDEN), jnp.float32)
    b_fc = std * jax.random.normal(ks[12], (1, HIDDEN), jnp.float32)
    w_cls = std * jax.random.normal(ks[13], (HIDDEN, D_CLASS), jnp.float32)
    b_cls = std * jax.random.normal(ks[14], (1, D_CLASS), jnp.float32)

    # attn mask: 1 - eye(seg_num), applied per batch group (as in forward()).
    mask = (1.0 - jnp.eye(SEG_NUM, dtype=jnp.float32))

    # ---- parameter preparation (plain JAX glue, done once) -------------------
    # Pre-split SED weights by pooling group: column j::4 of W_sed feeds max-pool
    # output i at original column 4*i + j.
    w_sed_split = jnp.stack([w_sed[:, j::POOL_K] for j in range(POOL_K)], axis=0)
    b_sed_split = jnp.stack([b_sed[j::POOL_K].reshape(1, EVENT_DIM)
                             for j in range(POOL_K)], axis=0)
    # Fused QKV weights / biases.
    w_qkv = jnp.concatenate([wq, wk, wv], axis=1)        # (512, 1536) bf16
    b_qkv = jnp.concatenate([bq, bk, bv], axis=1)        # (1, 1536)  f32
    # Block-diagonal additive attention bias for the full (BS, BS) score matrix:
    # 0 where same group & off-diagonal, -1e9 elsewhere (== masked_fill).
    allowed = jnp.kron(jnp.eye(B_GROUPS, dtype=jnp.float32), mask)      # (10,10)
    attn_bias = jnp.where(allowed > 0.5, 0.0, -1e9).astype(jnp.float32)
    # Per-group segment-mean as a tiny matmul.
    avg_mat = (jnp.kron(jnp.eye(B_GROUPS, dtype=jnp.float32),
                        jnp.ones((1, SEG_NUM), jnp.float32)) / SEG_NUM)  # (2,10)

    params = (w_sed_split, b_sed_split, w_qkv, b_qkv, wo, bo,
              attn_bias, avg_mat, w_fc, b_fc, w_cls, b_cls)

    logits = scd_forward(x_feat, params)
    logits = jax.block_until_ready(logits)

    ref = scd_reference(
        x_feat, w_sed.astype(jnp.float32), b_sed,
        (wq.astype(jnp.float32), wk.astype(jnp.float32),
         wv.astype(jnp.float32), wo.astype(jnp.float32)),
        (bq, bk, bv, bo), mask, w_fc, b_fc, w_cls, b_cls)
    ref = jax.block_until_ready(ref)

    # atol slightly above 1e-4 to cover bf16 rounding of activations at the three
    # weight-heavy MXU pushes (weights themselves are identical in both paths).
    np.testing.assert_allclose(np.asarray(logits, dtype=np.float32),
                               np.asarray(ref), rtol=1e-3, atol=2e-4)
    print("KERNEL_OK")
</pallas_src>

<mosaic_0001>
module attributes {stable_mosaic.version = 11 : i64} {
  func.func @scd_kernel(%arg0: i32, %arg1: memref<10x16x64xf32, #tpu.memory_space<vmem>>, %arg2: memref<4x64x512xbf16, #tpu.memory_space<vmem>>, %arg3: memref<4x1x512xf32, #tpu.memory_space<vmem>>, %arg4: memref<512x1536xbf16, #tpu.memory_space<vmem>>, %arg5: memref<1x1536xf32, #tpu.memory_space<vmem>>, %arg6: memref<512x512xbf16, #tpu.memory_space<vmem>>, %arg7: memref<1x512xf32, #tpu.memory_space<vmem>>, %arg8: memref<10x10xf32, #tpu.memory_space<vmem>>, %arg9: memref<2x10xf32, #tpu.memory_space<vmem>>, %arg10: memref<512x64xf32, #tpu.memory_space<vmem>>, %arg11: memref<1x64xf32, #tpu.memory_space<vmem>>, %arg12: memref<64x4xf32, #tpu.memory_space<vmem>>, %arg13: memref<1x4xf32, #tpu.memory_space<vmem>>, %arg14: memref<2x4xf32, #tpu.memory_space<vmem>>) attributes {dimension_semantics = [#tpu.dimension_semantics<arbitrary>], iteration_bounds = array<i64: 1>, scalar_prefetch = 0 : i64, scratch_operands = 0 : i64, tpu.core_type = #tpu.core_type<tc>, window_params = [{pipeline_mode = #tpu.pipeline_mode<synchronous>, transform_indices = @transform_0, window_bounds = array<i64: 10, 16, 64>}, {pipeline_mode = #tpu.pipeline_mode<synchronous>, transform_indices = @transform_1, window_bounds = array<i64: 4, 64, 512>}, {pipeline_mode = #tpu.pipeline_mode<synchronous>, transform_indices = @transform_2, window_bounds = array<i64: 4, 1, 512>}, {pipeline_mode = #tpu.pipeline_mode<synchronous>, transform_indices = @transform_3, window_bounds = array<i64: 512, 1536>}, {pipeline_mode = #tpu.pipeline_mode<synchronous>, transform_indices = @transform_4, window_bounds = array<i64: 1, 1536>}, {pipeline_mode = #tpu.pipeline_mode<synchronous>, transform_indices = @transform_5, window_bounds = array<i64: 512, 512>}, {pipeline_mode = #tpu.pipeline_mode<synchronous>, transform_indices = @transform_6, window_bounds = array<i64: 1, 512>}, {pipeline_mode = #tpu.pipeline_mode<synchronous>, transform_indices = @transform_7, window_bounds = array<i64: 10, 10>}, {pipeline_mode = #tpu.pipeline_mode<synchronous>, transform_indices = @transform_8, window_bounds = array<i64: 2, 10>}, {pipeline_mode = #tpu.pipeline_mode<synchronous>, transform_indices = @transform_9, window_bounds = array<i64: 512, 64>}, {pipeline_mode = #tpu.pipeline_mode<synchronous>, transform_indices = @transform_10, window_bounds = array<i64: 1, 64>}, {pipeline_mode = #tpu.pipeline_mode<synchronous>, transform_indices = @transform_11, window_bounds = array<i64: 64, 4>}, {pipeline_mode = #tpu.pipeline_mode<synchronous>, transform_indices = @transform_12, window_bounds = array<i64: 1, 4>}, {pipeline_mode = #tpu.pipeline_mode<synchronous>, transform_indices = @transform_13, window_bounds = array<i64: 2, 4>}]} {
    %c0 = arith.constant 0 : index
    %c0_0 = arith.constant 0 : index
    %c0_1 = arith.constant 0 : index
    %0 = vector.load %arg1[%c0, %c0_0, %c0_1] : memref<10x16x64xf32, #tpu.memory_space<vmem>>, vector<10x16x64xf32>
    %cst = arith.constant dense<0.000000e+00> : vector<10x64xf32>
    %1 = vector.multi_reduction <add>, %0, %cst [1] : vector<10x16x64xf32> to vector<10x64xf32>
    %cst_2 = arith.constant 1.600000e+01 : f32
    %2 = vector.broadcast %cst_2 : f32 to vector<10x64xf32>
    %3 = arith.divf %1, %2 : vector<10x64xf32>
    %4 = arith.truncf %3 : vector<10x64xf32> to vector<10x64xbf16>
    %c0_3 = arith.constant 0 : index
    %c0_4 = arith.constant 0 : index
    %c0_5 = arith.constant 0 : index
    %5 = vector.load %arg2[%c0_3, %c0_4, %c0_5] : memref<4x64x512xbf16, #tpu.memory_space<vmem>>, vector<1x64x512xbf16>
    %6 = vector.shape_cast %5 : vector<1x64x512xbf16> to vector<64x512xbf16>
    %cst_6 = arith.constant dense<0.000000e+00> : vector<10x512xf32>
    %7 = tpu.matmul %4, %6, %cst_6 {dimension_numbers = #tpu.dot_dimension_numbers<[1], [0], [0], [1], [0, 0, 1, 1], [], []>} : vector<10x64xbf16>, vector<64x512xbf16>, vector<10x512xf32> -> vector<10x512xf32>
    %c0_7 = arith.constant 0 : index
    %c0_8 = arith.constant 0 : index
    %c0_9 = arith.constant 0 : index
    %8 = vector.load %arg3[%c0_7, %c0_8, %c0_9] : memref<4x1x512xf32, #tpu.memory_space<vmem>>, vector<1x1x512xf32>
    %9 = vector.shape_cast %8 : vector<1x1x512xf32> to vector<1x512xf32>
    %10 = vector.broadcast %9 : vector<1x512xf32> to vector<10x512xf32>
    %11 = arith.addf %7, %10 : vector<10x512xf32>
    %c1 = arith.constant 1 : index
    %c0_10 = arith.constant 0 : index
    %c0_11 = arith.constant 0 : index
    %12 = vector.load %arg2[%c1, %c0_10, %c0_11] : memref<4x64x512xbf16, #tpu.memory_space<vmem>>, vector<1x64x512xbf16>
    %13 = vector.shape_cast %12 : vector<1x64x512xbf16> to vector<64x512xbf16>
    %cst_12 = arith.constant dense<0.000000e+00> : vector<10x512xf32>
    %14 = tpu.matmul %4, %13, %cst_12 {dimension_numbers = #tpu.dot_dimension_numbers<[1], [0], [0], [1], [0, 0, 1, 1], [], []>} : vector<10x64xbf16>, vector<64x512xbf16>, vector<10x512xf32> -> vector<10x512xf32>
    %c1_13 = arith.constant 1 : index
    %c0_14 = arith.constant 0 : index
    %c0_15 = arith.constant 0 : index
    %15 = vector.load %arg3[%c1_13, %c0_14, %c0_15] : memref<4x1x512xf32, #tpu.memory_space<vmem>>, vector<1x1x512xf32>
    %16 = vector.shape_cast %15 : vector<1x1x512xf32> to vector<1x512xf32>
    %17 = vector.broadcast %16 : vector<1x512xf32> to vector<10x512xf32>
    %18 = arith.addf %14, %17 : vector<10x512xf32>
    %19 = arith.maximumf %11, %18 : vector<10x512xf32>
    %c2 = arith.constant 2 : index
    %c0_16 = arith.constant 0 : index
    %c0_17 = arith.constant 0 : index
    %20 = vector.load %arg2[%c2, %c0_16, %c0_17] : memref<4x64x512xbf16, #tpu.memory_space<vmem>>, vector<1x64x512xbf16>
    %21 = vector.shape_cast %20 : vector<1x64x512xbf16> to vector<64x512xbf16>
    %cst_18 = arith.constant dense<0.000000e+00> : vector<10x512xf32>
    %22 = tpu.matmul %4, %21, %cst_18 {dimension_numbers = #tpu.dot_dimension_numbers<[1], [0], [0], [1], [0, 0, 1, 1], [], []>} : vector<10x64xbf16>, vector<64x512xbf16>, vector<10x512xf32> -> vector<10x512xf32>
    %c2_19 = arith.constant 2 : index
    %c0_20 = arith.constant 0 : index
    %c0_21 = arith.constant 0 : index
    %23 = vector.load %arg3[%c2_19, %c0_20, %c0_21] : memref<4x1x512xf32, #tpu.memory_space<vmem>>, vector<1x1x512xf32>
    %24 = vector.shape_cast %23 : vector<1x1x512xf32> to vector<1x512xf32>
    %25 = vector.broadcast %24 : vector<1x512xf32> to vector<10x512xf32>
    %26 = arith.addf %22, %25 : vector<10x512xf32>
    %27 = arith.maximumf %19, %26 : vector<10x512xf32>
    %c3 = arith.constant 3 : index
    %c0_22 = arith.constant 0 : index
    %c0_23 = arith.constant 0 : index
    %28 = vector.load %arg2[%c3, %c0_22, %c0_23] : memref<4x64x512xbf16, #tpu.memory_space<vmem>>, vector<1x64x512xbf16>
    %29 = vector.shape_cast %28 : vector<1x64x512xbf16> to vector<64x512xbf16>
    %cst_24 = arith.constant dense<0.000000e+00> : vector<10x512xf32>
    %30 = tpu.matmul %4, %29, %cst_24 {dimension_numbers = #tpu.dot_dimension_numbers<[1], [0], [0], [1], [0, 0, 1, 1], [], []>} : vector<10x64xbf16>, vector<64x512xbf16>, vector<10x512xf32> -> vector<10x512xf32>
    %c3_25 = arith.constant 3 : index
    %c0_26 = arith.constant 0 : index
    %c0_27 = arith.constant 0 : index
    %31 = vector.load %arg3[%c3_25, %c0_26, %c0_27] : memref<4x1x512xf32, #tpu.memory_space<vmem>>, vector<1x1x512xf32>
    %32 = vector.shape_cast %31 : vector<1x1x512xf32> to vector<1x512xf32>
    %33 = vector.broadcast %32 : vector<1x512xf32> to vector<10x512xf32>
    %34 = arith.addf %30, %33 : vector<10x512xf32>
    %35 = arith.maximumf %27, %34 : vector<10x512xf32>
    %36 = arith.truncf %35 : vector<10x512xf32> to vector<10x512xbf16>
    %c0_28 = arith.constant 0 : index
    %c0_29 = arith.constant 0 : index
    %37 = vector.load %arg4[%c0_28, %c0_29] : memref<512x1536xbf16, #tpu.memory_space<vmem>>, vector<512x1536xbf16>
    %cst_30 = arith.constant dense<0.000000e+00> : vector<10x1536xf32>
    %38 = tpu.matmul %36, %37, %cst_30 {dimension_numbers = #tpu.dot_dimension_numbers<[1], [0], [0], [1], [0, 0, 1, 1], [], []>} : vector<10x512xbf16>, vector<512x1536xbf16>, vector<10x1536xf32> -> vector<10x1536xf32>
    %c0_31 = arith.constant 0 : index
    %c0_32 = arith.constant 0 : index
    %39 = vector.load %arg5[%c0_31, %c0_32] : memref<1x1536xf32, #tpu.memory_space<vmem>>, vector<1x1536xf32>
    %40 = vector.broadcast %39 : vector<1x1536xf32> to vector<10x1536xf32>
    %41 = arith.addf %38, %40 : vector<10x1536xf32>
    %42 = vector.extract_strided_slice %41 {offsets = [0, 0], sizes = [10, 512], strides = [1, 1]} : vector<10x1536xf32> to vector<10x512xf32>
    %cst_33 = arith.constant 1.250000e-01 : f32
    %43 = vector.broadcast %cst_33 : f32 to vector<10x512xf32>
    %44 = arith.mulf %42, %43 : vector<10x512xf32>
    %45 = vector.extract_strided_slice %41 {offsets = [0, 512], sizes = [10, 512], strides = [1, 1]} : vector<10x1536xf32> to vector<10x512xf32>
    %46 = vector.extract_strided_slice %41 {offsets = [0, 1024], sizes = [10, 512], strides = [1, 1]} : vector<10x1536xf32> to vector<10x512xf32>
    %c0_34 = arith.constant 0 : index
    %c0_35 = arith.constant 0 : index
    %47 = vector.load %arg8[%c0_34, %c0_35] : memref<10x10xf32, #tpu.memory_space<vmem>>, vector<10x10xf32>
    %48 = vector.extract_strided_slice %44 {offsets = [0, 0], sizes = [10, 64], strides = [1, 1]} : vector<10x512xf32> to vector<10x64xf32>
    %49 = vector.extract_strided_slice %45 {offsets = [0, 0], sizes = [10, 64], strides = [1, 1]} : vector<10x512xf32> to vector<10x64xf32>
    %50 = vector.extract_strided_slice %46 {offsets = [0, 0], sizes = [10, 64], strides = [1, 1]} : vector<10x512xf32> to vector<10x64xf32>
    "tpu.trace_start"() <{level = 10 : i32, message = "qd,kd->qk"}> : () -> ()
    %cst_36 = arith.constant dense<0.000000e+00> : vector<10x10xf32>
    %51 = tpu.matmul %48, %49, %cst_36 {dimension_numbers = #tpu.dot_dimension_numbers<[1], [1], [0], [0], [0, 0, 1, 0], [], []>} : vector<10x64xf32>, vector<10x64xf32>, vector<10x10xf32> -> vector<10x10xf32>
    "tpu.trace_stop"() : () -> ()
    %52 = arith.addf %51, %47 : vector<10x10xf32>
    %cst_37 = arith.constant dense<0xFF800000> : vector<10xf32>
    %53 = vector.multi_reduction <maximumf>, %52, %cst_37 [1] : vector<10x10xf32> to vector<10xf32>
    %54 = vector.shape_cast %53 : vector<10xf32> to vector<10x1xf32>
    %55 = vector.broadcast %54 : vector<10x1xf32> to vector<10x10xf32>
    %56 = arith.subf %52, %55 : vector<10x10xf32>
    %57 = math.exp %56 : vector<10x10xf32>
    %cst_38 = arith.constant dense<0.000000e+00> : vector<10xf32>
    %58 = vector.multi_reduction <add>, %57, %cst_38 [1] : vector<10x10xf32> to vector<10xf32>
    %59 = vector.shape_cast %58 : vector<10xf32> to vector<10x1xf32>
    %60 = tpu.reciprocal %59 {approx = true} : vector<10x1xf32> -> vector<10x1xf32>
    %61 = vector.broadcast %60 : vector<10x1xf32> to vector<10x10xf32>
    %62 = arith.mulf %57, %61 : vector<10x10xf32>
    %cst_39 = arith.constant dense<0.000000e+00> : vector<10x64xf32>
    %63 = tpu.matmul %62, %50, %cst_39 {dimension_numbers = #tpu.dot_dimension_numbers<[1], [0], [0], [1], [0, 0, 1, 1], [], []>} : vector<10x10xf32>, vector<10x64xf32>, vector<10x64xf32> -> vector<10x64xf32>
    %64 = vector.extract_strided_slice %44 {offsets = [0, 64], sizes = [10, 64], strides = [1, 1]} : vector<10x512xf32> to vector<10x64xf32>
    %65 = vector.extract_strided_slice %45 {offsets = [0, 64], sizes = [10, 64], strides = [1, 1]} : vector<10x512xf32> to vector<10x64xf32>
    %66 = vector.extract_strided_slice %46 {offsets = [0, 64], sizes = [10, 64], strides = [1, 1]} : vector<10x512xf32> to vector<10x64xf32>
    "tpu.trace_start"() <{level = 10 : i32, message = "qd,kd->qk"}> : () -> ()
    %cst_40 = arith.constant dense<0.000000e+00> : vector<10x10xf32>
    %67 = tpu.matmul %64, %65, %cst_40 {dimension_numbers = #tpu.dot_dimension_numbers<[1], [1], [0], [0], [0, 0, 1, 0], [], []>} : vector<10x64xf32>, vector<10x64xf32>, vector<10x10xf32> -> vector<10x10xf32>
    "tpu.trace_stop"() : () -> ()
    %68 = arith.addf %67, %47 : vector<10x10xf32>
    %cst_41 = arith.constant dense<0xFF800000> : vector<10xf32>
    %69 = vector.multi_reduction <maximumf>, %68, %cst_41 [1] : vector<10x10xf32> to vector<10xf32>
    %70 = vector.shape_cast %69 : vector<10xf32> to vector<10x1xf32>
    %71 = vector.broadcast %70 : vector<10x1xf32> to vector<10x10xf32>
    %72 = arith.subf %68, %71 : vector<10x10xf32>
    %73 = math.exp %72 : vector<10x10xf32>
    %cst_42 = arith.constant dense<0.000000e+00> : vector<10xf32>
    %74 = vector.multi_reduction <add>, %73, %cst_42 [1] : vector<10x10xf32> to vector<10xf32>
    %75 = vector.shape_cast %74 : vector<10xf32> to vector<10x1xf32>
    %76 = tpu.reciprocal %75 {approx = true} : vector<10x1xf32> -> vector<10x1xf32>
    %77 = vector.broadcast %76 : vector<10x1xf32> to vector<10x10xf32>
    %78 = arith.mulf %73, %77 : vector<10x10xf32>
    %cst_43 = arith.constant dense<0.000000e+00> : vector<10x64xf32>
    %79 = tpu.matmul %78, %66, %cst_43 {dimension_numbers = #tpu.dot_dimension_numbers<[1], [0], [0], [1], [0, 0, 1, 1], [], []>} : vector<10x10xf32>, vector<10x64xf32>, vector<10x64xf32> -> vector<10x64xf32>
    %80 = vector.extract_strided_slice %44 {offsets = [0, 128], sizes = [10, 64], strides = [1, 1]} : vector<10x512xf32> to vector<10x64xf32>
    %81 = vector.extract_strided_slice %45 {offsets = [0, 128], sizes = [10, 64], strides = [1, 1]} : vector<10x512xf32> to vector<10x64xf32>
    %82 = vector.extract_strided_slice %46 {offsets = [0, 128], sizes = [10, 64], strides = [1, 1]} : vector<10x512xf32> to vector<10x64xf32>
    "tpu.trace_start"() <{level = 10 : i32, message = "qd,kd->qk"}> : () -> ()
    %cst_44 = arith.constant dense<0.000000e+00> : vector<10x10xf32>
    %83 = tpu.matmul %80, %81, %cst_44 {dimension_numbers = #tpu.dot_dimension_numbers<[1], [1], [0], [0], [0, 0, 1, 0], [], []>} : vector<10x64xf32>, vector<10x64xf32>, vector<10x10xf32> -> vector<10x10xf32>
    "tpu.trace_stop"() : () -> ()
    %84 = arith.addf %83, %47 : vector<10x10xf32>
    %cst_45 = arith.constant dense<0xFF800000> : vector<10xf32>
    %85 = vector.multi_reduction <maximumf>, %84, %cst_45 [1] : vector<10x10xf32> to vector<10xf32>
    %86 = vector.shape_cast %85 : vector<10xf32> to vector<10x1xf32>
    %87 = vector.broadcast %86 : vector<10x1xf32> to vector<10x10xf32>
    %88 = arith.subf %84, %87 : vector<10x10xf32>
    %89 = math.exp %88 : vector<10x10xf32>
    %cst_46 = arith.constant dense<0.000000e+00> : vector<10xf32>
    %90 = vector.multi_reduction <add>, %89, %cst_46 [1] : vector<10x10xf32> to vector<10xf32>
    %91 = vector.shape_cast %90 : vector<10xf32> to vector<10x1xf32>
    %92 = tpu.reciprocal %91 {approx = true} : vector<10x1xf32> -> vector<10x1xf32>
    %93 = vector.broadcast %92 : vector<10x1xf32> to vector<10x10xf32>
    %94 = arith.mulf %89, %93 : vector<10x10xf32>
    %cst_47 = arith.constant dense<0.000000e+00> : vector<10x64xf32>
    %95 = tpu.matmul %94, %82, %cst_47 {dimension_numbers = #tpu.dot_dimension_numbers<[1], [0], [0], [1], [0, 0, 1, 1], [], []>} : vector<10x10xf32>, vector<10x64xf32>, vector<10x64xf32> -> vector<10x64xf32>
    %96 = vector.extract_strided_slice %44 {offsets = [0, 192], sizes = [10, 64], strides = [1, 1]} : vector<10x512xf32> to vector<10x64xf32>
    %97 = vector.extract_strided_slice %45 {offsets = [0, 192], sizes = [10, 64], strides = [1, 1]} : vector<10x512xf32> to vector<10x64xf32>
    %98 = vector.extract_strided_slice %46 {offsets = [0, 192], sizes = [10, 64], strides = [1, 1]} : vector<10x512xf32> to vector<10x64xf32>
    "tpu.trace_start"() <{level = 10 : i32, message = "qd,kd->qk"}> : () -> ()
    %cst_48 = arith.constant dense<0.000000e+00> : vector<10x10xf32>
    %99 = tpu.matmul %96, %97, %cst_48 {dimension_numbers = #tpu.dot_dimension_numbers<[1], [1], [0], [0], [0, 0, 1, 0], [], []>} : vector<10x64xf32>, vector<10x64xf32>, vector<10x10xf32> -> vector<10x10xf32>
    "tpu.trace_stop"() : () -> ()
    %100 = arith.addf %99, %47 : vector<10x10xf32>
    %cst_49 = arith.constant dense<0xFF800000> : vector<10xf32>
    %101 = vector.multi_reduction <maximumf>, %100, %cst_49 [1] : vector<10x10xf32> to vector<10xf32>
    %102 = vector.shape_cast %101 : vector<10xf32> to vector<10x1xf32>
    %103 = vector.broadcast %102 : vector<10x1xf32> to vector<10x10xf32>
    %104 = arith.subf %100, %103 : vector<10x10xf32>
    %105 = math.exp %104 : vector<10x10xf32>
    %cst_50 = arith.constant dense<0.000000e+00> : vector<10xf32>
    %106 = vector.multi_reduction <add>, %105, %cst_50 [1] : vector<10x10xf32> to vector<10xf32>
    %107 = vector.shape_cast %106 : vector<10xf32> to vector<10x1xf32>
    %108 = tpu.reciprocal %107 {approx = true} : vector<10x1xf32> -> vector<10x1xf32>
    %109 = vector.broadcast %108 : vector<10x1xf32> to vector<10x10xf32>
    %110 = arith.mulf %105, %109 : vector<10x10xf32>
    %cst_51 = arith.constant dense<0.000000e+00> : vector<10x64xf32>
    %111 = tpu.matmul %110, %98, %cst_51 {dimension_numbers = #tpu.dot_dimension_numbers<[1], [0], [0], [1], [0, 0, 1, 1], [], []>} : vector<10x10xf32>, vector<10x64xf32>, vector<10x64xf32> -> vector<10x64xf32>
    %112 = vector.extract_strided_slice %44 {offsets = [0, 256], sizes = [10, 64], strides = [1, 1]} : vector<10x512xf32> to vector<10x64xf32>
    %113 = vector.extract_strided_slice %45 {offsets = [0, 256], sizes = [10, 64], strides = [1, 1]} : vector<10x512xf32> to vector<10x64xf32>
    %114 = vector.extract_strided_slice %46 {offsets = [0, 256], sizes = [10, 64], strides = [1, 1]} : vector<10x512xf32> to vector<10x64xf32>
    "tpu.trace_start"() <{level = 10 : i32, message = "qd,kd->qk"}> : () -> ()
    %cst_52 = arith.constant dense<0.000000e+00> : vector<10x10xf32>
    %115 = tpu.matmul %112, %113, %cst_52 {dimension_numbers = #tpu.dot_dimension_numbers<[1], [1], [0], [0], [0, 0, 1, 0], [], []>} : vector<10x64xf32>, vector<10x64xf32>, vector<10x10xf32> -> vector<10x10xf32>
    "tpu.trace_stop"() : () -> ()
    %116 = arith.addf %115, %47 : vector<10x10xf32>
    %cst_53 = arith.constant dense<0xFF800000> : vector<10xf32>
    %117 = vector.multi_reduction <maximumf>, %116, %cst_53 [1] : vector<10x10xf32> to vector<10xf32>
    %118 = vector.shape_cast %117 : vector<10xf32> to vector<10x1xf32>
    %119 = vector.broadcast %118 : vector<10x1xf32> to vector<10x10xf32>
    %120 = arith.subf %116, %119 : vector<10x10xf32>
    %121 = math.exp %120 : vector<10x10xf32>
    %cst_54 = arith.constant dense<0.000000e+00> : vector<10xf32>
    %122 = vector.multi_reduction <add>, %121, %cst_54 [1] : vector<10x10xf32> to vector<10xf32>
    %123 = vector.shape_cast %122 : vector<10xf32> to vector<10x1xf32>
    %124 = tpu.reciprocal %123 {approx = true} : vector<10x1xf32> -> vector<10x1xf32>
    %125 = vector.broadcast %124 : vector<10x1xf32> to vector<10x10xf32>
    %126 = arith.mulf %121, %125 : vector<10x10xf32>
    %cst_55 = arith.constant dense<0.000000e+00> : vector<10x64xf32>
    %127 = tpu.matmul %126, %114, %cst_55 {dimension_numbers = #tpu.dot_dimension_numbers<[1], [0], [0], [1], [0, 0, 1, 1], [], []>} : vector<10x10xf32>, vector<10x64xf32>, vector<10x64xf32> -> vector<10x64xf32>
    %128 = vector.extract_strided_slice %44 {offsets = [0, 320], sizes = [10, 64], strides = [1, 1]} : vector<10x512xf32> to vector<10x64xf32>
    %129 = vector.extract_strided_slice %45 {offsets = [0, 320], sizes = [10, 64], strides = [1, 1]} : vector<10x512xf32> to vector<10x64xf32>
    %130 = vector.extract_strided_slice %46 {offsets = [0, 320], sizes = [10, 64], strides = [1, 1]} : vector<10x512xf32> to vector<10x64xf32>
    "tpu.trace_start"() <{level = 10 : i32, message = "qd,kd->qk"}> : () -> ()
    %cst_56 = arith.constant dense<0.000000e+00> : vector<10x10xf32>
    %131 = tpu.matmul %128, %129, %cst_56 {dimension_numbers = #tpu.dot_dimension_numbers<[1], [1], [0], [0], [0, 0, 1, 0], [], []>} : vector<10x64xf32>, vector<10x64xf32>, vector<10x10xf32> -> vector<10x10xf32>
    "tpu.trace_stop"() : () -> ()
    %132 = arith.addf %131, %47 : vector<10x10xf32>
    %cst_57 = arith.constant dense<0xFF800000> : vector<10xf32>
    %133 = vector.multi_reduction <maximumf>, %132, %cst_57 [1] : vector<10x10xf32> to vector<10xf32>
    %134 = vector.shape_cast %133 : vector<10xf32> to vector<10x1xf32>
    %135 = vector.broadcast %134 : vector<10x1xf32> to vector<10x10xf32>
    %136 = arith.subf %132, %135 : vector<10x10xf32>
    %137 = math.exp %136 : vector<10x10xf32>
    %cst_58 = arith.constant dense<0.000000e+00> : vector<10xf32>
    %138 = vector.multi_reduction <add>, %137, %cst_58 [1] : vector<10x10xf32> to vector<10xf32>
    %139 = vector.shape_cast %138 : vector<10xf32> to vector<10x1xf32>
    %140 = tpu.reciprocal %139 {approx = true} : vector<10x1xf32> -> vector<10x1xf32>
    %141 = vector.broadcast %140 : vector<10x1xf32> to vector<10x10xf32>
    %142 = arith.mulf %137, %141 : vector<10x10xf32>
    %cst_59 = arith.constant dense<0.000000e+00> : vector<10x64xf32>
    %143 = tpu.matmul %142, %130, %cst_59 {dimension_numbers = #tpu.dot_dimension_numbers<[1], [0], [0], [1], [0, 0, 1, 1], [], []>} : vector<10x10xf32>, vector<10x64xf32>, vector<10x64xf32> -> vector<10x64xf32>
    %144 = vector.extract_strided_slice %44 {offsets = [0, 384], sizes = [10, 64], strides = [1, 1]} : vector<10x512xf32> to vector<10x64xf32>
    %145 = vector.extract_strided_slice %45 {offsets = [0, 384], sizes = [10, 64], strides = [1, 1]} : vector<10x512xf32> to vector<10x64xf32>
    %146 = vector.extract_strided_slice %46 {offsets = [0, 384], sizes = [10, 64], strides = [1, 1]} : vector<10x512xf32> to vector<10x64xf32>
    "tpu.trace_start"() <{level = 10 : i32, message = "qd,kd->qk"}> : () -> ()
    %cst_60 = arith.constant dense<0.000000e+00> : vector<10x10xf32>
    %147 = tpu.matmul %144, %145, %cst_60 {dimension_numbers = #tpu.dot_dimension_numbers<[1], [1], [0], [0], [0, 0, 1, 0], [], []>} : vector<10x64xf32>, vector<10x64xf32>, vector<10x10xf32> -> vector<10x10xf32>
    "tpu.trace_stop"() : () -> ()
    %148 = arith.addf %147, %47 : vector<10x10xf32>
    %cst_61 = arith.constant dense<0xFF800000> : vector<10xf32>
    %149 = vector.multi_reduction <maximumf>, %148, %cst_61 [1] : vector<10x10xf32> to vector<10xf32>
    %150 = vector.shape_cast %149 : vector<10xf32> to vector<10x1xf32>
    %151 = vector.broadcast %150 : vector<10x1xf32> to vector<10x10xf32>
    %152 = arith.subf %148, %151 : vector<10x10xf32>
    %153 = math.exp %152 : vector<10x10xf32>
    %cst_62 = arith.constant dense<0.000000e+00> : vector<10xf32>
    %154 = vector.multi_reduction <add>, %153, %cst_62 [1] : vector<10x10xf32> to vector<10xf32>
    %155 = vector.shape_cast %154 : vector<10xf32> to vector<10x1xf32>
    %156 = tpu.reciprocal %155 {approx = true} : vector<10x1xf32> -> vector<10x1xf32>
    %157 = vector.broadcast %156 : vector<10x1xf32> to vector<10x10xf32>
    %158 = arith.mulf %153, %157 : vector<10x10xf32>
    %cst_63 = arith.constant dense<0.000000e+00> : vector<10x64xf32>
    %159 = tpu.matmul %158, %146, %cst_63 {dimension_numbers = #tpu.dot_dimension_numbers<[1], [0], [0], [1], [0, 0, 1, 1], [], []>} : vector<10x10xf32>, vector<10x64xf32>, vector<10x64xf32> -> vector<10x64xf32>
    %160 = vector.extract_strided_slice %44 {offsets = [0, 448], sizes = [10, 64], strides = [1, 1]} : vector<10x512xf32> to vector<10x64xf32>
    %161 = vector.extract_strided_slice %45 {offsets = [0, 448], sizes = [10, 64], strides = [1, 1]} : vector<10x512xf32> to vector<10x64xf32>
    %162 = vector.extract_strided_slice %46 {offsets = [0, 448], sizes = [10, 64], strides = [1, 1]} : vector<10x512xf32> to vector<10x64xf32>
    "tpu.trace_start"() <{level = 10 : i32, message = "qd,kd->qk"}> : () -> ()
    %cst_64 = arith.constant dense<0.000000e+00> : vector<10x10xf32>
    %163 = tpu.matmul %160, %161, %cst_64 {dimension_numbers = #tpu.dot_dimension_numbers<[1], [1], [0], [0], [0, 0, 1, 0], [], []>} : vector<10x64xf32>, vector<10x64xf32>, vector<10x10xf32> -> vector<10x10xf32>
    "tpu.trace_stop"() : () -> ()
    %164 = arith.addf %163, %47 : vector<10x10xf32>
    %cst_65 = arith.constant dense<0xFF800000> : vector<10xf32>
    %165 = vector.multi_reduction <maximumf>, %164, %cst_65 [1] : vector<10x10xf32> to vector<10xf32>
    %166 = vector.shape_cast %165 : vector<10xf32> to vector<10x1xf32>
    %167 = vector.broadcast %166 : vector<10x1xf32> to vector<10x10xf32>
    %168 = arith.subf %164, %167 : vector<10x10xf32>
    %169 = math.exp %168 : vector<10x10xf32>
    %cst_66 = arith.constant dense<0.000000e+00> : vector<10xf32>
    %170 = vector.multi_reduction <add>, %169, %cst_66 [1] : vector<10x10xf32> to vector<10xf32>
    %171 = vector.shape_cast %170 : vector<10xf32> to vector<10x1xf32>
    %172 = tpu.reciprocal %171 {approx = true} : vector<10x1xf32> -> vector<10x1xf32>
    %173 = vector.broadcast %172 : vector<10x1xf32> to vector<10x10xf32>
    %174 = arith.mulf %169, %173 : vector<10x10xf32>
    %cst_67 = arith.constant dense<0.000000e+00> : vector<10x64xf32>
    %175 = tpu.matmul %174, %162, %cst_67 {dimension_numbers = #tpu.dot_dimension_numbers<[1], [0], [0], [1], [0, 0, 1, 1], [], []>} : vector<10x10xf32>, vector<10x64xf32>, vector<10x64xf32> -> vector<10x64xf32>
    %176 = tpu.concatenate %63, %79, %95, %111, %127, %143, %159, %175 in 1 : vector<10x64xf32>, vector<10x64xf32>, vector<10x64xf32>, vector<10x64xf32>, vector<10x64xf32>, vector<10x64xf32>, vector<10x64xf32>, vector<10x64xf32> -> vector<10x512xf32>
    %177 = arith.truncf %176 : vector<10x512xf32> to vector<10x512xbf16>
    %c0_68 = arith.constant 0 : index
    %c0_69 = arith.constant 0 : index
    %178 = vector.load %arg6[%c0_68, %c0_69] : memref<512x512xbf16, #tpu.memory_space<vmem>>, vector<512x512xbf16>
    %cst_70 = arith.constant dense<0.000000e+00> : vector<10x512xf32>
    %179 = tpu.matmul %177, %178, %cst_70 {dimension_numbers = #tpu.dot_dimension_numbers<[1], [0], [0], [1], [0, 0, 1, 1], [], []>} : vector<10x512xbf16>, vector<512x512xbf16>, vector<10x512xf32> -> vector<10x512xf32>
    %c0_71 = arith.constant 0 : index
    %c0_72 = arith.constant 0 : index
    %180 = vector.load %arg7[%c0_71, %c0_72] : memref<1x512xf32, #tpu.memory_space<vmem>>, vector<1x512xf32>
    %181 = vector.broadcast %180 : vector<1x512xf32> to vector<10x512xf32>
    %182 = arith.addf %179, %181 : vector<10x512xf32>
    %c0_73 = arith.constant 0 : index
    %c0_74 = arith.constant 0 : index
    %183 = vector.load %arg10[%c0_73, %c0_74] : memref<512x64xf32, #tpu.memory_space<vmem>>, vector<512x64xf32>
    %cst_75 = arith.constant dense<0.000000e+00> : vector<10x64xf32>
    %184 = tpu.matmul %182, %183, %cst_75 {dimension_numbers = #tpu.dot_dimension_numbers<[1], [0], [0], [1], [0, 0, 1, 1], [], []>} : vector<10x512xf32>, vector<512x64xf32>, vector<10x64xf32> -> vector<10x64xf32>
    %c0_76 = arith.constant 0 : index
    %c0_77 = arith.constant 0 : index
    %185 = vector.load %arg11[%c0_76, %c0_77] : memref<1x64xf32, #tpu.memory_space<vmem>>, vector<1x64xf32>
    %186 = vector.broadcast %185 : vector<1x64xf32> to vector<10x64xf32>
    %187 = arith.addf %184, %186 : vector<10x64xf32>
    %cst_78 = arith.constant 0.000000e+00 : f32
    %188 = vector.broadcast %cst_78 : f32 to vector<10x64xf32>
    %189 = arith.maximumf %187, %188 : vector<10x64xf32>
    %c0_79 = arith.constant 0 : index
    %c0_80 = arith.constant 0 : index
    %190 = vector.load %arg9[%c0_79, %c0_80] : memref<2x10xf32, #tpu.memory_space<vmem>>, vector<2x10xf32>
    %cst_81 = arith.constant dense<0.000000e+00> : vector<2x64xf32>
    %191 = tpu.matmul %190, %189, %cst_81 {dimension_numbers = #tpu.dot_dimension_numbers<[1], [0], [0], [1], [0, 0, 1, 1], [], []>} : vector<2x10xf32>, vector<10x64xf32>, vector<2x64xf32> -> vector<2x64xf32>
    %c0_82 = arith.constant 0 : index
    %c0_83 = arith.constant 0 : index
    %192 = vector.load %arg12[%c0_82, %c0_83] : memref<64x4xf32, #tpu.memory_space<vmem>>, vector<64x4xf32>
    %cst_84 = arith.constant dense<0.000000e+00> : vector<2x4xf32>
    %193 = tpu.matmul %191, %192, %cst_84 {dimension_numbers = #tpu.dot_dimension_numbers<[1], [0], [0], [1], [0, 0, 1, 1], [], []>} : vector<2x64xf32>, vector<64x4xf32>, vector<2x4xf32> -> vector<2x4xf32>
    %c0_85 = arith.constant 0 : index
    %c0_86 = arith.constant 0 : index
    %194 = vector.load %arg13[%c0_85, %c0_86] : memref<1x4xf32, #tpu.memory_space<vmem>>, vector<1x4xf32>
    %195 = vector.broadcast %194 : vector<1x4xf32> to vector<2x4xf32>
    %196 = arith.addf %193, %195 : vector<2x4xf32>
    %c0_87 = arith.constant 0 : index
    %c0_88 = arith.constant 0 : index
    %197 = vector.load %arg14[%c0_87, %c0_88] : memref<2x4xf32, #tpu.memory_space<vmem>>, vector<2x4xf32>
    tpu.vector_store %arg14[%c0_87, %c0_88], %196 {strides = array<i32>} : memref<2x4xf32, #tpu.memory_space<vmem>>, vector<2x4xf32>,
    return
  }
  func.func @transform_0(%arg0: i32) -> (i32, i32, i32) {
    %c0_i32 = arith.constant 0 : i32
    %c0_i32_0 = arith.constant 0 : i32
    %c0_i32_1 = arith.constant 0 : i32
    %c0_i32_2 = arith.constant 0 : i32
    return %c0_i32, %c0_i32_0, %c0_i32_1 : i32, i32, i32
  }
  func.func @transform_1(%arg0: i32) -> (i32, i32, i32) {
    %c0_i32 = arith.constant 0 : i32
    %c0_i32_0 = arith.constant 0 : i32
    %c0_i32_1 = arith.constant 0 : i32
    %c0_i32_2 = arith.constant 0 : i32
    return %c0_i32, %c0_i32_0, %c0_i32_1 : i32, i32, i32
  }
  func.func @transform_2(%arg0: i32) -> (i32, i32, i32) {
    %c0_i32 = arith.constant 0 : i32
    %c0_i32_0 = arith.constant 0 : i32
    %c0_i32_1 = arith.constant 0 : i32
    %c0_i32_2 = arith.constant 0 : i32
    return %c0_i32, %c0_i32_0, %c0_i32_1 : i32, i32, i32
  }
  func.func @transform_3(%arg0: i32) -> (i32, i32) {
    %c0_i32 = arith.constant 0 : i32
    %c0_i32_0 = arith.constant 0 : i32
    %c0_i32_1 = arith.constant 0 : i32
    return %c0_i32, %c0_i32_0 : i32, i32
  }
  func.func @transform_4(%arg0: i32) -> (i32, i32) {
    %c0_i32 = arith.constant 0 : i32
    %c0_i32_0 = arith.constant 0 : i32
    %c0_i32_1 = arith.constant 0 : i32
    return %c0_i32, %c0_i32_0 : i32, i32
  }
  func.func @transform_5(%arg0: i32) -> (i32, i32) {
    %c0_i32 = arith.constant 0 : i32
    %c0_i32_0 = arith.constant 0 : i32
    %c0_i32_1 = arith.constant 0 : i32
    return %c0_i32, %c0_i32_0 : i32, i32
  }
  func.func @transform_6(%arg0: i32) -> (i32, i32) {
    %c0_i32 = arith.constant 0 : i32
    %c0_i32_0 = arith.constant 0 : i32
    %c0_i32_1 = arith.constant 0 : i32
    return %c0_i32, %c0_i32_0 : i32, i32
  }
  func.func @transform_7(%arg0: i32) -> (i32, i32) {
    %c0_i32 = arith.constant 0 : i32
    %c0_i32_0 = arith.constant 0 : i32
    %c0_i32_1 = arith.constant 0 : i32
    return %c0_i32, %c0_i32_0 : i32, i32
  }
  func.func @transform_8(%arg0: i32) -> (i32, i32) {
    %c0_i32 = arith.constant 0 : i32
    %c0_i32_0 = arith.constant 0 : i32
    %c0_i32_1 = arith.constant 0 : i32
    return %c0_i32, %c0_i32_0 : i32, i32
  }
  func.func @transform_9(%arg0: i32) -> (i32, i32) {
    %c0_i32 = arith.constant 0 : i32
    %c0_i32_0 = arith.constant 0 : i32
    %c0_i32_1 = arith.constant 0 : i32
    return %c0_i32, %c0_i32_0 : i32, i32
  }
  func.func @transform_10(%arg0: i32) -> (i32, i32) {
    %c0_i32 = arith.constant 0 : i32
    %c0_i32_0 = arith.constant 0 : i32
    %c0_i32_1 = arith.constant 0 : i32
    return %c0_i32, %c0_i32_0 : i32, i32
  }
  func.func @transform_11(%arg0: i32) -> (i32, i32) {
    %c0_i32 = arith.constant 0 : i32
    %c0_i32_0 = arith.constant 0 : i32
    %c0_i32_1 = arith.constant 0 : i32
    return %c0_i32, %c0_i32_0 : i32, i32
  }
  func.func @transform_12(%arg0: i32) -> (i32, i32) {
    %c0_i32 = arith.constant 0 : i32
    %c0_i32_0 = arith.constant 0 : i32
    %c0_i32_1 = arith.constant 0 : i32
    return %c0_i32, %c0_i32_0 : i32, i32
  }
  func.func @transform_13(%arg0: i32) -> (i32, i32) {
    %c0_i32 = arith.constant 0 : i32
    %c0_i32_0 = arith.constant 0 : i32
    %c0_i32_1 = arith.constant 0 : i32
    return %c0_i32, %c0_i32_0 : i32, i32
  }
}

</mosaic_0001>

<bundles_post_ra>
// kernel: tpu_custom_call.1
= control target key start
LH: loop header
LB: loop body
LE: loop exit
PB: predicated region body
PF: predicated region fallthrough
CT: control target
= control target key end

     0   :  { %18 = vsyncpa [#allocation3], 0  ;;  %s10519_s0 = inlined_call_operand.hbm [shape: f32[10,16,64], index: 0, kind: input, shape index: {}]   ;;  %s10520_s1 = inlined_call_operand.hbm [shape: bf16[4,64,512], index: 1, kind: input, shape index: {}]   ;;  %s10521_s2 = inlined_call_operand.hbm [shape: f32[4,1,512], index: 2, kind: input, shape index: {}]   ;;  %s10522_s3 = inlined_call_operand.hbm [shape: bf16[512,1536], index: 3, kind: input, shape index: {}]   ;;  %s10523_s4 = inlined_call_operand.hbm [shape: f32[1,1536], index: 4, kind: input, shape index: {}]   ;;  %s10524_s5 = inlined_call_operand.hbm [shape: bf16[512,512], index: 5, kind: input, shape index: {}]   ;;  %s10525_s6 = inlined_call_operand.hbm [shape: f32[1,512], index: 6, kind: input, shape index: {}]   ;;  %s10526_s7 = inlined_call_operand.hbm [shape: f32[10,10], index: 7, kind: input, shape index: {}]   ;;  %s10527_s8 = inlined_call_operand.hbm [shape: f32[2,10], index: 8, kind: input, shape index: {}]   ;;  %s10528_s9 = inlined_call_operand.vmem [shape: f32[512,64], index: 9, kind: input, shape index: {}]   ;;  %s10529_s10 = inlined_call_operand.hbm [shape: f32[1,64], index: 10, kind: input, shape index: {}]   ;;  %s10530_s11 = inlined_call_operand.vmem [shape: f32[64,4], index: 11, kind: input, shape index: {}]   ;;  %s10531_s12 = inlined_call_operand.hbm [shape: f32[1,4], index: 12, kind: input, shape index: {}]   ;;  %s10532_s13 = inlined_call_operand.hbm [shape: f32[2,4], index: 13, kind: output, shape index: {}]  }
   0x1   :  { %19 = vsyncpa [#allocation6], 0 }
   0x2   :  { %20 = vsyncpa [#allocation9], 0 }
   0x3   :  { %21 = vsyncpa [#allocation12], 0 }
   0x4   :  { %22 = vsyncpa [#allocation15], 0 }
   0x5   :  { %23 = vsyncpa [#allocation18], 0  ;;  %s42_s27 = sshll.u32 %s10520_s1, 4  ;;  %s43_s27 = int_to_ptr.hbm [resolvable:$true] %s42_s27 }
   0x6   :  { %24 = vsyncpa [#allocation4], 0  ;;  %s9502_s28 = smov [#allocation5]   ;;  %s68_s15 = sshll.u32 %s10522_s3, 4  ;;  %s69_s15 = int_to_ptr.hbm [resolvable:$true] %s68_s15 }
   0x7   :  { %s44_s29 = sshll.u32 %s9502_s28, 4  ;;  %s9503_s16 = smov 256   ;;  %s45_s29 = int_to_ptr.vmem [resolvable:$true] %s44_s29 }
   0x8   :  { %s9504_s17 = smov 16   ;;  %s9505_s18 = smov [#allocation8]  }
   0x9   :  { %50 = dma.hbm_to_vmem [thread:$0]  %s43_s27, 8192, %s45_s29, [#allocation6], %s9503_s16, %s9503_s16, %s9504_s17  }
   0xa   :  { %s70_s19 = sshll.u32 %s9505_s18, 4  ;;  %s9506_s20 = smov 768   ;;  %s71_s19 = int_to_ptr.vmem [resolvable:$true] %s70_s19 }
   0xb   :  { %s9507_s21 = smov 48   ;;  %s92_s23 = sshll.u32 %s10524_s5, 4  ;;  %s93_s23 = int_to_ptr.hbm [resolvable:$true] %s92_s23 }
   0xc   :  { %76 = dma.hbm_to_vmem [thread:$0]  %s69_s15, 49152, %s71_s19, [#allocation9], %s9506_s20, %s9506_s20, %s9507_s21  }
   0xd   :  { %s9508_s24 = smov [#allocation11]   ;;  %s116_s27 = sshll.u32 %s10526_s7, 4  ;;  %s117_s27 = int_to_ptr.hbm [resolvable:$true] %s116_s27 }
   0xe   :  { %s94_s25 = sshll.u32 %s9508_s24, 4  ;;  %s9509_s28 = smov [#allocation14]   ;;  %s95_s25 = int_to_ptr.vmem [resolvable:$true] %s94_s25 }
   0xf   :  { %100 = dma.hbm_to_vmem [thread:$0]  %s93_s23, 16384, %s95_s25, [#allocation12], %s9503_s16, %s9503_s16, %s9504_s17  }
  0x10   :  { %s118_s29 = sshll.u32 %s9509_s28, 4  ;;  %s143_s15 = sshll.u32 %s10529_s10, 4  ;;  %s119_s29 = int_to_ptr.vmem [resolvable:$true] %s118_s29  ;;  %s144_s15 = int_to_ptr.hbm [resolvable:$true] %s143_s15 }
  0x11   :  { %s9510_s18 = smov 128   ;;  %s9511_s5 = smov 8  }
  0x12   :  { %124 = dma.hbm_to_vmem [thread:$0]  %s117_s27, 256, %s119_s29, [#allocation15], %s9510_s18, %s9510_s18, %s9511_s5  }
  0x13   :  { %s29_s16 = sshll.u32 %s10519_s0, 4  ;;  %s9512_s17 = smov [#allocation17]   ;;  %s30_s16 = int_to_ptr.hbm [resolvable:$true] %s29_s16 }
  0x14   :  { %s145_s21 = sshll.u32 %s9512_s17, 4  ;;  %s9513_s7 = smov [#allocation2]   ;;  %s146_s21 = int_to_ptr.vmem [resolvable:$true] %s145_s21 }
  0x15   :  { %148 = dma.hbm_to_vmem [thread:$0]  %s144_s15, 16, %s146_s21, [#allocation18]  }
  0x16   :  { %s31_s1 = sshll.u32 %s9513_s7, 4  ;;  %s55_s10 = sshll.u32 %s10521_s2, 4  ;;  %s32_s1 = int_to_ptr.vmem [resolvable:$true] %s31_s1  ;;  %s56_s10 = int_to_ptr.hbm [resolvable:$true] %s55_s10 }
  0x17   :  { %37 = dma.hbm_to_vmem [thread:$0]  %s30_s16, 2560, %s32_s1, [#allocation3], %s9510_s18, %s9510_s18, %s9511_s5  }
  0x18   :  { %s9514_s24 = smov [#allocation7]   ;;  %s82_s0 = sshll.u32 %s10523_s4, 4  ;;  %s83_s0 = int_to_ptr.hbm [resolvable:$true] %s82_s0 }
  0x19   :  { %s57_s25 = sshll.u32 %s9514_s24, 4  ;;  %s9515_s27 = smov 64   ;;  %s58_s25 = int_to_ptr.vmem [resolvable:$true] %s57_s25 }
  0x1a   :  { %s9516_s28 = smov 4   ;;  %s9517_s29 = smov [#allocation10]  }
  0x1b   :  { %63 = dma.hbm_to_vmem [thread:$0]  %s56_s10, 256, %s58_s25, [#allocation6], %s9515_s27, %s9515_s27, %s9516_s28  }
  0x1c   :  { %s84_s30 = sshll.u32 %s9517_s29, 4  ;;  %s106_s15 = sshll.u32 %s10525_s6, 4  ;;  %s85_s30 = int_to_ptr.vmem [resolvable:$true] %s84_s30  ;;  %s107_s15 = int_to_ptr.hbm [resolvable:$true] %s106_s15 }
  0x1d   :  { %87 = dma.hbm_to_vmem [thread:$0]  %s83_s0, 192, %s85_s30, [#allocation9]  }
  0x1e   :  { %s130_s19 = sshll.u32 %s10527_s8, 4  ;;  %s9518_s4 = smov [#allocation13]   ;;  %s131_s19 = int_to_ptr.hbm [resolvable:$true] %s130_s19 }
  0x1f   :  { %s108_s20 = sshll.u32 %s9518_s4, 4  ;;  %s9519_s16 = smov [#allocation16]   ;;  %s109_s20 = int_to_ptr.vmem [resolvable:$true] %s108_s20 }
  0x20   :  { %111 = dma.hbm_to_vmem [thread:$0]  %s107_s15, 64, %s109_s20, [#allocation12]  }
  0x21   :  { %s132_s17 = sshll.u32 %s9519_s16, 4  ;;  %s156_s1 = sshll.u32 %s10531_s12, 4  ;;  %s133_s17 = int_to_ptr.vmem [resolvable:$true] %s132_s17  ;;  %s157_s1 = int_to_ptr.hbm [resolvable:$true] %s156_s1 }
  0x22   :  { %135 = dma.hbm_to_vmem [thread:$0]  %s131_s19, 32, %s133_s17, [#allocation15]  }
  0x23   :  { %s9520_s6 = smov [#allocation19]  }
  0x24   :  { %s158_s22 = sshll.u32 %s9520_s6, 4  ;;  %s159_s22 = int_to_ptr.vmem [resolvable:$true] %s158_s22 }
  0x25   :  { %161 = dma.hbm_to_vmem [thread:$0]  %s157_s1, 16, %s159_s22, [#allocation18]  }
  0x26   :  { %9488 = dma.done.wait [#allocation3], 2560  }
  0x27   :  { %9489 = vsyncadd [#allocation3], 4294964736 }
  0x28   :  { %9490 = dma.done.wait [#allocation6], 8448  }
  0x29   :  { %9491 = vsyncadd [#allocation6], 4294958848 }
  0x2a   :  { %9492 = dma.done.wait [#allocation9], 49344  }
  0x2b   :  { %9493 = vsyncadd [#allocation9], 4294917952 }
  0x2c   :  { %9494 = dma.done.wait [#allocation12], 16448  }
  0x2d   :  { %9495 = vsyncadd [#allocation12], 4294950848 }
  0x2e   :  { %9496 = dma.done.wait [#allocation15], 288  }
  0x2f   :  { %9497 = vsyncadd [#allocation15], 4294967008 }
  0x30   :  { %9498 = dma.done.wait [#allocation18], 32  }
  0x31   :  { %9499 = vsyncadd [#allocation18], 4294967264  ;;  %v6175_v0 = vld [vmem:[#allocation5 + $0x60] sm:$0xf]  ;;  %v8518_v1 = vld [vmem:[#allocation5 + $0x6c] sm:$0xf0] }
  0x32   :  { %v8516_v2 = vld [vmem:[#allocation5 + $0x64] sm:$0xf]  ;;  %vm227_vm0 = vcmask 523264   ;;  %v6176_v3 = vor.u32 %v8518_v1, %v6175_v0  ;;  %v6177_v4 = vld [vmem:[#allocation5 + $0x70] sm:$0xf0]  ;;  %v9521_v45 = vmov 16.0  }
  0x33   :  { %v6183_v5 = vld [vmem:[#allocation5 + $0x68] sm:$0xf]  ;;  %v8519_v6 = vld [vmem:[#allocation5 + $0x74] sm:$0xf0]  ;;  %v6180_v7 = vor.u32 %v8516_v2, %v6177_v4  ;;  %v8517_v9 = vld [vmem:[#allocation5 + $0x6c] sm:$0xf]  ;;  %9133 = vrcp.f32 %v9521_v45 }
  0x34   :  { %v6184_v8 = vor.u32 %v8519_v6, %v6183_v5  ;;  %v6185_v10 = vld [vmem:[#allocation5 + $0x78] sm:$0xf0]  ;;  %v6159_v11 = vld [vmem:[#allocation5 + $0x40] sm:$0xf]  ;;  %494 = vmatpush.bf16.msra.mxu0 %v6176_v3  ;;  %v8514_v13 = vld [vmem:[#allocation5 + $0x4c] sm:$0xf0] }
  0x35   :  { %v6188_v12 = vor.u32 %v8517_v9, %v6185_v10  ;;  %v8512_v14 = vld [vmem:[#allocation5 + $0x44] sm:$0xf]  ;;  %v6161_v15 = vld [vmem:[#allocation5 + $0x50] sm:$0xf0]  ;;  %508 = vmatpush.bf16.msra.mxu1 %v6180_v7  ;;  %v6160_v16 = vor.u32 %v8514_v13, %v6159_v11  ;;  %v6167_v18 = vld [vmem:[#allocation5 + $0x48] sm:$0xf] }
  0x36   :  { %522 = vmatpush.bf16.msra.mxu2 %v6184_v8  ;;  %v6164_v17 = vor.u32 %v8512_v14, %v6161_v15  ;;  %v8515_v19 = vld [vmem:[#allocation5 + $0x54] sm:$0xf0]  ;;  %v8513_v20 = vld [vmem:[#allocation5 + $0x4c] sm:$0xf]  ;;  %v6169_v22 = vld [vmem:[#allocation5 + $0x58] sm:$0xf0] }
  0x37   :  { %536 = vmatpush.bf16.msra.mxu3 %v6188_v12  ;;  %v6168_v21 = vor.u32 %v8515_v19, %v6167_v18  ;;  %v6143_v23 = vld [vmem:[#allocation5 + $0x20] sm:$0xf]  ;;  %v8510_v24 = vld [vmem:[#allocation5 + $0x2c] sm:$0xf0]  ;;  %v6172_v25 = vor.u32 %v8513_v20, %v6169_v22  ;;  %v8508_v26 = vld [vmem:[#allocation5 + $0x24] sm:$0xf] }
  0x38   :  { %v6145_v27 = vld [vmem:[#allocation5 + $0x30] sm:$0xf0]  ;;  %v6151_v28 = vld [vmem:[#allocation5 + $0x28] sm:$0xf]  ;;  %495 = vmatpush.bf16.msra.mxu0 %v6160_v16  ;;  %v6144_v29 = vor.u32 %v8510_v24, %v6143_v23  ;;  %v8511_v30 = vld [vmem:[#allocation5 + $0x34] sm:$0xf0] }
  0x39   :  { %v8509_v31 = vld [vmem:[#allocation5 + $0x2c] sm:$0xf]  ;;  %v6153_v32 = vld [vmem:[#allocation5 + $0x38] sm:$0xf0]  ;;  %509 = vmatpush.bf16.msra.mxu1 %v6164_v17  ;;  %v6148_v33 = vor.u32 %v8508_v26, %v6145_v27  ;;  %v6152_v34 = vor.u32 %v8511_v30, %v6151_v28  ;;  %v6127_v35 = vld [vmem:[#allocation5] sm:$0xf]  ;;  %v9638_v15 = vpop.eup %9133 }
  0x3a   :  { %523 = vmatpush.bf16.msra.mxu2 %v6168_v21  ;;  %v8506_v36 = vld [vmem:[#allocation5 + $0xc] sm:$0xf0]  ;;  %v8504_v37 = vld [vmem:[#allocation5 + $0x4] sm:$0xf]  ;;  %v6156_v38 = vor.u32 %v8509_v31, %v6153_v32  ;;  %v6129_v39 = vld [vmem:[#allocation5 + $0x10] sm:$0xf0]  ;;  %vm323_vm1 = vweird.f32 %v9638_v15 }
  0x3b   :  { %537 = vmatpush.bf16.msra.mxu3 %v6172_v25  ;;  %v6135_v40 = vld [vmem:[#allocation5 + $0x8] sm:$0xf]  ;;  %v8507_v41 = vld [vmem:[#allocation5 + $0x14] sm:$0xf0]  ;;  %v8505_v42 = vld [vmem:[#allocation5 + $0xc] sm:$0xf]  ;;  %v6128_v46 = vor.u32 %v8506_v36, %v6127_v35  ;;  %v6132_v47 = vor.u32 %v8504_v37, %v6129_v39 }
  0x3c   :  { %v6137_v43 = vld [vmem:[#allocation5 + $0x18] sm:$0xf0]  ;;  %v207_v44 = vld [vmem:[#allocation2] sm:$0xff]  ;;  %496 = vmatpush.bf16.msra.mxu0 %v6144_v29  ;;  %v6136_v48 = vor.u32 %v8507_v41, %v6135_v40  ;;  %v208_v49 = vld [vmem:[#allocation2 + $0x8] sm:$0xff]  ;;  %vm391_vm2 = vcmask 1041409   ;;  %vm393_vm3 = vcmask 1042434  }
  0x3d   :  { %v209_v50 = vld [vmem:[#allocation2 + $0x10] sm:$0xff]  ;;  %v210_v51 = vld [vmem:[#allocation2 + $0x18] sm:$0xff]  ;;  %v228_v52 = vsel %vm227_vm0, %v207_v44, 0.0  ;;  %510 = vmatpush.bf16.msra.mxu1 %v6148_v33  ;;  %v6140_v53 = vor.u32 %v8505_v42, %v6137_v43  ;;  %v211_v54 = vld [vmem:[#allocation2 + $0x20] sm:$0xff]  ;;  %v229_v57 = vsel %vm227_vm0, %v208_v49, 0.0  ;;  %vm395_vm4 = vcmask 1043459  }
  0x3e   :  { %524 = vmatpush.bf16.msra.mxu2 %v6152_v34  ;;  %v212_v55 = vld [vmem:[#allocation2 + $0x28] sm:$0xff]  ;;  %v213_v56 = vld [vmem:[#allocation2 + $0x30] sm:$0xff]  ;;  %v237_v58 = vsel %vm227_vm0, %v209_v50, 0.0  ;;  %v238_v59 = vsel %vm227_vm0, %v210_v51, 0.0  ;;  %v214_v60 = vld [vmem:[#allocation2 + $0x38] sm:$0xff]  ;;  %v230_v63 = vadd.f32 %v229_v57, %v228_v52  ;;  %v246_v1 = vsel %vm227_vm0, %v211_v54, 0.0 }
  0x3f   :  { %538 = vmatpush.bf16.msra.mxu3 %v6156_v38  ;;  %v215_v61 = vld [vmem:[#allocation2 + $0x40] sm:$0xff]  ;;  %v216_v62 = vld [vmem:[#allocation2 + $0x48] sm:$0xff]  ;;  %v239_v0 = vadd.f32 %v238_v59, %v237_v58  ;;  %v247_v2 = vsel %vm227_vm0, %v212_v55, 0.0  ;;  %v217_v3 = vld [vmem:[#allocation2 + $0x50] sm:$0xff]  ;;  %v255_v6 = vsel %vm227_vm0, %v213_v56, 0.0  ;;  %v256_v7 = vsel %vm227_vm0, %v214_v60, 0.0 }
  0x40   :  { %v218_v4 = vld [vmem:[#allocation2 + $0x58] sm:$0xff]  ;;  %v248_v5 = vadd.f32 %v247_v2, %v246_v1  ;;  %v264_v8 = vsel %vm227_vm0, %v215_v61, 0.0  ;;  %497 = vmatpush.bf16.msra.mxu0 %v6128_v46  ;;  %v219_v9 = vld [vmem:[#allocation2 + $0x60] sm:$0xff]  ;;  %v220_v10 = vld [vmem:[#allocation2 + $0x68] sm:$0xff]  ;;  %v231_v11 = vrot.slane %v230_v63, 4  ;;  %v257_v13 = vadd.f32 %v256_v7, %v255_v6  ;;  %s6110_s3 = sshll.u32 %s10532_s13, 4  ;;  %s6111_s3 = int_to_ptr.hbm [resolvable:$true] %s6110_s3 }
  0x41   :  { %v240_v12 = vrot.slane %v239_v0, 4  ;;  %v265_v14 = vsel %vm227_vm0, %v216_v62, 0.0  ;;  %511 = vmatpush.bf16.msra.mxu1 %v6132_v47  ;;  %v273_v18 = vsel %vm227_vm0, %v217_v3, 0.0  ;;  %v274_v19 = vsel %vm227_vm0, %v218_v4, 0.0  ;;  %v221_v24 = vld [vmem:[#allocation2 + $0x70] sm:$0xff]  ;;  %v222_v29 = vld [vmem:[#allocation2 + $0x78] sm:$0xff] }
  0x42   :  { %525 = vmatpush.bf16.msra.mxu2 %v6136_v48  ;;  %v249_v16 = vrot.slane %v248_v5, 4  ;;  %v266_v17 = vadd.f32 %v265_v14, %v264_v8  ;;  %v232_v20 = vadd.f32 %v231_v11, %v230_v63  ;;  %v258_v22 = vrot.slane %v257_v13, 4  ;;  %v223_v48 = vld [vmem:[#allocation2 + $0x80] sm:$0xff]  ;;  %v224_v49 = vld [vmem:[#allocation2 + $0x88] sm:$0xff]  ;;  %v225_v55 = vld [vmem:[#allocation2 + $0x90] sm:$0xff] }
  0x43   :  { %539 = vmatpush.bf16.msra.mxu3 %v6140_v53  ;;  %v241_v21 = vadd.f32 %v240_v12, %v239_v0  ;;  %v275_v23 = vadd.f32 %v274_v19, %v273_v18  ;;  %v282_v27 = vsel %vm227_vm0, %v219_v9, 0.0  ;;  %v283_v28 = vsel %vm227_vm0, %v220_v10, 0.0  ;;  %v226_v56 = vld [vmem:[#allocation2 + $0x98] sm:$0xff]  ;;  %v6243_v9 = vld [vmem:[#allocation5 + $0xe0] sm:$0xf] }
  0x44   :  { %v250_v25 = vadd.f32 %v249_v16, %v248_v5  ;;  %v267_v26 = vrot.slane %v266_v17, 4  ;;  %v233_v30 = vrot.slane %v232_v20, 2  ;;  %v259_v32 = vadd.f32 %v258_v22, %v257_v13  ;;  %v8534_v10 = vld [vmem:[#allocation5 + $0xec] sm:$0xf0]  ;;  %v8532_v16 = vld [vmem:[#allocation5 + $0xe4] sm:$0xf] }
  0x45   :  { %v242_v31 = vrot.slane %v241_v21, 2  ;;  %v276_v33 = vrot.slane %v275_v23, 4  ;;  %v284_v36 = vadd.f32 %v283_v28, %v282_v27  ;;  %v291_v40 = vsel %vm227_vm0, %v221_v24, 0.0  ;;  %v6251_v22 = vld [vmem:[#allocation5 + $0xe8] sm:$0xf] }
  0x46   :  { %v251_v34 = vrot.slane %v250_v25, 2  ;;  %v268_v35 = vadd.f32 %v267_v26, %v266_v17  ;;  %v234_v37 = vadd.f32 %v233_v30, %v232_v20  ;;  %v260_v38 = vrot.slane %v259_v32, 2  ;;  %v8533_v28 = vld [vmem:[#allocation5 + $0xec] sm:$0xf] }
  0x47   :  { %v277_v39 = vadd.f32 %v276_v33, %v275_v23  ;;  %v243_v41 = vadd.f32 %v242_v31, %v241_v21  ;;  %v285_v43 = vrot.slane %v284_v36, 4  ;;  %v292_v44 = vsel %vm227_vm0, %v222_v29, 0.0  ;;  %v6245_v21 = vld [vmem:[#allocation5 + $0xf0] sm:$0xf0]  ;;  %v8535_v23 = vld [vmem:[#allocation5 + $0xf4] sm:$0xf0] }
  0x48   :  { %v269_v42 = vrot.slane %v268_v35, 2  ;;  %v252_v45 = vadd.f32 %v251_v34, %v250_v25  ;;  %v261_v46 = vadd.f32 %v260_v38, %v259_v32  ;;  %v293_v52 = vadd.f32 %v292_v44, %v291_v40  ;;  %v6253_v29 = vld [vmem:[#allocation5 + $0xf8] sm:$0xf0] }
  0x49   :  { %v278_v47 = vrot.slane %v277_v39, 2  ;;  %v286_v51 = vadd.f32 %v285_v43, %v284_v36  ;;  %v319_v54 = vmul.f32 16.0, %v9638_v15  ;;  %v235_v57 = vrot.slane %v234_v37, 1 }
  0x4a   :  { %v270_v50 = vadd.f32 %v269_v42, %v268_v35  ;;  %v244_v58 = vrot.slane %v243_v41, 1  ;;  %v294_v60 = vrot.slane %v293_v52, 4  ;;  %v253_v61 = vrot.slane %v252_v45, 1 }
  0x4b   :  { %v279_v53 = vadd.f32 %v278_v47, %v277_v39  ;;  %v287_v59 = vrot.slane %v286_v51, 2  ;;  %v262_v62 = vrot.slane %v261_v46, 1  ;;  %v300_v63 = vsel %vm227_vm0, %v223_v48, 0.0 }
  0x4c   :  { %v301_v0 = vsel %vm227_vm0, %v224_v49, 0.0  ;;  %v271_v1 = vrot.slane %v270_v50, 1  ;;  %v295_v3 = vadd.f32 %v294_v60, %v293_v52  ;;  %v309_v6 = vsel %vm227_vm0, %v225_v55, 0.0 }
  0x4d   :  { %v288_v2 = vadd.f32 %v287_v59, %v286_v51  ;;  %v302_v4 = vadd.f32 %v301_v0, %v300_v63  ;;  %v280_v5 = vrot.slane %v279_v53, 1  ;;  %v310_v7 = vsel %vm227_vm0, %v226_v56, 0.0 }
  0x4e   :  { %v320_v8 = vsub.f32 1.0, %v319_v54  ;;  %v296_v12 = vrot.slane %v295_v3, 2  ;;  %v311_v14 = vadd.f32 %v310_v7, %v309_v6  ;;  %v236_v17 = vadd.f32 %v235_v57, %v234_v37 }
  0x4f   :  { %v289_v11 = vrot.slane %v288_v2, 1  ;;  %v303_v13 = vrot.slane %v302_v4, 4  ;;  %v245_v18 = vadd.f32 %v244_v58, %v243_v41  ;;  %v254_v19 = vadd.f32 %v253_v61, %v252_v45  ;;  %v6227_v61 = vld [vmem:[#allocation5 + $0xc0] sm:$0xf] }
  0x50   :  { %v321_v20 = vmul.f32 %v9638_v15, %v320_v8  ;;  %v263_v24 = vadd.f32 %v262_v62, %v261_v46  ;;  %v297_v25 = vadd.f32 %v296_v12, %v295_v3  ;;  %v312_v27 = vrot.slane %v311_v14, 4  ;;  %v8528_v3 = vld [vmem:[#allocation5 + $0xc4] sm:$0xf] }
  0x51   :  { %v304_v26 = vadd.f32 %v303_v13, %v302_v4  ;;  %v272_v30 = vadd.f32 %v271_v1, %v270_v50  ;;  %v281_v31 = vadd.f32 %v280_v5, %v279_v53  ;;  %v290_v32 = vadd.f32 %v289_v11, %v288_v2  ;;  %v8530_v2 = vld [vmem:[#allocation5 + $0xcc] sm:$0xf0]  ;;  %v6229_v4 = vld [vmem:[#allocation5 + $0xd0] sm:$0xf0]  ;;  %v8529_v11 = vld [vmem:[#allocation5 + $0xcc] sm:$0xf] }
  0x52   :  { %v322_v33 = vadd.f32 %v9638_v15, %v321_v20  ;;  %v298_v34 = vrot.slane %v297_v25, 1  ;;  %v313_v36 = vadd.f32 %v312_v27, %v311_v14  ;;  %v6244_v37 = vor.u32 %v8534_v10, %v6243_v9  ;;  %v6235_v9 = vld [vmem:[#allocation5 + $0xc8] sm:$0xf]  ;;  %v8531_v10 = vld [vmem:[#allocation5 + $0xd4] sm:$0xf0] }
  0x53   :  { %v305_v35 = vrot.slane %v304_v26, 2  ;;  %v6248_v39 = vor.u32 %v8532_v16, %v6245_v21  ;;  %v6252_v40 = vor.u32 %v8535_v23, %v6251_v22  ;;  %v6256_v41 = vor.u32 %v8533_v28, %v6253_v29 }
  0x54   :  { %v324_v38 = vsel %vm323_vm1, %v9638_v15, %v322_v33  ;;  %v299_v42 = vadd.f32 %v298_v34, %v297_v25  ;;  %v314_v44 = vrot.slane %v313_v36, 2  ;;  %vm397_vm5 = vcmask 1044484   ;;  %658 = vmatpush.bf16.msrb.mxu0 %v6244_v37  ;;  %v6213_v25 = vld [vmem:[#allocation5 + $0xb0] sm:$0xf0]  ;;  %v6221_v33 = vld [vmem:[#allocation5 + $0xb8] sm:$0xf0] }
  0x55   :  { %v306_v43 = vadd.f32 %v305_v35, %v304_v26  ;;  %v325_v45 = vmul.f32 %v324_v38, %v236_v17  ;;  %v326_v46 = vmul.f32 %v324_v38, %v245_v18  ;;  %v327_v47 = vmul.f32 %v324_v38, %v254_v19  ;;  %672 = vmatpush.bf16.msrb.mxu1 %v6248_v39  ;;  %v6237_v17 = vld [vmem:[#allocation5 + $0xd8] sm:$0xf0]  ;;  %v6211_v18 = vld [vmem:[#allocation5 + $0xa0] sm:$0xf]  ;;  %v8526_v19 = vld [vmem:[#allocation5 + $0xac] sm:$0xf0] }
  0x56   :  { %v328_v48 = vmul.f32 %v324_v38, %v263_v24  ;;  %v329_v49 = vmul.f32 %v324_v38, %v272_v30  ;;  %vm399_vm6 = vcmask 1045509   ;;  %v315_v51 = vadd.f32 %v314_v44, %v313_v36  ;;  %686 = vmatpush.bf16.msrb.mxu2 %v6252_v40  ;;  %700 = vmatpush.bf16.msrb.mxu3 %v6256_v41  ;;  %v8524_v24 = vld [vmem:[#allocation5 + $0xa4] sm:$0xf]  ;;  %v6219_v26 = vld [vmem:[#allocation5 + $0xa8] sm:$0xf] }
  0x57   :  { %v307_v50 = vrot.slane %v306_v43, 1  ;;  %v330_v52 = vmul.f32 %v324_v38, %v281_v31  ;;  %v331_v15 = vmul.f32 %v324_v38, %v290_v32  ;;  %vm401_vm7 = vcmask 1046534   ;;  %v8527_v31 = vld [vmem:[#allocation5 + $0xb4] sm:$0xf0]  ;;  %v8525_v32 = vld [vmem:[#allocation5 + $0xac] sm:$0xf] }
  0x58   :  { %v332_v53 = vmul.f32 %v324_v38, %v299_v42  ;;  %v335_v54 = vpack.c.bf16 %v325_v45, %v325_v45  ;;  %v336_v55 = vpack.c.bf16 %v326_v46, %v326_v46  ;;  %v337_v56 = vpack.c.bf16 %v327_v47, %v327_v47  ;;  %v8522_v42 = vld [vmem:[#allocation5 + $0x8c] sm:$0xf0]  ;;  %v6197_v44 = vld [vmem:[#allocation5 + $0x90] sm:$0xf0] }
  0x59   :  { %vm403_vm8 = vcmask 1047559   ;;  %v308_v57 = vadd.f32 %v307_v50, %v306_v43  ;;  %v316_v58 = vrot.slane %v315_v51, 1  ;;  %v338_v59 = vpack.c.bf16 %v328_v48, %v328_v48  ;;  %v8520_v43 = vld [vmem:[#allocation5 + $0x84] sm:$0xf]  ;;  %v8523_v50 = vld [vmem:[#allocation5 + $0x94] sm:$0xf0] }
  0x5a   :  { %v339_v60 = vpack.c.bf16 %v329_v49, %v329_v49  ;;  %v340_v62 = vpack.c.bf16 %v330_v52, %v330_v52  ;;  %v341_v63 = vpack.c.bf16 %v331_v15, %v331_v15  ;;  %v342_v0 = vpack.c.bf16 %v332_v53, %v332_v53  ;;  %v6203_v49 = vld [vmem:[#allocation5 + $0x88] sm:$0xf]  ;;  %v6205_v15 = vld [vmem:[#allocation5 + $0x98] sm:$0xf0]  ;;  %v6311_v53 = vld [vmem:[#allocation5 + $0x160] sm:$0xf] }
  0x5b   :  { %v381_v1 = vunpack.c.l.b16 %v335_v54  ;;  %v317_v5 = vadd.f32 %v316_v58, %v315_v51  ;;  %v333_v6 = vmul.f32 %v324_v38, %v308_v57  ;;  %v382_v7 = vunpack.c.l.b16 %v336_v55  ;;  %v8521_v51 = vld [vmem:[#allocation5 + $0x8c] sm:$0xf]  ;;  %v8550_v54 = vld [vmem:[#allocation5 + $0x16c] sm:$0xf0]  ;;  %v8548_v57 = vld [vmem:[#allocation5 + $0x164] sm:$0xf] }
  0x5c   :  { %v383_v8 = vunpack.c.l.b16 %v337_v56  ;;  %v384_v12 = vunpack.c.l.b16 %v338_v59  ;;  %v385_v13 = vunpack.c.l.b16 %v339_v60  ;;  %v386_v14 = vunpack.c.l.b16 %v340_v62  ;;  %v6313_v58 = vld [vmem:[#allocation5 + $0x170] sm:$0xf0]  ;;  %v6319_v59 = vld [vmem:[#allocation5 + $0x168] sm:$0xf] }
  0x5d   :  { %v387_v16 = vunpack.c.l.b16 %v341_v63  ;;  %v334_v20 = vmul.f32 %v324_v38, %v317_v5  ;;  %v343_v21 = vpack.c.bf16 %v333_v6, %v333_v6  ;;  %v388_v22 = vunpack.c.l.b16 %v342_v0  ;;  %v6195_v38 = vld [vmem:[#allocation5 + $0x80] sm:$0xf]  ;;  %v8551_v63 = vld [vmem:[#allocation5 + $0x174] sm:$0xf0]  ;;  %v8549_v0 = vld [vmem:[#allocation5 + $0x16c] sm:$0xf] }
  0x5e   :  { %v392_v23 = vsel %vm391_vm2, %v382_v7, %v381_v1  ;;  %v6228_v28 = vor.u32 %v8530_v2, %v6227_v61  ;;  %v6232_v29 = vor.u32 %v8528_v3, %v6229_v4  ;;  %v6236_v30 = vor.u32 %v8531_v10, %v6235_v9  ;;  %v6321_v1 = vld [vmem:[#allocation5 + $0x178] sm:$0xf0]  ;;  %v6295_v6 = vld [vmem:[#allocation5 + $0x140] sm:$0xf]  ;;  %v8546_v7 = vld [vmem:[#allocation5 + $0x14c] sm:$0xf0] }
  0x5f   :  { %v394_v27 = vsel %vm393_vm3, %v383_v8, %v392_v23  ;;  %v344_v34 = vpack.c.bf16 %v334_v20, %v334_v20  ;;  %v389_v35 = vunpack.c.l.b16 %v343_v21  ;;  %v6240_v37 = vor.u32 %v8529_v11, %v6237_v17  ;;  %v8544_v10 = vld [vmem:[#allocation5 + $0x144] sm:$0xf]  ;;  %v6297_v11 = vld [vmem:[#allocation5 + $0x150] sm:$0xf0]  ;;  %v8542_v20 = vld [vmem:[#allocation5 + $0x12c] sm:$0xf0] }
  0x60   :  { %v396_v36 = vsel %vm395_vm4, %v384_v12, %v394_v27  ;;  %659 = vmatpush.bf16.msrb.mxu0 %v6228_v28  ;;  %673 = vmatpush.bf16.msrb.mxu1 %v6232_v29  ;;  %v6212_v40 = vor.u32 %v8526_v19, %v6211_v18  ;;  %v6216_v41 = vor.u32 %v8524_v24, %v6213_v25  ;;  %v6303_v12 = vld [vmem:[#allocation5 + $0x148] sm:$0xf]  ;;  %v6279_v19 = vld [vmem:[#allocation5 + $0x120] sm:$0xf]  ;;  %v8540_v23 = vld [vmem:[#allocation5 + $0x124] sm:$0xf] }
  0x61   :  { %v398_v39 = vsel %vm397_vm5, %v385_v13, %v396_v36  ;;  %v390_v45 = vunpack.c.l.b16 %v344_v34  ;;  %687 = vmatpush.bf16.msrb.mxu2 %v6236_v30  ;;  %701 = vmatpush.bf16.msrb.mxu3 %v6240_v37  ;;  %v6220_v47 = vor.u32 %v8527_v31, %v6219_v26  ;;  %v6224_v48 = vor.u32 %v8525_v32, %v6221_v33  ;;  %v8547_v13 = vld [vmem:[#allocation5 + $0x154] sm:$0xf0]  ;;  %v6281_v24 = vld [vmem:[#allocation5 + $0x130] sm:$0xf0]  ;;  %v6287_v25 = vld [vmem:[#allocation5 + $0x128] sm:$0xf] }
  0x62   :  { %v400_v46 = vsel %vm399_vm6, %v386_v14, %v398_v39  ;;  %v6196_v61 = vor.u32 %v8522_v42, %v6195_v38  ;;  %v6200_v62 = vor.u32 %v8520_v43, %v6197_v44  ;;  %v6204_v2 = vor.u32 %v8523_v50, %v6203_v49  ;;  %v8545_v14 = vld [vmem:[#allocation5 + $0x14c] sm:$0xf]  ;;  %v8543_v26 = vld [vmem:[#allocation5 + $0x134] sm:$0xf0]  ;;  %v6289_v28 = vld [vmem:[#allocation5 + $0x138] sm:$0xf0] }
  0x63   :  { %v402_v52 = vsel %vm401_vm7, %v387_v16, %v400_v46  ;;  %v405_v56 = vsel %vm391_vm2, %v390_v45, %v389_v35  ;;  %v6208_v3 = vor.u32 %v8521_v51, %v6205_v15  ;;  %v6312_v4 = vor.u32 %v8550_v54, %v6311_v53  ;;  %v6305_v16 = vld [vmem:[#allocation5 + $0x158] sm:$0xf0]  ;;  %v8541_v27 = vld [vmem:[#allocation5 + $0x12c] sm:$0xf]  ;;  %v6263_v33 = vld [vmem:[#allocation5 + $0x100] sm:$0xf] }
  0x64   :  { %v404_v55 = vsel %vm403_vm8, %v388_v22, %v402_v52  ;;  %660 = vmatpush.bf16.msrb.mxu0 %v6212_v40  ;;  %674 = vmatpush.bf16.msrb.mxu1 %v6216_v41  ;;  %v6316_v5 = vor.u32 %v8548_v57, %v6313_v58  ;;  %v6320_v8 = vor.u32 %v8551_v63, %v6319_v59  ;;  %v8538_v34 = vld [vmem:[#allocation5 + $0x10c] sm:$0xf0]  ;;  %v8536_v35 = vld [vmem:[#allocation5 + $0x104] sm:$0xf]  ;;  %v6265_v36 = vld [vmem:[#allocation5 + $0x110] sm:$0xf0] }
  0x65   :  { %v9665_v60 = vpack.c.b16 %v405_v56, %v404_v55  ;;  %688 = vmatpush.bf16.msrb.mxu2 %v6220_v47  ;;  %702 = vmatpush.bf16.msrb.mxu3 %v6224_v48  ;;  %v6324_v9 = vor.u32 %v8549_v0, %v6321_v1  ;;  %v6296_v17 = vor.u32 %v8546_v7, %v6295_v6  ;;  %v6271_v37 = vld [vmem:[#allocation5 + $0x108] sm:$0xf]  ;;  %v8539_v38 = vld [vmem:[#allocation5 + $0x114] sm:$0xf0]  ;;  %v8537_v39 = vld [vmem:[#allocation5 + $0x10c] sm:$0xf] }
  0x66   :  { %v6300_v18 = vor.u32 %v8544_v10, %v6297_v11  ;;  %v6304_v21 = vor.u32 %v8547_v13, %v6303_v12  ;;  %v6308_v22 = vor.u32 %v8545_v14, %v6305_v16  ;;  %v6280_v29 = vor.u32 %v8542_v20, %v6279_v19  ;;  %v6273_v40 = vld [vmem:[#allocation5 + $0x118] sm:$0xf0]  ;;  %v6379_v41 = vld [vmem:[#allocation5 + $0x1e0] sm:$0xf]  ;;  %v8566_v42 = vld [vmem:[#allocation5 + $0x1ec] sm:$0xf0] }
  0x67   :  { %6189 = vmatmul.msk.bf16.vlgmr.msra.gmra.mxu0 %vm227_vm0, %v9665_v60  ;;  %6190 = vmatmul.msk.bf16.vlgmr.msra.gmra.mxu1 %vm227_vm0, %v9665_v60  ;;  %v6284_v30 = vor.u32 %v8540_v23, %v6281_v24  ;;  %v6288_v31 = vor.u32 %v8543_v26, %v6287_v25  ;;  %v6292_v32 = vor.u32 %v8541_v27, %v6289_v28  ;;  %v8564_v43 = vld [vmem:[#allocation5 + $0x1e4] sm:$0xf]  ;;  %v6381_v44 = vld [vmem:[#allocation5 + $0x1f0] sm:$0xf0]  ;;  %v6387_v45 = vld [vmem:[#allocation5 + $0x1e8] sm:$0xf] }
  0x68   :  { %6191 = vmatmul.msk.bf16.vlgmr.msra.gmra.mxu2 %vm227_vm0, %v9665_v60  ;;  %6192 = vmatmul.msk.bf16.vlgmr.msra.gmra.mxu3 %vm227_vm0, %v9665_v60  ;;  %v6264_v46 = vor.u32 %v8538_v34, %v6263_v33  ;;  %v6268_v47 = vor.u32 %v8536_v35, %v6265_v36  ;;  %v8567_v48 = vld [vmem:[#allocation5 + $0x1f4] sm:$0xf0]  ;;  %v8565_v49 = vld [vmem:[#allocation5 + $0x1ec] sm:$0xf]  ;;  %v6389_v50 = vld [vmem:[#allocation5 + $0x1f8] sm:$0xf0]  ;;  %v6272_v51 = vor.u32 %v8539_v38, %v6271_v37 }
  0x69   :  { %661 = vmatpush.bf16.msrb.mxu0 %v6196_v61  ;;  %675 = vmatpush.bf16.msrb.mxu1 %v6200_v62  ;;  %v6276_v52 = vor.u32 %v8537_v39, %v6273_v40  ;;  %v6380_v15 = vor.u32 %v8566_v42, %v6379_v41  ;;  %v6384_v53 = vor.u32 %v8564_v43, %v6381_v44  ;;  %v6363_v54 = vld [vmem:[#allocation5 + $0x1c0] sm:$0xf]  ;;  %v8562_v55 = vld [vmem:[#allocation5 + $0x1cc] sm:$0xf0]  ;;  %v8560_v58 = vld [vmem:[#allocation5 + $0x1c4] sm:$0xf] }
  0x6a   :  { %689 = vmatpush.bf16.msrb.mxu2 %v6204_v2  ;;  %703 = vmatpush.bf16.msrb.mxu3 %v6208_v3  ;;  %v6388_v56 = vor.u32 %v8567_v48, %v6387_v45  ;;  %v6392_v57 = vor.u32 %v8565_v49, %v6389_v50  ;;  %v6365_v59 = vld [vmem:[#allocation5 + $0x1d0] sm:$0xf0]  ;;  %v6371_v61 = vld [vmem:[#allocation5 + $0x1c8] sm:$0xf]  ;;  %v8563_v62 = vld [vmem:[#allocation5 + $0x1d4] sm:$0xf0]  ;;  %v6364_v1 = vor.u32 %v8562_v55, %v6363_v54 }
  0x6b   :  { %v8561_v63 = vld [vmem:[#allocation5 + $0x1cc] sm:$0xf]  ;;  %v6373_v0 = vld [vmem:[#allocation5 + $0x1d8] sm:$0xf0]  ;;  %v6368_v2 = vor.u32 %v8560_v58, %v6365_v59  ;;  %v6347_v3 = vld [vmem:[#allocation5 + $0x1a0] sm:$0xf] }
  0x6c   :  { %v6376_v6 = vor.u32 %v8561_v63, %v6373_v0  ;;  %v8556_v7 = vld [vmem:[#allocation5 + $0x1a4] sm:$0xf]  ;;  %v8559_v10 = vld [vmem:[#allocation5 + $0x1b4] sm:$0xf0]  ;;  %v8557_v11 = vld [vmem:[#allocation5 + $0x1ac] sm:$0xf] }
  0x6d   :  { %830 = vmatpush.bf16.msra.mxu0 %v6312_v4  ;;  %844 = vmatpush.bf16.msra.mxu1 %v6316_v5  ;;  %v8558_v4 = vld [vmem:[#allocation5 + $0x1ac] sm:$0xf0]  ;;  %v6372_v5 = vor.u32 %v8563_v62, %v6371_v61  ;;  %v6357_v12 = vld [vmem:[#allocation5 + $0x1b8] sm:$0xf0]  ;;  %v8552_v20 = vld [vmem:[#allocation5 + $0x184] sm:$0xf] }
  0x6e   :  { %858 = vmatpush.bf16.msra.mxu2 %v6320_v8  ;;  %872 = vmatpush.bf16.msra.mxu3 %v6324_v9  ;;  %v6349_v8 = vld [vmem:[#allocation5 + $0x1b0] sm:$0xf0]  ;;  %v6355_v9 = vld [vmem:[#allocation5 + $0x1a8] sm:$0xf]  ;;  %v6348_v13 = vor.u32 %v8558_v4, %v6347_v3  ;;  %v8554_v19 = vld [vmem:[#allocation5 + $0x18c] sm:$0xf0] }
  0x6f   :  { %v6352_v14 = vor.u32 %v8556_v7, %v6349_v8  ;;  %v6356_v16 = vor.u32 %v8559_v10, %v6355_v9  ;;  %v8555_v23 = vld [vmem:[#allocation5 + $0x194] sm:$0xf0]  ;;  %v8553_v24 = vld [vmem:[#allocation5 + $0x18c] sm:$0xf]  ;;  %v6341_v25 = vld [vmem:[#allocation5 + $0x198] sm:$0xf0] }
  0x70   :  { %v7119_v33 = vld [vmem:[#allocation8 + $0x5a0] sm:$0xf]  ;;  %v8754_v34 = vld [vmem:[#allocation8 + $0x5cc] sm:$0xf0]  ;;  %vm4145_vm9 = vcmask 1041408   ;;  %vm4115_vm10 = vcmask 80896  }
  0x71   :  { %831 = vmatpush.bf16.msra.mxu0 %v6296_v17  ;;  %845 = vmatpush.bf16.msra.mxu1 %v6300_v18  ;;  %v6360_v17 = vor.u32 %v8557_v11, %v6357_v12  ;;  %v6331_v18 = vld [vmem:[#allocation5 + $0x180] sm:$0xf]  ;;  %v7120_v35 = vor.u32 %v8754_v34, %v7119_v33  ;;  %v6687_v36 = vld [vmem:[#allocation8 + $0x240] sm:$0xf]  ;;  %vm4119_vm11 = vcmask 74752   ;;  %vm6101_vm12 = vcmask 25600  }
  0x72   :  { %859 = vmatpush.bf16.msra.mxu2 %v6304_v21  ;;  %873 = vmatpush.bf16.msra.mxu3 %v6308_v22  ;;  %v6333_v21 = vld [vmem:[#allocation5 + $0x190] sm:$0xf0]  ;;  %v6339_v22 = vld [vmem:[#allocation5 + $0x188] sm:$0xf]  ;;  %v6332_v26 = vor.u32 %v8554_v19, %v6331_v18  ;;  %v8646_v37 = vld [vmem:[#allocation8 + $0x26c] sm:$0xf0] }
  0x73   :  { %v6336_v27 = vor.u32 %v8552_v20, %v6333_v21  ;;  %v6340_v28 = vor.u32 %v8555_v23, %v6339_v22  ;;  %v7071_v38 = vld [vmem:[#allocation8 + $0x540] sm:$0xf]  ;;  %v6688_v39 = vor.u32 %v8646_v37, %v6687_v36  ;;  %v8742_v40 = vld [vmem:[#allocation8 + $0x56c] sm:$0xf0] }
  0x74   :  { %v7072_v41 = vor.u32 %v8742_v40, %v7071_v38  ;;  %v7503_v42 = vld [vmem:[#allocation8 + $0x8a0] sm:$0xf]  ;;  %v8850_v43 = vld [vmem:[#allocation8 + $0x8cc] sm:$0xf0] }
  0x75   :  { %832 = vmatpush.bf16.msra.mxu0 %v6280_v29  ;;  %846 = vmatpush.bf16.msra.mxu1 %v6284_v30  ;;  %v6344_v29 = vor.u32 %v8553_v24, %v6341_v25  ;;  %v6735_v30 = vld [vmem:[#allocation8 + $0x2a0] sm:$0xf]  ;;  %v7504_v45 = vor.u32 %v8850_v43, %v7503_v42  ;;  %v8622_v59 = vld [vmem:[#allocation8 + $0x1ac] sm:$0xf0] }
  0x76   :  { %860 = vmatpush.bf16.msra.mxu2 %v6288_v31  ;;  %874 = vmatpush.bf16.msra.mxu3 %v6292_v32  ;;  %v8658_v31 = vld [vmem:[#allocation8 + $0x2cc] sm:$0xf0]  ;;  %v7887_v44 = vld [vmem:[#allocation8 + $0xba0] sm:$0xf] }
  0x77   :  { %6257 = vmatmul.msk.bf16.vlgmr.msrb.gmra.mxu0 %vm227_vm0, %v9665_v60  ;;  %6258 = vmatmul.msk.bf16.vlgmr.msrb.gmra.mxu1 %vm227_vm0, %v9665_v60  ;;  %v6736_v32 = vor.u32 %v8658_v31, %v6735_v30  ;;  %v7023_v50 = vld [vmem:[#allocation8 + $0x4e0] sm:$0xf]  ;;  %v8718_v63 = vld [vmem:[#allocation8 + $0x4ac] sm:$0xf0] }
  0x78   :  { %6259 = vmatmul.msk.bf16.vlgmr.msrb.gmra.mxu2 %vm227_vm0, %v9665_v60  ;;  %6260 = vmatmul.msk.bf16.vlgmr.msrb.gmra.mxu3 %vm227_vm0, %v9665_v60  ;;  %v7839_v54 = vld [vmem:[#allocation8 + $0xb40] sm:$0xf]  ;;  %v8610_v8 = vld [vmem:[#allocation8 + $0x14c] sm:$0xf0] }
  0x79   :  { %833 = vmatpush.bf16.msra.mxu0 %v6264_v46  ;;  %847 = vmatpush.bf16.msra.mxu1 %v6268_v47  ;;  %v6639_v46 = vld [vmem:[#allocation8 + $0x1e0] sm:$0xf]  ;;  %v8634_v47 = vld [vmem:[#allocation8 + $0x20c] sm:$0xf0] }
  0x7a   :  { %861 = vmatpush.bf16.msra.mxu2 %v6272_v51  ;;  %875 = vmatpush.bf16.msra.mxu3 %v6276_v52  ;;  %v6640_v49 = vor.u32 %v8634_v47, %v6639_v46  ;;  %v8730_v51 = vld [vmem:[#allocation8 + $0x50c] sm:$0xf0]  ;;  %v6591_v58 = vld [vmem:[#allocation8 + $0x180] sm:$0xf] }
  0x7b   :  { %v7024_v52 = vor.u32 %v8730_v51, %v7023_v50  ;;  %v6592_v61 = vor.u32 %v8622_v59, %v6591_v58  ;;  %v6975_v62 = vld [vmem:[#allocation8 + $0x480] sm:$0xf]  ;;  %v8706_v11 = vld [vmem:[#allocation8 + $0x44c] sm:$0xf0]  ;;  %v8652_v51 = vld [vmem:[#allocation8 + $0x2a4] sm:$0xf] }
  0x7c   :  { %v6976_v0 = vor.u32 %v8718_v63, %v6975_v62  ;;  %v7791_v3 = vld [vmem:[#allocation8 + $0xae0] sm:$0xf]  ;;  %v8910_v18 = vld [vmem:[#allocation8 + $0xaac] sm:$0xf0]  ;;  %v8640_v63 = vld [vmem:[#allocation8 + $0x244] sm:$0xf] }
  0x7d   :  { %1002 = vmatpush.bf16.msrb.mxu0 %v6380_v15  ;;  %1016 = vmatpush.bf16.msrb.mxu1 %v6384_v53  ;;  %v7455_v15 = vld [vmem:[#allocation8 + $0x840] sm:$0xf]  ;;  %v8838_v53 = vld [vmem:[#allocation8 + $0x86c] sm:$0xf0] }
  0x7e   :  { %1030 = vmatpush.bf16.msrb.mxu2 %v6388_v56  ;;  %1044 = vmatpush.bf16.msrb.mxu3 %v6392_v57  ;;  %v7456_v55 = vor.u32 %v8838_v53, %v7455_v15  ;;  %v8934_v56 = vld [vmem:[#allocation8 + $0xb6c] sm:$0xf0]  ;;  %v6543_v7 = vld [vmem:[#allocation8 + $0x120] sm:$0xf]  ;;  %v8748_v15 = vld [vmem:[#allocation8 + $0x5a4] sm:$0xf] }
  0x7f   :  { %v7840_v57 = vor.u32 %v8934_v56, %v7839_v54  ;;  %v6927_v9 = vld [vmem:[#allocation8 + $0x420] sm:$0xf]  ;;  %v6544_v10 = vor.u32 %v8610_v8, %v6543_v7  ;;  %v8598_v21 = vld [vmem:[#allocation8 + $0xec] sm:$0xf0]  ;;  %v7121_v54 = vld [vmem:[#allocation8 + $0x5d0] sm:$0xf0] }
  0x80   :  { %v6928_v12 = vor.u32 %v8706_v11, %v6927_v9  ;;  %v6495_v20 = vld [vmem:[#allocation8 + $0xc0] sm:$0xf]  ;;  %v8694_v24 = vld [vmem:[#allocation8 + $0x3ec] sm:$0xf0] }
  0x81   :  { %1003 = vmatpush.bf16.msrb.mxu0 %v6364_v1  ;;  %1017 = vmatpush.bf16.msrb.mxu1 %v6368_v2  ;;  %v7407_v1 = vld [vmem:[#allocation8 + $0x7e0] sm:$0xf]  ;;  %v8826_v2 = vld [vmem:[#allocation8 + $0x80c] sm:$0xf0]  ;;  %v6496_v23 = vor.u32 %v8598_v21, %v6495_v20  ;;  %v7889_v20 = vld [vmem:[#allocation8 + $0xbd0] sm:$0xf0] }
  0x82   :  { %1031 = vmatpush.bf16.msrb.mxu2 %v6372_v5  ;;  %1045 = vmatpush.bf16.msrb.mxu3 %v6376_v6  ;;  %v7408_v4 = vor.u32 %v8826_v2, %v7407_v1  ;;  %v8922_v5 = vld [vmem:[#allocation8 + $0xb0c] sm:$0xf0]  ;;  %v6879_v22 = vld [vmem:[#allocation8 + $0x3c0] sm:$0xf]  ;;  %v8736_v1 = vld [vmem:[#allocation8 + $0x544] sm:$0xf] }
  0x83   :  { %v7792_v6 = vor.u32 %v8922_v5, %v7791_v3  ;;  %v6880_v25 = vor.u32 %v8694_v24, %v6879_v22  ;;  %v8898_v30 = vld [vmem:[#allocation8 + $0xa4c] sm:$0xf0]  ;;  %v6831_v34 = vld [vmem:[#allocation8 + $0x360] sm:$0xf]  ;;  %v7073_v3 = vld [vmem:[#allocation8 + $0x570] sm:$0xf0] }
  0x84   :  { %v8586_v33 = vld [vmem:[#allocation8 + $0x8c] sm:$0xf0]  ;;  %v7263_v38 = vld [vmem:[#allocation8 + $0x6c0] sm:$0xf]  ;;  %v8628_v21 = vld [vmem:[#allocation8 + $0x1e4] sm:$0xf] }
  0x85   :  { %1004 = vmatpush.bf16.msrb.mxu0 %v6348_v13  ;;  %1018 = vmatpush.bf16.msrb.mxu1 %v6352_v14  ;;  %v7359_v13 = vld [vmem:[#allocation8 + $0x780] sm:$0xf]  ;;  %v8814_v14 = vld [vmem:[#allocation8 + $0x7ac] sm:$0xf0]  ;;  %v6641_v22 = vld [vmem:[#allocation8 + $0x210] sm:$0xf0] }
  0x86   :  { %1032 = vmatpush.bf16.msrb.mxu2 %v6356_v16  ;;  %1046 = vmatpush.bf16.msrb.mxu3 %v6360_v17  ;;  %v7743_v16 = vld [vmem:[#allocation8 + $0xa80] sm:$0xf]  ;;  %v7360_v17 = vor.u32 %v8814_v14, %v7359_v13  ;;  %v8682_v36 = vld [vmem:[#allocation8 + $0x38c] sm:$0xf0]  ;;  %v8844_v13 = vld [vmem:[#allocation8 + $0x8a4] sm:$0xf] }
  0x87   :  { %6325 = vmatmul.msk.bf16.vlgmr.msra.gmra.mxu0 %vm227_vm0, %v9665_v60  ;;  %6326 = vmatmul.msk.bf16.vlgmr.msra.gmra.mxu1 %vm227_vm0, %v9665_v60  ;;  %v7744_v19 = vor.u32 %v8910_v18, %v7743_v16  ;;  %v6832_v37 = vor.u32 %v8682_v36, %v6831_v34  ;;  %v7647_v40 = vld [vmem:[#allocation8 + $0x9c0] sm:$0xf]  ;;  %v8886_v42 = vld [vmem:[#allocation8 + $0x9ec] sm:$0xf0]  ;;  %v7505_v14 = vld [vmem:[#allocation8 + $0x8d0] sm:$0xf0] }
  0x88   :  { %6327 = vmatmul.msk.bf16.vlgmr.msra.gmra.mxu2 %vm227_vm0, %v9665_v60  ;;  %6328 = vmatmul.msk.bf16.vlgmr.msra.gmra.mxu3 %vm227_vm0, %v9665_v60  ;;  %v7648_v43 = vor.u32 %v8886_v42, %v7647_v40  ;;  %v8778_v56 = vld [vmem:[#allocation8 + $0x68c] sm:$0xf0]  ;;  %v7599_v59 = vld [vmem:[#allocation8 + $0x960] sm:$0xf]  ;;  %v8940_v16 = vld [vmem:[#allocation8 + $0xba4] sm:$0xf] }
  0x89   :  { %1005 = vmatpush.bf16.msrb.mxu0 %v6332_v26  ;;  %1019 = vmatpush.bf16.msrb.mxu1 %v6336_v27  ;;  %v7311_v26 = vld [vmem:[#allocation8 + $0x720] sm:$0xf]  ;;  %v8802_v27 = vld [vmem:[#allocation8 + $0x74c] sm:$0xf0]  ;;  %v8724_v24 = vld [vmem:[#allocation8 + $0x4e4] sm:$0xf] }
  0x8a   :  { %1033 = vmatpush.bf16.msrb.mxu2 %v6340_v28  ;;  %1047 = vmatpush.bf16.msrb.mxu3 %v6344_v29  ;;  %v7695_v28 = vld [vmem:[#allocation8 + $0xa20] sm:$0xf]  ;;  %v7312_v29 = vor.u32 %v8802_v27, %v7311_v26  ;;  %v8766_v5 = vld [vmem:[#allocation8 + $0x62c] sm:$0xf0]  ;;  %v6644_v26 = vor.u32 %v8628_v21, %v6641_v22  ;;  %v8616_v34 = vld [vmem:[#allocation8 + $0x184] sm:$0xf] }
  0x8b   :  { %v7696_v31 = vor.u32 %v8898_v30, %v7695_v28  ;;  %v7551_v8 = vld [vmem:[#allocation8 + $0x900] sm:$0xf]  ;;  %v8862_v9 = vld [vmem:[#allocation8 + $0x92c] sm:$0xf0]  ;;  %v8832_v28 = vld [vmem:[#allocation8 + $0x844] sm:$0xf] }
  0x8c   :  { %v8928_v30 = vld [vmem:[#allocation8 + $0xb44] sm:$0xf]  ;;  %v6449_v21 = vld [vmem:[#allocation8 + $0x90] sm:$0xf0] }
  0x8d   :  { %3398 = vmatpush.bf16.msra.mxu0 %v6736_v32  ;;  %3412 = vmatpush.bf16.msra.mxu1 %v7120_v35  ;;  %v6447_v32 = vld [vmem:[#allocation8 + $0x60] sm:$0xf]  ;;  %v8712_v36 = vld [vmem:[#allocation8 + $0x484] sm:$0xf] }
  0x8e   :  { %3426 = vmatpush.bf16.msra.mxu2 %v7504_v45  ;;  %v6448_v35 = vor.u32 %v8586_v33, %v6447_v32  ;;  %v8574_v45 = vld [vmem:[#allocation8 + $0x2c] sm:$0xf0]  ;;  %v7841_v32 = vld [vmem:[#allocation8 + $0xb70] sm:$0xf0]  ;;  %v8820_v40 = vld [vmem:[#allocation8 + $0x7e4] sm:$0xf] }
  0x8f   :  { %v7844_v33 = vor.u32 %v8928_v30, %v7841_v32  ;;  %v8916_v42 = vld [vmem:[#allocation8 + $0xae4] sm:$0xf]  ;;  %v7649_v30 = vld [vmem:[#allocation8 + $0x9f0] sm:$0xf0] }
  0x90   :  { %v8676_v22 = vld [vmem:[#allocation8 + $0x364] sm:$0xf] }
  0x91   :  { %3399 = vmatpush.bf16.msra.mxu0 %v6688_v39  ;;  %3413 = vmatpush.bf16.msra.mxu1 %v7072_v41  ;;  %v8790_v39 = vld [vmem:[#allocation8 + $0x6ec] sm:$0xf0]  ;;  %v8568_v32 = vld [vmem:[#allocation8 + $0x4] sm:$0xf] }
  0x92   :  { %3427 = vmatpush.bf16.msra.mxu2 %v7456_v55  ;;  %v7264_v41 = vor.u32 %v8790_v39, %v7263_v38  ;;  %v7215_v55 = vld [vmem:[#allocation8 + $0x660] sm:$0xf]  ;;  %v6977_v38 = vld [vmem:[#allocation8 + $0x4b0] sm:$0xf0] }
  0x93   :  { %v7216_v58 = vor.u32 %v8778_v56, %v7215_v55  ;;  %v6980_v39 = vor.u32 %v8712_v36, %v6977_v38  ;;  %v8808_v56 = vld [vmem:[#allocation8 + $0x784] sm:$0xf]  ;;  %v6785_v36 = vld [vmem:[#allocation8 + $0x330] sm:$0xf0] }
  0x94   :  { %v8772_v38 = vld [vmem:[#allocation8 + $0x664] sm:$0xf] }
  0x95   :  { %3400 = vmatpush.bf16.msra.mxu0 %v6640_v49  ;;  %3414 = vmatpush.bf16.msra.mxu1 %v7024_v52  ;;  %v8670_v49 = vld [vmem:[#allocation8 + $0x32c] sm:$0xf0]  ;;  %v6737_v52 = vld [vmem:[#allocation8 + $0x2d0] sm:$0xf0] }
  0x96   :  { %3428 = vmatpush.bf16.msra.mxu2 %v7408_v4  ;;  %v6740_v53 = vor.u32 %v8652_v51, %v6737_v52  ;;  %v7167_v4 = vld [vmem:[#allocation8 + $0x600] sm:$0xf]  ;;  %v6545_v51 = vld [vmem:[#allocation8 + $0x150] sm:$0xf0] }
  0x97   :  { %6393 = vmatmul.msk.bf16.vlgmr.msrb.gmra.mxu0 %vm227_vm0, %v9665_v60  ;;  %6394 = vmatmul.msk.bf16.vlgmr.msrb.gmra.mxu1 %vm227_vm0, %v9665_v60  ;;  %v7168_v7 = vor.u32 %v8766_v5, %v7167_v4  ;;  %v8796_v5 = vld [vmem:[#allocation8 + $0x724] sm:$0xf] }
  0x98   :  { %6395 = vmatmul.msk.bf16.vlgmr.msrb.gmra.mxu2 %vm227_vm0, %v9665_v60  ;;  %6396 = vmatmul.msk.bf16.vlgmr.msrb.gmra.mxu3 %vm227_vm0, %v9665_v60  ;;  %v8946_v60 = vld [vmem:[#allocation8 + $0xbcc] sm:$0xf0] }
  0x99   :  { %v7888_v48 = vor.u32 %v8946_v60, %v7887_v44  ;;  %3401 = vmatpush.bf16.msra.mxu0 %v6592_v61  ;;  %3415 = vmatpush.bf16.msra.mxu1 %v6976_v0  ;;  %v6399_v44 = vld [vmem:[#allocation8] sm:$0xf]  ;;  %v8874_v61 = vld [vmem:[#allocation8 + $0x98c] sm:$0xf0]  ;;  %v6689_v0 = vld [vmem:[#allocation8 + $0x270] sm:$0xf0] }
  0x9a   :  { %3429 = vmatpush.bf16.msra.mxu2 %v7360_v17  ;;  %v6400_v47 = vor.u32 %v8574_v45, %v6399_v44  ;;  %v7600_v62 = vor.u32 %v8874_v61, %v7599_v59  ;;  %v6692_v2 = vor.u32 %v8640_v63, %v6689_v0  ;;  %v7745_v61 = vld [vmem:[#allocation8 + $0xab0] sm:$0xf0]  ;;  %v8592_v63 = vld [vmem:[#allocation8 + $0xc4] sm:$0xf] }
  0x9b   :  { %3440 = vmatpush.bf16.msra.mxu3 %v7888_v48  ;;  %v6783_v48 = vld [vmem:[#allocation8 + $0x300] sm:$0xf]  ;;  %v6497_v0 = vld [vmem:[#allocation8 + $0xf0] sm:$0xf0] }
  0x9c   :  { %v6784_v50 = vor.u32 %v8670_v49, %v6783_v48 }
  0x9d   :  { %3402 = vmatpush.bf16.msra.mxu0 %v6544_v10  ;;  %3416 = vmatpush.bf16.msra.mxu1 %v6928_v12  ;;  %v7552_v12 = vor.u32 %v8862_v9, %v7551_v8 }
  0x9e   :  { %3430 = vmatpush.bf16.msra.mxu2 %v7312_v29  ;;  %v7457_v29 = vld [vmem:[#allocation8 + $0x870] sm:$0xf0] }
  0x9f   :  { %3441 = vmatpush.bf16.msra.mxu3 %v7840_v57  ;;  %v7124_v57 = vor.u32 %v8748_v15, %v7121_v54  ;;  %v6929_v54 = vld [vmem:[#allocation8 + $0x450] sm:$0xf0] }
  0xa1   :  { %3403 = vmatpush.bf16.msra.mxu0 %v6496_v23  ;;  %3417 = vmatpush.bf16.msra.mxu1 %v6880_v25  ;;  %v7892_v23 = vor.u32 %v8940_v16, %v7889_v20  ;;  %v7025_v25 = vld [vmem:[#allocation8 + $0x510] sm:$0xf0]  ;;  %v8580_v20 = vld [vmem:[#allocation8 + $0x64] sm:$0xf] }
  0xa2   :  { %3431 = vmatpush.bf16.msra.mxu2 %v7264_v41  ;;  %v7028_v27 = vor.u32 %v8724_v24, %v7025_v25  ;;  %v7409_v41 = vld [vmem:[#allocation8 + $0x810] sm:$0xf0] }
  0xa3   :  { %3442 = vmatpush.bf16.msra.mxu3 %v7792_v6  ;;  %v7076_v6 = vor.u32 %v8736_v1, %v7073_v3  ;;  %v7412_v45 = vor.u32 %v8820_v40, %v7409_v41  ;;  %v8688_v1 = vld [vmem:[#allocation8 + $0x3c4] sm:$0xf]  ;;  %v6881_v3 = vld [vmem:[#allocation8 + $0x3f0] sm:$0xf0] }
  0xa4   :  { %v6884_v4 = vor.u32 %v8688_v1, %v6881_v3  ;;  %v6833_v24 = vld [vmem:[#allocation8 + $0x390] sm:$0xf0] }
  0xa5   :  { %3404 = vmatpush.bf16.msra.mxu0 %v6448_v35  ;;  %3418 = vmatpush.bf16.msra.mxu1 %v6832_v37  ;;  %v6593_v35 = vld [vmem:[#allocation8 + $0x1b0] sm:$0xf0]  ;;  %v6836_v25 = vor.u32 %v8676_v22, %v6833_v24 }
  0xa6   :  { %3432 = vmatpush.bf16.msra.mxu2 %v7216_v58  ;;  %v6596_v37 = vor.u32 %v8616_v34, %v6593_v35  ;;  %v8904_v58 = vld [vmem:[#allocation8 + $0xa84] sm:$0xf]  ;;  %v7217_v41 = vld [vmem:[#allocation8 + $0x690] sm:$0xf0] }
  0xa7   :  { %3443 = vmatpush.bf16.msra.mxu3 %v7744_v19  ;;  %v7508_v19 = vor.u32 %v8844_v13, %v7505_v14  ;;  %v7697_v13 = vld [vmem:[#allocation8 + $0xa50] sm:$0xf0]  ;;  %v8664_v34 = vld [vmem:[#allocation8 + $0x304] sm:$0xf] }
  0xa9   :  { %3405 = vmatpush.bf16.msra.mxu0 %v6400_v47  ;;  %3419 = vmatpush.bf16.msra.mxu1 %v6784_v50  ;;  %v7793_v47 = vld [vmem:[#allocation8 + $0xb10] sm:$0xf0]  ;;  %v8604_v50 = vld [vmem:[#allocation8 + $0x124] sm:$0xf] }
  0xaa   :  { %3433 = vmatpush.bf16.msra.mxu2 %v7168_v7  ;;  %v7796_v52 = vor.u32 %v8916_v42, %v7793_v47  ;;  %v6548_v15 = vor.u32 %v8604_v50, %v6545_v51  ;;  %v8868_v42 = vld [vmem:[#allocation8 + $0x964] sm:$0xf]  ;;  %v7220_v51 = vor.u32 %v8772_v38, %v7217_v41 }
  0xab   :  { %3444 = vmatpush.bf16.msra.mxu3 %v7696_v31  ;;  %v7460_v31 = vor.u32 %v8832_v28, %v7457_v29  ;;  %v8880_v28 = vld [vmem:[#allocation8 + $0x9c4] sm:$0xf] }
  0xad   :  { %3454 = vmatpush.bf16.msrb.mxu0 %v6740_v53  ;;  %3468 = vmatpush.bf16.msrb.mxu1 %v7124_v57  ;;  %v8700_v53 = vld [vmem:[#allocation8 + $0x424] sm:$0xf]  ;;  %v7361_v57 = vld [vmem:[#allocation8 + $0x7b0] sm:$0xf0] }
  0xae   :  { %3482 = vmatpush.bf16.msrb.mxu2 %v7508_v19  ;;  %v6932_v55 = vor.u32 %v8700_v53, %v6929_v54  ;;  %v7364_v59 = vor.u32 %v8808_v56, %v7361_v57  ;;  %v7169_v53 = vld [vmem:[#allocation8 + $0x630] sm:$0xf0] }
  0xaf   :  { %3445 = vmatpush.bf16.msra.mxu3 %v7648_v43  ;;  %v7553_v56 = vld [vmem:[#allocation8 + $0x930] sm:$0xf0] }
  0xb1   :  { %3455 = vmatpush.bf16.msrb.mxu0 %v6692_v2  ;;  %3469 = vmatpush.bf16.msrb.mxu1 %v7076_v6  ;;  %v6500_v2 = vor.u32 %v8592_v63, %v6497_v0  ;;  %v7313_v6 = vld [vmem:[#allocation8 + $0x750] sm:$0xf0]  ;;  %v361_v0 = vld [vmem:[#allocation7] sm:$0xf] }
  0xb2   :  { %3483 = vmatpush.bf16.msrb.mxu2 %v7460_v31  ;;  %v7316_v9 = vor.u32 %v8796_v5, %v7313_v6  ;;  %v7652_v31 = vor.u32 %v8880_v28, %v7649_v30  ;;  %v564_v63 = vld [vmem:[#allocation7 + $0x4] sm:$0xf]  ;;  %v363_v1 = vperm.slane %v361_v0, 0  ;;  %v9735_v5 = vld [vmem:[#allocation7 + $0x8] sm:$0xf]  ;;  %v365_v6 = vperm.slane %v361_v0, 2 }
  0xb3   :  { %3446 = vmatpush.bf16.msra.mxu3 %v7600_v62  ;;  %v7748_v62 = vor.u32 %v8904_v58, %v7745_v61  ;;  %v566_v3 = vperm.slane %v564_v63, 0  ;;  %v739_v24 = vperm.slane %v9735_v5, 1  ;;  %v740_v30 = vperm.slane %v9735_v5, 2 }
  0xb5   :  { %3456 = vmatpush.bf16.msrb.mxu0 %v6644_v26  ;;  %3470 = vmatpush.bf16.msrb.mxu1 %v7028_v27  ;;  %v8784_v26 = vld [vmem:[#allocation8 + $0x6c4] sm:$0xf]  ;;  %v7265_v27 = vld [vmem:[#allocation8 + $0x6f0] sm:$0xf0] }
  0xb6   :  { %3484 = vmatpush.bf16.msrb.mxu2 %v7412_v45  ;;  %v7268_v29 = vor.u32 %v8784_v26, %v7265_v27  ;;  %v7601_v45 = vld [vmem:[#allocation8 + $0x990] sm:$0xf0] }
  0xb7   :  { %3447 = vmatpush.bf16.msra.mxu3 %v7552_v12  ;;  %v8892_v12 = vld [vmem:[#allocation8 + $0xa24] sm:$0xf] }
  0xb8   :  { %v7700_v19 = vor.u32 %v8892_v12, %v7697_v13  ;;  %v568_v12 = vperm.slane %v564_v63, 2  ;;  %v569_v13 = vperm.slane %v564_v63, 3 }
  0xb9   :  { %3457 = vmatpush.bf16.msrb.mxu0 %v6596_v37  ;;  %3471 = vmatpush.bf16.msrb.mxu1 %v6980_v39  ;;  %v6788_v37 = vor.u32 %v8664_v34, %v6785_v36 }
  0xba   :  { %3485 = vmatpush.bf16.msrb.mxu2 %v7364_v59 }
  0xbb   :  { %3496 = vmatpush.bf16.msrb.mxu3 %v7892_v23  ;;  %v6452_v23 = vor.u32 %v8580_v20, %v6449_v21 }
  0xbd   :  { %3458 = vmatpush.bf16.msrb.mxu0 %v6548_v15  ;;  %3472 = vmatpush.bf16.msrb.mxu1 %v6932_v55  ;;  %v8760_v15 = vld [vmem:[#allocation8 + $0x604] sm:$0xf] }
  0xbe   :  { %3486 = vmatpush.bf16.msrb.mxu2 %v7316_v9  ;;  %v7172_v54 = vor.u32 %v8760_v15, %v7169_v53  ;;  %v8856_v55 = vld [vmem:[#allocation8 + $0x904] sm:$0xf]  ;;  %v366_v9 = vperm.slane %v361_v0, 3 }
  0xbf   :  { %3497 = vmatpush.bf16.msrb.mxu3 %v7844_v33  ;;  %v6401_v33 = vld [vmem:[#allocation8 + $0x30] sm:$0xf0]  ;;  %v7556_v57 = vor.u32 %v8856_v55, %v7553_v56 }
  0xc0   :  { %v6404_v35 = vor.u32 %v8568_v32, %v6401_v33 }
  0xc1   :  { %3459 = vmatpush.bf16.msrb.mxu0 %v6500_v2  ;;  %3473 = vmatpush.bf16.msrb.mxu1 %v6884_v4  ;;  %v364_v2 = vperm.slane %v361_v0, 1  ;;  %v567_v4 = vperm.slane %v564_v63, 1  ;;  %v8659_v0 = vld [vmem:[#allocation8 + $0x2d4] sm:$0xf0] }
  0xc2   :  { %3487 = vmatpush.bf16.msrb.mxu2 %v7268_v29 }
  0xc3   :  { %3498 = vmatpush.bf16.msrb.mxu3 %v7796_v52  ;;  %v7604_v52 = vor.u32 %v8868_v42, %v7601_v45 }
  0xc5   :  { %3460 = vmatpush.bf16.msrb.mxu0 %v6452_v23  ;;  %3474 = vmatpush.bf16.msrb.mxu1 %v6836_v25  ;;  %v738_v23 = vperm.slane %v9735_v5, 0  ;;  %v9743_v25 = vld [vmem:[#allocation7 + $0xc] sm:$0xf] }
  0xc6   :  { %3488 = vmatpush.bf16.msrb.mxu2 %v7220_v51  ;;  %v913_v45 = vperm.slane %v9743_v25, 3 }
  0xc7   :  { %3499 = vmatpush.bf16.msrb.mxu3 %v7748_v62 }
  0xc9   :  { %3461 = vmatpush.bf16.msrb.mxu0 %v6404_v35  ;;  %3475 = vmatpush.bf16.msrb.mxu1 %v6788_v37  ;;  %v911_v35 = vperm.slane %v9743_v25, 1 }
  0xca   :  { %3489 = vmatpush.bf16.msrb.mxu2 %v7172_v54 }
  0xcb   :  { %3500 = vmatpush.bf16.msrb.mxu3 %v7700_v19 }
  0xcf   :  { %3501 = vmatpush.bf16.msrb.mxu3 %v7652_v31  ;;  %v741_v31 = vperm.slane %v9735_v5, 3 }
  0xd3   :  { %3502 = vmatpush.bf16.msrb.mxu3 %v7604_v52 }
  0xd7   :  { %3503 = vmatpush.bf16.msrb.mxu3 %v7556_v57  ;;  %v6743_v57 = vld [vmem:[#allocation8 + $0x2a8] sm:$0xf] }
  0xe4   :  { %v9699_v60 = vpop.f32.mrf.mxu0  ;;  %v9701_v46 = vpop.f32.mrf.mxu1 }
  0xe5   :  { %v500_v21 = vadd.f32 %v9699_v60, %v363_v1  ;;  %v514_v22 = vadd.f32 %v9701_v46, %v364_v2 }
  0xeb   :  { %v9703_v10 = vpop.f32.mrf.mxu2  ;;  %v9705_v11 = vpop.f32.mrf.mxu3 }
  0xec   :  { %v9707_v17 = vpop.f32.mrf.mxu0  ;;  %v9709_v18 = vpop.f32.mrf.mxu1  ;;  %v9750_v60 = vadd.f32 %v9703_v10, %v365_v6  ;;  %v9753_v46 = vadd.f32 %v9705_v11, %v366_v9 }
  0xed   :  { %v502_v32 = vadd.f32 %v9707_v17, %v363_v1  ;;  %v516_v33 = vadd.f32 %v9709_v18, %v364_v2  ;;  %v7127_v1 = vld [vmem:[#allocation8 + $0x5a8] sm:$0xf]  ;;  %v8755_v2 = vld [vmem:[#allocation8 + $0x5d4] sm:$0xf0] }
  0xf3   :  { %v9711_v43 = vpop.f32.mrf.mxu2  ;;  %v9713_v44 = vpop.f32.mrf.mxu3 }
  0xf4   :  { %v9715_v48 = vpop.f32.mrf.mxu0  ;;  %v9717_v49 = vpop.f32.mrf.mxu1  ;;  %v530_v36 = vadd.f32 %v9711_v43, %v365_v6  ;;  %v9763_v10 = vadd.f32 %v9713_v44, %v366_v9 }
  0xf5   :  { %v664_v28 = vadd.f32 %v9715_v48, %v566_v3  ;;  %v678_v29 = vadd.f32 %v9717_v49, %v567_v4  ;;  %v910_v49 = vperm.slane %v9743_v25, 0 }
  0xf7   :  { %v710_v38 = vmax.f32 %v500_v21, %v664_v28  ;;  %v711_v41 = vmax.f32 %v514_v22, %v678_v29  ;;  %v8647_v21 = vld [vmem:[#allocation8 + $0x274] sm:$0xf0]  ;;  %v7079_v22 = vld [vmem:[#allocation8 + $0x548] sm:$0xf] }
  0xfb   :  { %v9719_v7 = vpop.f32.mrf.mxu2  ;;  %v9721_v8 = vpop.f32.mrf.mxu3 }
  0xfc   :  { %v9723_v14 = vpop.f32.mrf.mxu0  ;;  %v9725_v16 = vpop.f32.mrf.mxu1  ;;  %v692_v18 = vadd.f32 %v9719_v7, %v568_v12 }
  0xfd   :  { %v666_v34 = vadd.f32 %v9723_v14, %v566_v3  ;;  %v680_v48 = vadd.f32 %v9725_v16, %v567_v4  ;;  %v706_v14 = vadd.f32 %v9721_v8, %v569_v13  ;;  %v912_v16 = vperm.slane %v9743_v25, 2 }
  0xfe   :  { %v712_v3 = vmax.f32 %v9750_v60, %v692_v18 }
  0xff   :  { %v714_v51 = vmax.f32 %v502_v32, %v666_v34  ;;  %v715_v52 = vmax.f32 %v516_v33, %v680_v48 }
 0x103   :  { %v9727_v39 = vpop.f32.mrf.mxu2  ;;  %v9729_v40 = vpop.f32.mrf.mxu3 }
 0x104   :  { %v835_v47 = vpop.f32.mrf.mxu0  ;;  %v849_v50 = vpop.f32.mrf.mxu1 }
 0x105   :  { %v836_v37 = vadd.f32 %v835_v47, %v738_v23  ;;  %v850_v11 = vadd.f32 %v849_v50, %v739_v24  ;;  %v694_v47 = vadd.f32 %v9727_v39, %v568_v12  ;;  %v708_v50 = vadd.f32 %v9729_v40, %v569_v13  ;;  %v6695_v40 = vld [vmem:[#allocation8 + $0x248] sm:$0xf] }
 0x106   :  { %v6696_v60 = vor.u32 %v8647_v21, %v6695_v40  ;;  %v6935_v40 = vld [vmem:[#allocation8 + $0x428] sm:$0xf]  ;;  %v8815_v21 = vld [vmem:[#allocation8 + $0x7b4] sm:$0xf0] }
 0x107   :  { %v882_v54 = vmax.f32 %v710_v38, %v836_v37  ;;  %v883_v55 = vmax.f32 %v711_v41, %v850_v11  ;;  %v716_v28 = vmax.f32 %v530_v36, %v694_v47  ;;  %v8947_v11 = vld [vmem:[#allocation8 + $0xbd4] sm:$0xf0]  ;;  %v6647_v38 = vld [vmem:[#allocation8 + $0x1e8] sm:$0xf] }
 0x108   :  { %v8635_v41 = vld [vmem:[#allocation8 + $0x214] sm:$0xf0] }
 0x109   :  { %v8839_v47 = vld [vmem:[#allocation8 + $0x874] sm:$0xf0] }
 0x10b   :  { %v9731_v58 = vpop.f32.mrf.mxu2  ;;  %v9733_v59 = vpop.f32.mrf.mxu3 }
 0x10c   :  { %v837_v61 = vpop.f32.mrf.mxu0  ;;  %v851_v62 = vpop.f32.mrf.mxu1  ;;  %v864_v4 = vadd.f32 %v9731_v58, %v740_v30  ;;  %v878_v39 = vadd.f32 %v9733_v59, %v741_v31  ;;  %v717_v58 = vmax.f32 %v9763_v10, %v708_v50 }
 0x10d   :  { %v838_v17 = vadd.f32 %v837_v61, %v738_v23  ;;  %v852_v42 = vadd.f32 %v851_v62, %v739_v24  ;;  %v8743_v23 = vld [vmem:[#allocation8 + $0x574] sm:$0xf0]  ;;  %v713_v24 = vmax.f32 %v9753_v46, %v706_v14 }
 0x10e   :  { %v7080_v32 = vor.u32 %v8743_v23, %v7079_v22  ;;  %v884_v33 = vmax.f32 %v712_v3, %v864_v4  ;;  %v7799_v3 = vld [vmem:[#allocation8 + $0xae8] sm:$0xf]  ;;  %v8923_v4 = vld [vmem:[#allocation8 + $0xb14] sm:$0xf0] }
 0x10f   :  { %v886_v8 = vmax.f32 %v714_v51, %v838_v17  ;;  %v887_v61 = vmax.f32 %v715_v52, %v852_v42  ;;  %v885_v34 = vmax.f32 %v713_v24, %v878_v39  ;;  %v7031_v17 = vld [vmem:[#allocation8 + $0x4e8] sm:$0xf]  ;;  %v8731_v42 = vld [vmem:[#allocation8 + $0x514] sm:$0xf0] }
 0x110   :  { %v6551_v39 = vld [vmem:[#allocation8 + $0x128] sm:$0xf]  ;;  %v8911_v23 = vld [vmem:[#allocation8 + $0xab4] sm:$0xf0] }
 0x111   :  { %v7751_v22 = vld [vmem:[#allocation8 + $0xa88] sm:$0xf] }
 0x113   :  { %v865_v19 = vpop.f32.mrf.mxu2  ;;  %v9737_v20 = vpop.f32.mrf.mxu3 }
 0x114   :  { %v1007_v26 = vpop.f32.mrf.mxu0  ;;  %v1021_v27 = vpop.f32.mrf.mxu1  ;;  %v866_v5 = vadd.f32 %v865_v19, %v740_v30  ;;  %v880_v25 = vadd.f32 %v9737_v20, %v741_v31  ;;  %v7511_v20 = vld [vmem:[#allocation8 + $0x8a8] sm:$0xf]  ;;  %v8851_v31 = vld [vmem:[#allocation8 + $0x8d4] sm:$0xf0] }
 0x115   :  { %v1008_v43 = vadd.f32 %v1007_v26, %v910_v49  ;;  %v1022_v15 = vadd.f32 %v1021_v27, %v911_v35  ;;  %v6744_v26 = vor.u32 %v8659_v0, %v6743_v57  ;;  %v7128_v27 = vor.u32 %v8755_v2, %v7127_v1  ;;  %v6983_v57 = vld [vmem:[#allocation8 + $0x488] sm:$0xf]  ;;  %v8827_v2 = vld [vmem:[#allocation8 + $0x814] sm:$0xf0] }
 0x116   :  { %v888_v48 = vmax.f32 %v716_v28, %v866_v5  ;;  %v889_v36 = vmax.f32 %v717_v58, %v880_v25  ;;  %v8611_v5 = vld [vmem:[#allocation8 + $0x154] sm:$0xf0]  ;;  %v6887_v28 = vld [vmem:[#allocation8 + $0x3c8] sm:$0xf] }
 0x117   :  { %v1054_v6 = vmax.f32 %v882_v54, %v1008_v43  ;;  %v1055_v9 = vmax.f32 %v883_v55, %v1022_v15  ;;  %v7512_v43 = vor.u32 %v8851_v31, %v7511_v20  ;;  %v7847_v54 = vld [vmem:[#allocation8 + $0xb48] sm:$0xf]  ;;  %v8935_v55 = vld [vmem:[#allocation8 + $0xb74] sm:$0xf0]  ;;  %v6552_v24 = vor.u32 %v8611_v5, %v6551_v39 }
 0x118   :  { %v8695_v58 = vld [vmem:[#allocation8 + $0x3f4] sm:$0xf0]  ;;  %v6839_v31 = vld [vmem:[#allocation8 + $0x368] sm:$0xf] }
 0x119   :  { %v8587_v20 = vld [vmem:[#allocation8 + $0x94] sm:$0xf0]  ;;  %v7175_v39 = vld [vmem:[#allocation8 + $0x608] sm:$0xf] }
 0x11a   :  { %v8767_v5 = vld [vmem:[#allocation8 + $0x634] sm:$0xf0] }
 0x11b   :  { %v1035_v44 = vpop.f32.mrf.mxu2  ;;  %v1049_v53 = vpop.f32.mrf.mxu3 }
 0x11c   :  { %v1009_v56 = vpop.f32.mrf.mxu0  ;;  %v1023_v7 = vpop.f32.mrf.mxu1  ;;  %v1036_v19 = vadd.f32 %v1035_v44, %v912_v16  ;;  %v1050_v30 = vadd.f32 %v1049_v53, %v913_v45  ;;  %v6648_v44 = vor.u32 %v8635_v41, %v6647_v38  ;;  %v7463_v53 = vld [vmem:[#allocation8 + $0x848] sm:$0xf]  ;;  %v8887_v41 = vld [vmem:[#allocation8 + $0x9f4] sm:$0xf0] }
 0x11d   :  { %v1010_v62 = vadd.f32 %v1009_v56, %v910_v49  ;;  %v1024_v63 = vadd.f32 %v1023_v7, %v911_v35  ;;  %v7895_v35 = vld [vmem:[#allocation8 + $0xba8] sm:$0xf]  ;;  %v8623_v7 = vld [vmem:[#allocation8 + $0x1b4] sm:$0xf0] }
 0x11e   :  { %v1056_v18 = vmax.f32 %v884_v33, %v1036_v19  ;;  %v1057_v14 = vmax.f32 %v885_v34, %v1050_v30  ;;  %v7896_v15 = vor.u32 %v8947_v11, %v7895_v35  ;;  %v6599_v56 = vld [vmem:[#allocation8 + $0x188] sm:$0xf]  ;;  %v7752_v30 = vor.u32 %v8911_v23, %v7751_v22  ;;  %v8899_v34 = vld [vmem:[#allocation8 + $0xa54] sm:$0xf0] }
 0x11f   :  { %v1058_v12 = vmax.f32 %v886_v8, %v1010_v62  ;;  %v1059_v13 = vmax.f32 %v887_v61, %v1024_v63  ;;  %v8719_v8 = vld [vmem:[#allocation8 + $0x4b4] sm:$0xf0]  ;;  %v7464_v61 = vor.u32 %v8839_v47, %v7463_v53  ;;  %v7848_v62 = vor.u32 %v8935_v55, %v7847_v54  ;;  %v7415_v63 = vld [vmem:[#allocation8 + $0x7e8] sm:$0xf]  ;;  %v8749_v47 = vld [vmem:[#allocation8 + $0x5ac] sm:$0xf] }
 0x120   :  { %v6600_v0 = vor.u32 %v8623_v7, %v6599_v56  ;;  %v6984_v1 = vor.u32 %v8719_v8, %v6983_v57  ;;  %v7703_v33 = vld [vmem:[#allocation8 + $0xa28] sm:$0xf]  ;;  %v8683_v35 = vld [vmem:[#allocation8 + $0x394] sm:$0xf0] }
 0x121   :  { %v9777_v29 = vpack.c.bf16 %v1058_v12, %v1054_v6  ;;  %v9779_v59 = vpack.c.bf16 %v1059_v13, %v1055_v9  ;;  %v8707_v6 = vld [vmem:[#allocation8 + $0x454] sm:$0xf0]  ;;  %v7416_v9 = vor.u32 %v8827_v2, %v7415_v63  ;;  %v7800_v12 = vor.u32 %v8923_v4, %v7799_v3  ;;  %v7367_v13 = vld [vmem:[#allocation8 + $0x788] sm:$0xf]  ;;  %v8641_v63 = vld [vmem:[#allocation8 + $0x24c] sm:$0xf] }
 0x122   :  { %v6936_v25 = vor.u32 %v8707_v6, %v6935_v40  ;;  %v7368_v19 = vor.u32 %v8815_v21, %v7367_v13  ;;  %v8791_v11 = vld [vmem:[#allocation8 + $0x6f4] sm:$0xf0]  ;;  %v7655_v38 = vld [vmem:[#allocation8 + $0x9c8] sm:$0xf]  ;;  %v7081_v4 = vld [vmem:[#allocation8 + $0x578] sm:$0xf0] }
 0x123   :  { %v1037_v49 = vpop.f32.mrf.mxu2  ;;  %v1051_v46 = vpop.f32.mrf.mxu3  ;;  %3406 = vmatmul.bf16.vlgmr.msra.gmra.mxu0 %v9777_v29  ;;  %3420 = vmatmul.bf16.vlgmr.msra.gmra.mxu1 %v9779_v59  ;;  %v7656_v53 = vor.u32 %v8887_v41, %v7655_v38  ;;  %v7223_v54 = vld [vmem:[#allocation8 + $0x668] sm:$0xf]  ;;  %v8779_v55 = vld [vmem:[#allocation8 + $0x694] sm:$0xf0]  ;;  %v8941_v13 = vld [vmem:[#allocation8 + $0xbac] sm:$0xf] }
 0x124   :  { %v1038_v10 = vadd.f32 %v1037_v49, %v912_v16  ;;  %v1052_v37 = vadd.f32 %v1051_v46, %v913_v45  ;;  %3510 = vmatpush.bf16.msra.mxu0 %v6744_v26  ;;  %3524 = vmatpush.bf16.msra.mxu1 %v7128_v27  ;;  %v7032_v45 = vor.u32 %v8731_v42, %v7031_v17  ;;  %v6503_v26 = vld [vmem:[#allocation8 + $0xc8] sm:$0xf]  ;;  %v8599_v27 = vld [vmem:[#allocation8 + $0xf4] sm:$0xf0]  ;;  %v7897_v21 = vld [vmem:[#allocation8 + $0xbd8] sm:$0xf0] }
 0x125   :  { %v6888_v49 = vor.u32 %v8695_v58, %v6887_v28  ;;  %v6455_v46 = vld [vmem:[#allocation8 + $0x68] sm:$0xf]  ;;  %v6840_v42 = vor.u32 %v8683_v35, %v6839_v31  ;;  %v8875_v7 = vld [vmem:[#allocation8 + $0x994] sm:$0xf0]  ;;  %v7224_v2 = vor.u32 %v8779_v55, %v7223_v54  ;;  %v8725_v28 = vld [vmem:[#allocation8 + $0x4ec] sm:$0xf] }
 0x126   :  { %v1060_v51 = vmax.f32 %v888_v48, %v1038_v10  ;;  %v1061_v52 = vmax.f32 %v889_v36, %v1052_v37  ;;  %v6504_v48 = vor.u32 %v8599_v27, %v6503_v26  ;;  %v7704_v10 = vor.u32 %v8899_v34, %v7703_v33  ;;  %v7271_v37 = vld [vmem:[#allocation8 + $0x6c8] sm:$0xf]  ;;  %v8863_v6 = vld [vmem:[#allocation8 + $0x934] sm:$0xf0]  ;;  %v6649_v27 = vld [vmem:[#allocation8 + $0x218] sm:$0xf0] }
 0x127   :  { %v6456_v17 = vor.u32 %v8587_v20, %v6455_v46  ;;  %v7607_v56 = vld [vmem:[#allocation8 + $0x968] sm:$0xf]  ;;  %v7033_v58 = vld [vmem:[#allocation8 + $0x518] sm:$0xf0]  ;;  %v8929_v33 = vld [vmem:[#allocation8 + $0xb4c] sm:$0xf] }
 0x128   :  { %v9783_v50 = vpack.c.bf16 %v1060_v51, %v1056_v18  ;;  %v9785_v16 = vpack.c.bf16 %v1061_v52, %v1057_v14  ;;  %3511 = vmatpush.bf16.msra.mxu0 %v6696_v60  ;;  %3525 = vmatpush.bf16.msra.mxu1 %v7080_v32  ;;  %v7319_v60 = vld [vmem:[#allocation8 + $0x728] sm:$0xf]  ;;  %v8803_v32 = vld [vmem:[#allocation8 + $0x754] sm:$0xf0]  ;;  %v7608_v3 = vor.u32 %v8875_v7, %v7607_v56  ;;  %v7849_v34 = vld [vmem:[#allocation8 + $0xb78] sm:$0xf0] }
 0x129   :  { %v7320_v36 = vor.u32 %v8803_v32, %v7319_v60  ;;  %v6407_v18 = vld [vmem:[#allocation8 + $0x8] sm:$0xf]  ;;  %v8575_v14 = vld [vmem:[#allocation8 + $0x34] sm:$0xf0]  ;;  %v8833_v60 = vld [vmem:[#allocation8 + $0x84c] sm:$0xf] }
 0x12a   :  { %3434 = vmatmul.bf16.vlgmr.msra.gmra.mxu2 %v9783_v50  ;;  %3448 = vmatmul.bf16.vlgmr.msra.gmra.mxu3 %v9785_v16  ;;  %v6791_v51 = vld [vmem:[#allocation8 + $0x308] sm:$0xf]  ;;  %v8671_v52 = vld [vmem:[#allocation8 + $0x334] sm:$0xf0]  ;;  %v6408_v57 = vor.u32 %v8575_v14, %v6407_v18  ;;  %v7465_v32 = vld [vmem:[#allocation8 + $0x878] sm:$0xf0] }
 0x12b   :  { %3538 = vmatpush.bf16.msra.mxu2 %v7512_v43  ;;  %3552 = vmatpush.bf16.msra.mxu3 %v7896_v15  ;;  %v8653_v43 = vld [vmem:[#allocation8 + $0x2ac] sm:$0xf]  ;;  %v6745_v15 = vld [vmem:[#allocation8 + $0x2d8] sm:$0xf0]  ;;  %v6792_v8 = vor.u32 %v8671_v52, %v6791_v51  ;;  %v7559_v40 = vld [vmem:[#allocation8 + $0x908] sm:$0xf] }
 0x12c   :  { %3512 = vmatpush.bf16.msra.mxu0 %v6648_v44  ;;  %3526 = vmatpush.bf16.msra.mxu1 %v7032_v45  ;;  %v7272_v44 = vor.u32 %v8791_v11, %v7271_v37  ;;  %v7129_v45 = vld [vmem:[#allocation8 + $0x5d8] sm:$0xf0]  ;;  %v7560_v26 = vor.u32 %v8863_v6, %v7559_v40  ;;  %v8617_v46 = vld [vmem:[#allocation8 + $0x18c] sm:$0xf] }
 0x12d   :  { %v6601_v20 = vld [vmem:[#allocation8 + $0x1b8] sm:$0xf0]  ;;  %v8713_v31 = vld [vmem:[#allocation8 + $0x48c] sm:$0xf] }
 0x12e   :  { %v6985_v35 = vld [vmem:[#allocation8 + $0x4b8] sm:$0xf0]  ;;  %v8821_v37 = vld [vmem:[#allocation8 + $0x7ec] sm:$0xf] }
 0x12f   :  { %3539 = vmatpush.bf16.msra.mxu2 %v7464_v61  ;;  %3553 = vmatpush.bf16.msra.mxu3 %v7848_v62  ;;  %v6748_v61 = vor.u32 %v8653_v43, %v6745_v15  ;;  %v7132_v62 = vor.u32 %v8749_v47, %v7129_v45  ;;  %v7417_v11 = vld [vmem:[#allocation8 + $0x818] sm:$0xf0]  ;;  %v8917_v38 = vld [vmem:[#allocation8 + $0xaec] sm:$0xf] }
 0x130   :  { %3513 = vmatpush.bf16.msra.mxu0 %v6600_v0  ;;  %3527 = vmatpush.bf16.msra.mxu1 %v6984_v1  ;;  %v6697_v0 = vld [vmem:[#allocation8 + $0x278] sm:$0xf0]  ;;  %v8737_v1 = vld [vmem:[#allocation8 + $0x54c] sm:$0xf]  ;;  %v7420_v43 = vor.u32 %v8821_v37, %v7417_v11  ;;  %v6703_v37 = vld [vmem:[#allocation8 + $0x250] sm:$0xf] }
 0x131   :  { %v6700_v22 = vor.u32 %v8641_v63, %v6697_v0  ;;  %v7084_v23 = vor.u32 %v8737_v1, %v7081_v4  ;;  %v7801_v41 = vld [vmem:[#allocation8 + $0xb18] sm:$0xf0]  ;;  %v8605_v18 = vld [vmem:[#allocation8 + $0x12c] sm:$0xf]  ;;  %v8648_v11 = vld [vmem:[#allocation8 + $0x27c] sm:$0xf0] }
 0x132   :  { %v6553_v14 = vld [vmem:[#allocation8 + $0x158] sm:$0xf0]  ;;  %v8701_v51 = vld [vmem:[#allocation8 + $0x42c] sm:$0xf]  ;;  %v7804_v15 = vor.u32 %v8917_v38, %v7801_v41  ;;  %v7087_v38 = vld [vmem:[#allocation8 + $0x550] sm:$0xf] }
 0x133   :  { %3540 = vmatpush.bf16.msra.mxu2 %v7416_v9  ;;  %3554 = vmatpush.bf16.msra.mxu3 %v7800_v12  ;;  %v8845_v9 = vld [vmem:[#allocation8 + $0x8ac] sm:$0xf]  ;;  %v7513_v12 = vld [vmem:[#allocation8 + $0x8d8] sm:$0xf0]  ;;  %v6556_v54 = vor.u32 %v8605_v18, %v6553_v14 }
 0x134   :  { %3462 = vmatmul.bf16.vlgmr.msrb.gmra.mxu0 %v9777_v29  ;;  %3476 = vmatmul.bf16.vlgmr.msrb.gmra.mxu1 %v9779_v59  ;;  %v6937_v52 = vld [vmem:[#allocation8 + $0x458] sm:$0xf0]  ;;  %v8905_v47 = vld [vmem:[#allocation8 + $0xa8c] sm:$0xf] }
 0x135   :  { %3514 = vmatpush.bf16.msra.mxu0 %v6552_v24  ;;  %3528 = vmatpush.bf16.msra.mxu1 %v6936_v25  ;;  %v8629_v24 = vld [vmem:[#allocation8 + $0x1ec] sm:$0xf]  ;;  %v7176_v25 = vor.u32 %v8767_v5, %v7175_v39  ;;  %v7753_v45 = vld [vmem:[#allocation8 + $0xab8] sm:$0xf0]  ;;  %v6940_v55 = vor.u32 %v8701_v51, %v6937_v52 }
 0x136   :  { %v8593_v56 = vld [vmem:[#allocation8 + $0xcc] sm:$0xf]  ;;  %v6505_v7 = vld [vmem:[#allocation8 + $0xf8] sm:$0xf0] }
 0x137   :  { %3541 = vmatpush.bf16.msra.mxu2 %v7368_v19  ;;  %3555 = vmatpush.bf16.msra.mxu3 %v7752_v30  ;;  %v7516_v19 = vor.u32 %v8845_v9, %v7513_v12  ;;  %v7900_v30 = vor.u32 %v8941_v13, %v7897_v21  ;;  %v8797_v63 = vld [vmem:[#allocation8 + $0x72c] sm:$0xf]  ;;  %v7321_v0 = vld [vmem:[#allocation8 + $0x758] sm:$0xf0] }
 0x138   :  { %v8893_v1 = vld [vmem:[#allocation8 + $0xa2c] sm:$0xf]  ;;  %v6457_v5 = vld [vmem:[#allocation8 + $0x98] sm:$0xf0]  ;;  %v7324_v9 = vor.u32 %v8797_v63, %v7321_v0  ;;  %v7471_v63 = vld [vmem:[#allocation8 + $0x850] sm:$0xf] }
 0x139   :  { %3515 = vmatpush.bf16.msra.mxu0 %v6504_v48  ;;  %3529 = vmatpush.bf16.msra.mxu1 %v6888_v49  ;;  %v6652_v48 = vor.u32 %v8629_v24, %v6649_v27  ;;  %v7036_v49 = vor.u32 %v8725_v28, %v7033_v58  ;;  %v8581_v39 = vld [vmem:[#allocation8 + $0x6c] sm:$0xf]  ;;  %v6841_v6 = vld [vmem:[#allocation8 + $0x398] sm:$0xf0]  ;;  %v8840_v0 = vld [vmem:[#allocation8 + $0x87c] sm:$0xf0] }
 0x13a   :  { %3490 = vmatmul.bf16.vlgmr.msrb.gmra.mxu2 %v9783_v50  ;;  %3504 = vmatmul.bf16.vlgmr.msrb.gmra.mxu3 %v9785_v16  ;;  %v8677_v40 = vld [vmem:[#allocation8 + $0x36c] sm:$0xf]  ;;  %v7273_v21 = vld [vmem:[#allocation8 + $0x6f8] sm:$0xf0]  ;;  %v6460_v24 = vor.u32 %v8581_v39, %v6457_v5  ;;  %v6607_v39 = vld [vmem:[#allocation8 + $0x190] sm:$0xf] }
 0x13b   :  { %3542 = vmatpush.bf16.msra.mxu2 %v7320_v36  ;;  %3556 = vmatpush.bf16.msra.mxu3 %v7704_v10  ;;  %v7468_v36 = vor.u32 %v8833_v60, %v7465_v32  ;;  %v7852_v10 = vor.u32 %v8929_v33, %v7849_v34  ;;  %v8785_v13 = vld [vmem:[#allocation8 + $0x6cc] sm:$0xf]  ;;  %v6409_v27 = vld [vmem:[#allocation8 + $0x38] sm:$0xf0]  ;;  %v7135_v33 = vld [vmem:[#allocation8 + $0x5b0] sm:$0xf] }
 0x13c   :  { %v8665_v28 = vld [vmem:[#allocation8 + $0x30c] sm:$0xf]  ;;  %v6793_v58 = vld [vmem:[#allocation8 + $0x338] sm:$0xf0]  ;;  %v7276_v60 = vor.u32 %v8785_v13, %v7273_v21  ;;  %v8756_v34 = vld [vmem:[#allocation8 + $0x5dc] sm:$0xf0] }
 0x13d   :  { %3516 = vmatpush.bf16.msra.mxu0 %v6456_v17  ;;  %3530 = vmatpush.bf16.msra.mxu1 %v6840_v42  ;;  %v6604_v17 = vor.u32 %v8617_v46, %v6601_v20  ;;  %v6988_v42 = vor.u32 %v8713_v31, %v6985_v35  ;;  %v8869_v46 = vld [vmem:[#allocation8 + $0x96c] sm:$0xf]  ;;  %v7609_v20 = vld [vmem:[#allocation8 + $0x998] sm:$0xf0]  ;;  %v6796_v35 = vor.u32 %v8665_v28, %v6793_v58  ;;  %v8624_v5 = vld [vmem:[#allocation8 + $0x1bc] sm:$0xf0] }
 0x13e   :  { %v8761_v18 = vld [vmem:[#allocation8 + $0x60c] sm:$0xf]  ;;  %v7177_v14 = vld [vmem:[#allocation8 + $0x638] sm:$0xf0]  ;;  %v7423_v13 = vld [vmem:[#allocation8 + $0x7f0] sm:$0xf] }
 0x13f   :  { %3543 = vmatpush.bf16.msra.mxu2 %v7272_v44  ;;  %3557 = vmatpush.bf16.msra.mxu3 %v7656_v53  ;;  %v8809_v44 = vld [vmem:[#allocation8 + $0x78c] sm:$0xf]  ;;  %v7369_v53 = vld [vmem:[#allocation8 + $0x7b8] sm:$0xf0]  ;;  %v8828_v21 = vld [vmem:[#allocation8 + $0x81c] sm:$0xf0] }
 0x140   :  { %v8857_v51 = vld [vmem:[#allocation8 + $0x90c] sm:$0xf]  ;;  %v7561_v52 = vld [vmem:[#allocation8 + $0x938] sm:$0xf0]  ;;  %v7424_v28 = vor.u32 %v8828_v21, %v7423_v13  ;;  %v8642_v13 = vld [vmem:[#allocation8 + $0x254] sm:$0xf] }
 0x141   :  { %3517 = vmatpush.bf16.msra.mxu0 %v6408_v57  ;;  %3531 = vmatpush.bf16.msra.mxu1 %v6792_v8  ;;  %v8689_v57 = vld [vmem:[#allocation8 + $0x3cc] sm:$0xf]  ;;  %v6889_v8 = vld [vmem:[#allocation8 + $0x3f8] sm:$0xf0]  ;;  %v6705_v21 = vld [vmem:[#allocation8 + $0x280] sm:$0xf0] }
 0x142   :  { %v6892_v4 = vor.u32 %v8689_v57, %v6889_v8 }
 0x143   :  { %3544 = vmatpush.bf16.msra.mxu2 %v7224_v2  ;;  %3558 = vmatpush.bf16.msra.mxu3 %v7608_v3  ;;  %v7705_v2 = vld [vmem:[#allocation8 + $0xa58] sm:$0xf0]  ;;  %v6508_v3 = vor.u32 %v8593_v56, %v6505_v7  ;;  %v6655_v56 = vld [vmem:[#allocation8 + $0x1f0] sm:$0xf]  ;;  %v8636_v7 = vld [vmem:[#allocation8 + $0x21c] sm:$0xf0] }
 0x144   :  { %3518 = vmatmul.bf16.vlgmr.msra.gmra.mxu0 %v9777_v29  ;;  %3532 = vmatmul.bf16.vlgmr.msra.gmra.mxu1 %v9779_v59  ;;  %v7708_v12 = vor.u32 %v8893_v1, %v7705_v2  ;;  %v7855_v1 = vld [vmem:[#allocation8 + $0xb50] sm:$0xf]  ;;  %v8936_v2 = vld [vmem:[#allocation8 + $0xb7c] sm:$0xf0] }
 0x145   :  { %3566 = vmatpush.bf16.msrb.mxu0 %v6748_v61  ;;  %3580 = vmatpush.bf16.msrb.mxu1 %v7132_v62  ;;  %v7372_v61 = vor.u32 %v8809_v44, %v7369_v53  ;;  %v7756_v62 = vor.u32 %v8905_v47, %v7753_v45  ;;  %v7903_v44 = vld [vmem:[#allocation8 + $0xbb0] sm:$0xf]  ;;  %v8948_v53 = vld [vmem:[#allocation8 + $0xbdc] sm:$0xf0]  ;;  %v6704_v47 = vor.u32 %v8648_v11, %v6703_v37 }
 0x146   :  { %v7904_v8 = vor.u32 %v8948_v53, %v7903_v44  ;;  %v7327_v37 = vld [vmem:[#allocation8 + $0x730] sm:$0xf]  ;;  %v8804_v11 = vld [vmem:[#allocation8 + $0x75c] sm:$0xf0] }
 0x147   :  { %3545 = vmatpush.bf16.msra.mxu2 %v7176_v25  ;;  %3559 = vmatpush.bf16.msra.mxu3 %v7560_v26  ;;  %v6844_v25 = vor.u32 %v8677_v40, %v6841_v6  ;;  %v8569_v26 = vld [vmem:[#allocation8 + $0xc] sm:$0xf]  ;;  %v7472_v40 = vor.u32 %v8840_v0, %v7471_v63  ;;  %v7856_v6 = vor.u32 %v8936_v2, %v7855_v1  ;;  %v7279_v44 = vld [vmem:[#allocation8 + $0x6d0] sm:$0xf]  ;;  %v8792_v53 = vld [vmem:[#allocation8 + $0x6fc] sm:$0xf0] }
 0x148   :  { %v6412_v31 = vor.u32 %v8569_v26, %v6409_v27  ;;  %v6559_v26 = vld [vmem:[#allocation8 + $0x130] sm:$0xf]  ;;  %v8612_v27 = vld [vmem:[#allocation8 + $0x15c] sm:$0xf0]  ;;  %v8654_v63 = vld [vmem:[#allocation8 + $0x2b4] sm:$0xf] }
 0x149   :  { %3567 = vmatpush.bf16.msrb.mxu0 %v6700_v22  ;;  %3581 = vmatpush.bf16.msrb.mxu1 %v7084_v23  ;;  %v8881_v22 = vld [vmem:[#allocation8 + $0x9cc] sm:$0xf]  ;;  %v7657_v23 = vld [vmem:[#allocation8 + $0x9f8] sm:$0xf0]  ;;  %v6753_v0 = vld [vmem:[#allocation8 + $0x2e0] sm:$0xf0] }
 0x14a   :  { %3546 = vmatmul.bf16.vlgmr.msra.gmra.mxu2 %v9783_v50  ;;  %3560 = vmatmul.bf16.vlgmr.msra.gmra.mxu3 %v9785_v16  ;;  %v7660_v32 = vor.u32 %v8881_v22, %v7657_v23  ;;  %v7807_v22 = vld [vmem:[#allocation8 + $0xaf0] sm:$0xf]  ;;  %v8924_v23 = vld [vmem:[#allocation8 + $0xb1c] sm:$0xf0]  ;;  %v8750_v1 = vld [vmem:[#allocation8 + $0x5b4] sm:$0xf] }
 0x14b   :  { %3594 = vmatpush.bf16.msrb.mxu2 %v7516_v19  ;;  %3608 = vmatpush.bf16.msrb.mxu3 %v7900_v30  ;;  %v6751_v19 = vld [vmem:[#allocation8 + $0x2b0] sm:$0xf]  ;;  %v8660_v30 = vld [vmem:[#allocation8 + $0x2dc] sm:$0xf0]  ;;  %v7808_v58 = vor.u32 %v8924_v23, %v7807_v22  ;;  %v7137_v2 = vld [vmem:[#allocation8 + $0x5e0] sm:$0xf0] }
 0x14c   :  { %v8738_v22 = vld [vmem:[#allocation8 + $0x554] sm:$0xf] }
 0x14d   :  { %3568 = vmatpush.bf16.msrb.mxu0 %v6652_v48  ;;  %3582 = vmatpush.bf16.msrb.mxu1 %v7036_v49  ;;  %v8773_v48 = vld [vmem:[#allocation8 + $0x66c] sm:$0xf]  ;;  %v7225_v49 = vld [vmem:[#allocation8 + $0x698] sm:$0xf0] }
 0x14e   :  { %v7228_v41 = vor.u32 %v8773_v48, %v7225_v49  ;;  %v6560_v48 = vor.u32 %v8612_v27, %v6559_v26  ;;  %v7183_v26 = vld [vmem:[#allocation8 + $0x610] sm:$0xf]  ;;  %v8768_v27 = vld [vmem:[#allocation8 + $0x63c] sm:$0xf0] }
 0x14f   :  { %3595 = vmatpush.bf16.msrb.mxu2 %v7468_v36  ;;  %3609 = vmatpush.bf16.msrb.mxu3 %v7852_v10  ;;  %v6752_v36 = vor.u32 %v8660_v30, %v6751_v19  ;;  %v7136_v10 = vor.u32 %v8756_v34, %v7135_v33  ;;  %v6943_v19 = vld [vmem:[#allocation8 + $0x430] sm:$0xf]  ;;  %v8708_v30 = vld [vmem:[#allocation8 + $0x45c] sm:$0xf0] }
 0x150   :  { %v7759_v33 = vld [vmem:[#allocation8 + $0xa90] sm:$0xf]  ;;  %v8912_v34 = vld [vmem:[#allocation8 + $0xabc] sm:$0xf0]  ;;  %v6944_v49 = vor.u32 %v8708_v30, %v6943_v19  ;;  %v8846_v19 = vld [vmem:[#allocation8 + $0x8b4] sm:$0xf] }
 0x151   :  { %3569 = vmatpush.bf16.msrb.mxu0 %v6604_v17  ;;  %3583 = vmatpush.bf16.msrb.mxu1 %v6988_v42  ;;  %v7612_v17 = vor.u32 %v8869_v46, %v7609_v20  ;;  %v8744_v42 = vld [vmem:[#allocation8 + $0x57c] sm:$0xf0]  ;;  %v6511_v46 = vld [vmem:[#allocation8 + $0xd0] sm:$0xf]  ;;  %v7521_v30 = vld [vmem:[#allocation8 + $0x8e0] sm:$0xf0] }
 0x152   :  { %v7088_v45 = vor.u32 %v8744_v42, %v7087_v38  ;;  %v8600_v20 = vld [vmem:[#allocation8 + $0xfc] sm:$0xf0]  ;;  %v7711_v38 = vld [vmem:[#allocation8 + $0xa30] sm:$0xf] }
 0x153   :  { %3596 = vmatpush.bf16.msrb.mxu2 %v7420_v43  ;;  %3610 = vmatpush.bf16.msrb.mxu3 %v7804_v15  ;;  %v7519_v43 = vld [vmem:[#allocation8 + $0x8b0] sm:$0xf]  ;;  %v8852_v15 = vld [vmem:[#allocation8 + $0x8dc] sm:$0xf0] }
 0x154   :  { %v7520_v57 = vor.u32 %v8852_v15, %v7519_v43  ;;  %v6847_v43 = vld [vmem:[#allocation8 + $0x370] sm:$0xf]  ;;  %v8684_v15 = vld [vmem:[#allocation8 + $0x39c] sm:$0xf0] }
 0x155   :  { %3570 = vmatpush.bf16.msrb.mxu0 %v6556_v54  ;;  %3584 = vmatpush.bf16.msrb.mxu1 %v6940_v55  ;;  %v7180_v54 = vor.u32 %v8761_v18, %v7177_v14  ;;  %v7564_v55 = vor.u32 %v8857_v51, %v7561_v52  ;;  %v6463_v18 = vld [vmem:[#allocation8 + $0x70] sm:$0xf]  ;;  %v8588_v14 = vld [vmem:[#allocation8 + $0x9c] sm:$0xf0]  ;;  %v7328_v51 = vor.u32 %v8804_v11, %v7327_v37  ;;  %v8834_v37 = vld [vmem:[#allocation8 + $0x854] sm:$0xf] }
 0x156   :  { %v7473_v11 = vld [vmem:[#allocation8 + $0x880] sm:$0xf0] }
 0x157   :  { %3597 = vmatpush.bf16.msrb.mxu2 %v7372_v61  ;;  %3611 = vmatpush.bf16.msrb.mxu3 %v7756_v62  ;;  %v7039_v61 = vld [vmem:[#allocation8 + $0x4f0] sm:$0xf]  ;;  %v8732_v62 = vld [vmem:[#allocation8 + $0x51c] sm:$0xf0] }
 0x159   :  { %3571 = vmatpush.bf16.msrb.mxu0 %v6508_v3  ;;  %3585 = vmatpush.bf16.msrb.mxu1 %v6892_v4  ;;  %v6656_v3 = vor.u32 %v8636_v7, %v6655_v56  ;;  %v7040_v4 = vor.u32 %v8732_v62, %v7039_v61  ;;  %v6415_v56 = vld [vmem:[#allocation8 + $0x10] sm:$0xf]  ;;  %v8576_v7 = vld [vmem:[#allocation8 + $0x3c] sm:$0xf0] }
 0x15a   :  { %v8672_v62 = vld [vmem:[#allocation8 + $0x33c] sm:$0xf0] }
 0x15b   :  { %3598 = vmatpush.bf16.msrb.mxu2 %v7324_v9  ;;  %3612 = vmatpush.bf16.msrb.mxu3 %v7708_v12  ;;  %v6991_v9 = vld [vmem:[#allocation8 + $0x490] sm:$0xf]  ;;  %v8720_v12 = vld [vmem:[#allocation8 + $0x4bc] sm:$0xf0] }
 0x15d   :  { %3572 = vmatpush.bf16.msrb.mxu0 %v6460_v24  ;;  %3586 = vmatpush.bf16.msrb.mxu1 %v6844_v25  ;;  %v6608_v24 = vor.u32 %v8624_v5, %v6607_v39  ;;  %v6992_v25 = vor.u32 %v8720_v12, %v6991_v9  ;;  %v7615_v39 = vld [vmem:[#allocation8 + $0x970] sm:$0xf]  ;;  %v8876_v5 = vld [vmem:[#allocation8 + $0x99c] sm:$0xf0]  ;;  %v6756_v9 = vor.u32 %v8654_v63, %v6753_v0  ;;  %v8810_v63 = vld [vmem:[#allocation8 + $0x794] sm:$0xf] }
 0x15e   :  { %v7140_v12 = vor.u32 %v8750_v1, %v7137_v2  ;;  %v7377_v0 = vld [vmem:[#allocation8 + $0x7c0] sm:$0xf0]  ;;  %v8906_v1 = vld [vmem:[#allocation8 + $0xa94] sm:$0xf] }
 0x15f   :  { %3599 = vmatpush.bf16.msrb.mxu2 %v7276_v60  ;;  %3613 = vmatpush.bf16.msrb.mxu3 %v7660_v32  ;;  %v7375_v60 = vld [vmem:[#allocation8 + $0x790] sm:$0xf]  ;;  %v8816_v32 = vld [vmem:[#allocation8 + $0x7bc] sm:$0xf0]  ;;  %v7761_v2 = vld [vmem:[#allocation8 + $0xac0] sm:$0xf0] }
 0x161   :  { %3573 = vmatpush.bf16.msrb.mxu0 %v6412_v31  ;;  %3587 = vmatpush.bf16.msrb.mxu1 %v6796_v35  ;;  %v7376_v31 = vor.u32 %v8816_v32, %v7375_v60  ;;  %v7760_v35 = vor.u32 %v8912_v34, %v7759_v33  ;;  %v8942_v60 = vld [vmem:[#allocation8 + $0xbb4] sm:$0xf]  ;;  %v7905_v32 = vld [vmem:[#allocation8 + $0xbe0] sm:$0xf0]  ;;  %v6708_v33 = vor.u32 %v8642_v13, %v6705_v21 }
 0x162   :  { %v8798_v13 = vld [vmem:[#allocation8 + $0x734] sm:$0xf]  ;;  %v7329_v21 = vld [vmem:[#allocation8 + $0x760] sm:$0xf0] }
 0x163   :  { %3600 = vmatpush.bf16.msrb.mxu2 %v7228_v41  ;;  %3614 = vmatpush.bf16.msrb.mxu3 %v7612_v17  ;;  %v8900_v41 = vld [vmem:[#allocation8 + $0xa5c] sm:$0xf0]  ;;  %v6512_v17 = vor.u32 %v8600_v20, %v6511_v46  ;;  %v8630_v46 = vld [vmem:[#allocation8 + $0x1f4] sm:$0xf]  ;;  %v6657_v20 = vld [vmem:[#allocation8 + $0x220] sm:$0xf0] }
 0x164   :  { %3574 = vmatmul.bf16.vlgmr.msrb.gmra.mxu0 %v9777_v29  ;;  %3588 = vmatmul.bf16.vlgmr.msrb.gmra.mxu1 %v9779_v59  ;;  %v7712_v52 = vor.u32 %v8900_v41, %v7711_v38  ;;  %v8930_v38 = vld [vmem:[#allocation8 + $0xb54] sm:$0xf]  ;;  %v7857_v41 = vld [vmem:[#allocation8 + $0xb80] sm:$0xf0] }
 0x165   :  { %3622 = vmatpush.bf16.msra.mxu0 %v6752_v36  ;;  %3636 = vmatpush.bf16.msra.mxu1 %v7136_v10  ;;  %v6895_v36 = vld [vmem:[#allocation8 + $0x3d0] sm:$0xf]  ;;  %v8696_v10 = vld [vmem:[#allocation8 + $0x3fc] sm:$0xf0] }
 0x166   :  { %v6896_v42 = vor.u32 %v8696_v10, %v6895_v36  ;;  %v8726_v36 = vld [vmem:[#allocation8 + $0x4f4] sm:$0xf]  ;;  %v7041_v10 = vld [vmem:[#allocation8 + $0x520] sm:$0xf0] }
 0x167   :  { %3601 = vmatpush.bf16.msrb.mxu2 %v7180_v54  ;;  %3615 = vmatpush.bf16.msrb.mxu3 %v7564_v55  ;;  %v6464_v54 = vor.u32 %v8588_v14, %v6463_v18  ;;  %v6848_v55 = vor.u32 %v8684_v15, %v6847_v43  ;;  %v8618_v18 = vld [vmem:[#allocation8 + $0x194] sm:$0xf]  ;;  %v6609_v14 = vld [vmem:[#allocation8 + $0x1c0] sm:$0xf0] }
 0x168   :  { %v8714_v43 = vld [vmem:[#allocation8 + $0x494] sm:$0xf]  ;;  %v6993_v15 = vld [vmem:[#allocation8 + $0x4c0] sm:$0xf0] }
 0x169   :  { %3623 = vmatpush.bf16.msra.mxu0 %v6704_v47  ;;  %3637 = vmatpush.bf16.msra.mxu1 %v7088_v45  ;;  %v7663_v47 = vld [vmem:[#allocation8 + $0x9d0] sm:$0xf]  ;;  %v8888_v45 = vld [vmem:[#allocation8 + $0x9fc] sm:$0xf0] }
 0x16a   :  { %3602 = vmatmul.bf16.vlgmr.msrb.gmra.mxu2 %v9783_v50  ;;  %3616 = vmatmul.bf16.vlgmr.msrb.gmra.mxu3 %v9785_v16  ;;  %v7664_v61 = vor.u32 %v8888_v45, %v7663_v47  ;;  %v8918_v47 = vld [vmem:[#allocation8 + $0xaf4] sm:$0xf]  ;;  %v7809_v45 = vld [vmem:[#allocation8 + $0xb20] sm:$0xf0] }
 0x16b   :  { %3650 = vmatpush.bf16.msra.mxu2 %v7520_v57  ;;  %3664 = vmatpush.bf16.msra.mxu3 %v7904_v8  ;;  %v6799_v57 = vld [vmem:[#allocation8 + $0x310] sm:$0xf]  ;;  %v7280_v8 = vor.u32 %v8792_v53, %v7279_v44  ;;  %v8822_v44 = vld [vmem:[#allocation8 + $0x7f4] sm:$0xf]  ;;  %v7425_v53 = vld [vmem:[#allocation8 + $0x820] sm:$0xf0] }
 0x16d   :  { %3624 = vmatpush.bf16.msra.mxu0 %v6656_v3  ;;  %3638 = vmatpush.bf16.msra.mxu1 %v7040_v4  ;;  %v7231_v3 = vld [vmem:[#allocation8 + $0x670] sm:$0xf]  ;;  %v8780_v4 = vld [vmem:[#allocation8 + $0x69c] sm:$0xf0] }
 0x16e   :  { %v7232_v23 = vor.u32 %v8780_v4, %v7231_v3 }
 0x16f   :  { %3651 = vmatpush.bf16.msra.mxu2 %v7472_v40  ;;  %3665 = vmatpush.bf16.msra.mxu3 %v7856_v6  ;;  %v6416_v40 = vor.u32 %v8576_v7, %v6415_v56  ;;  %v6800_v6 = vor.u32 %v8672_v62, %v6799_v57  ;;  %v8606_v56 = vld [vmem:[#allocation8 + $0x134] sm:$0xf]  ;;  %v6561_v7 = vld [vmem:[#allocation8 + $0x160] sm:$0xf0]  ;;  %v7428_v57 = vor.u32 %v8822_v44, %v7425_v53  ;;  %v6711_v44 = vld [vmem:[#allocation8 + $0x258] sm:$0xf] }
 0x170   :  { %v6945_v62 = vld [vmem:[#allocation8 + $0x460] sm:$0xf0]  ;;  %v6564_v3 = vor.u32 %v8606_v56, %v6561_v7  ;;  %v8649_v53 = vld [vmem:[#allocation8 + $0x284] sm:$0xf0]  ;;  %v8762_v56 = vld [vmem:[#allocation8 + $0x614] sm:$0xf] }
 0x171   :  { %3625 = vmatpush.bf16.msra.mxu0 %v6608_v24  ;;  %3639 = vmatpush.bf16.msra.mxu1 %v6992_v25  ;;  %v7616_v24 = vor.u32 %v8876_v5, %v7615_v39  ;;  %v7089_v25 = vld [vmem:[#allocation8 + $0x580] sm:$0xf0]  ;;  %v8594_v39 = vld [vmem:[#allocation8 + $0xd4] sm:$0xf] }
 0x172   :  { %v7092_v34 = vor.u32 %v8738_v22, %v7089_v25  ;;  %v6513_v5 = vld [vmem:[#allocation8 + $0x100] sm:$0xf0]  ;;  %v8894_v22 = vld [vmem:[#allocation8 + $0xa34] sm:$0xf] }
 0x173   :  { %3652 = vmatpush.bf16.msra.mxu2 %v7424_v28  ;;  %3666 = vmatpush.bf16.msra.mxu3 %v7808_v58  ;;  %v7567_v28 = vld [vmem:[#allocation8 + $0x910] sm:$0xf]  ;;  %v8864_v58 = vld [vmem:[#allocation8 + $0x93c] sm:$0xf0]  ;;  %v7185_v7 = vld [vmem:[#allocation8 + $0x640] sm:$0xf0] }
 0x175   :  { %3626 = vmatpush.bf16.msra.mxu0 %v6560_v48  ;;  %3640 = vmatpush.bf16.msra.mxu1 %v6944_v49  ;;  %v7184_v48 = vor.u32 %v8768_v27, %v7183_v26  ;;  %v7568_v49 = vor.u32 %v8864_v58, %v7567_v28  ;;  %v8582_v26 = vld [vmem:[#allocation8 + $0x74] sm:$0xf]  ;;  %v6465_v27 = vld [vmem:[#allocation8 + $0xa0] sm:$0xf0]  ;;  %v7332_v28 = vor.u32 %v8798_v13, %v7329_v21  ;;  %v7479_v13 = vld [vmem:[#allocation8 + $0x858] sm:$0xf] }
 0x176   :  { %v8841_v21 = vld [vmem:[#allocation8 + $0x884] sm:$0xf0] }
 0x177   :  { %3653 = vmatpush.bf16.msra.mxu2 %v7376_v31  ;;  %3667 = vmatpush.bf16.msra.mxu3 %v7760_v35  ;;  %v7524_v31 = vor.u32 %v8846_v19, %v7521_v30  ;;  %v7908_v35 = vor.u32 %v8942_v60, %v7905_v32  ;;  %v8678_v19 = vld [vmem:[#allocation8 + $0x374] sm:$0xf]  ;;  %v6849_v30 = vld [vmem:[#allocation8 + $0x3a0] sm:$0xf0] }
 0x178   :  { %v8786_v60 = vld [vmem:[#allocation8 + $0x6d4] sm:$0xf]  ;;  %v7281_v32 = vld [vmem:[#allocation8 + $0x700] sm:$0xf0] }
 0x179   :  { %3627 = vmatpush.bf16.msra.mxu0 %v6512_v17  ;;  %3641 = vmatpush.bf16.msra.mxu1 %v6896_v42  ;;  %v6660_v17 = vor.u32 %v8630_v46, %v6657_v20  ;;  %v7044_v42 = vor.u32 %v8726_v36, %v7041_v10  ;;  %v8570_v46 = vld [vmem:[#allocation8 + $0x14] sm:$0xf]  ;;  %v6417_v20 = vld [vmem:[#allocation8 + $0x40] sm:$0xf0] }
 0x17a   :  { %v6801_v10 = vld [vmem:[#allocation8 + $0x340] sm:$0xf0] }
 0x17b   :  { %3654 = vmatpush.bf16.msra.mxu2 %v7328_v51  ;;  %3668 = vmatpush.bf16.msra.mxu3 %v7712_v52  ;;  %v7476_v51 = vor.u32 %v8834_v37, %v7473_v11  ;;  %v7860_v52 = vor.u32 %v8930_v38, %v7857_v41  ;;  %v6759_v37 = vld [vmem:[#allocation8 + $0x2b8] sm:$0xf]  ;;  %v8661_v11 = vld [vmem:[#allocation8 + $0x2e4] sm:$0xf0] }
 0x17c   :  { %v7143_v38 = vld [vmem:[#allocation8 + $0x5b8] sm:$0xf]  ;;  %v8757_v41 = vld [vmem:[#allocation8 + $0x5e4] sm:$0xf0] }
 0x17d   :  { %3628 = vmatpush.bf16.msra.mxu0 %v6464_v54  ;;  %3642 = vmatpush.bf16.msra.mxu1 %v6848_v55  ;;  %v6612_v54 = vor.u32 %v8618_v18, %v6609_v14  ;;  %v6996_v55 = vor.u32 %v8714_v43, %v6993_v15  ;;  %v8870_v18 = vld [vmem:[#allocation8 + $0x974] sm:$0xf]  ;;  %v7617_v14 = vld [vmem:[#allocation8 + $0x9a0] sm:$0xf0]  ;;  %v6760_v43 = vor.u32 %v8661_v11, %v6759_v37 }
 0x17e   :  { %v7144_v15 = vor.u32 %v8757_v41, %v7143_v38  ;;  %v6951_v38 = vld [vmem:[#allocation8 + $0x438] sm:$0xf]  ;;  %v8709_v41 = vld [vmem:[#allocation8 + $0x464] sm:$0xf0] }
 0x17f   :  { %3655 = vmatpush.bf16.msra.mxu2 %v7280_v8  ;;  %3669 = vmatpush.bf16.msra.mxu3 %v7664_v61  ;;  %v7812_v8 = vor.u32 %v8918_v47, %v7809_v45  ;;  %v8702_v61 = vld [vmem:[#allocation8 + $0x434] sm:$0xf]  ;;  %v7095_v47 = vld [vmem:[#allocation8 + $0x558] sm:$0xf] }
 0x180   :  { %v6948_v4 = vor.u32 %v8702_v61, %v6945_v62  ;;  %v7527_v61 = vld [vmem:[#allocation8 + $0x8b8] sm:$0xf]  ;;  %v8853_v62 = vld [vmem:[#allocation8 + $0x8e4] sm:$0xf0] }
 0x181   :  { %3629 = vmatpush.bf16.msra.mxu0 %v6416_v40  ;;  %3643 = vmatpush.bf16.msra.mxu1 %v6800_v6  ;;  %v7380_v40 = vor.u32 %v8810_v63, %v7377_v0  ;;  %v7764_v6 = vor.u32 %v8906_v1, %v7761_v2  ;;  %v7911_v63 = vld [vmem:[#allocation8 + $0xbb8] sm:$0xf]  ;;  %v8949_v0 = vld [vmem:[#allocation8 + $0xbe4] sm:$0xf0]  ;;  %v6712_v1 = vor.u32 %v8649_v53, %v6711_v44 }
 0x182   :  { %v6519_v44 = vld [vmem:[#allocation8 + $0xd8] sm:$0xf]  ;;  %v8601_v53 = vld [vmem:[#allocation8 + $0x104] sm:$0xf0] }
 0x183   :  { %3656 = vmatpush.bf16.msra.mxu2 %v7232_v23  ;;  %3670 = vmatpush.bf16.msra.mxu3 %v7616_v24  ;;  %v7713_v23 = vld [vmem:[#allocation8 + $0xa60] sm:$0xf0]  ;;  %v6516_v24 = vor.u32 %v8594_v39, %v6513_v5  ;;  %v6663_v39 = vld [vmem:[#allocation8 + $0x1f8] sm:$0xf]  ;;  %v8637_v5 = vld [vmem:[#allocation8 + $0x224] sm:$0xf0] }
 0x184   :  { %3630 = vmatmul.bf16.vlgmr.msra.gmra.mxu0 %v9777_v29  ;;  %3644 = vmatmul.bf16.vlgmr.msra.gmra.mxu1 %v9779_v59  ;;  %v7716_v58 = vor.u32 %v8894_v22, %v7713_v23  ;;  %v7863_v22 = vld [vmem:[#allocation8 + $0xb58] sm:$0xf]  ;;  %v8937_v23 = vld [vmem:[#allocation8 + $0xb84] sm:$0xf0] }
 0x185   :  { %3678 = vmatpush.bf16.msrb.mxu0 %v6756_v9  ;;  %3692 = vmatpush.bf16.msrb.mxu1 %v7140_v12  ;;  %v8690_v9 = vld [vmem:[#allocation8 + $0x3d4] sm:$0xf]  ;;  %v6897_v12 = vld [vmem:[#allocation8 + $0x400] sm:$0xf0] }
 0x186   :  { %v6900_v25 = vor.u32 %v8690_v9, %v6897_v12  ;;  %v7047_v9 = vld [vmem:[#allocation8 + $0x4f8] sm:$0xf]  ;;  %v8733_v12 = vld [vmem:[#allocation8 + $0x524] sm:$0xf0] }
 0x187   :  { %3657 = vmatpush.bf16.msra.mxu2 %v7184_v48  ;;  %3671 = vmatpush.bf16.msra.mxu3 %v7568_v49  ;;  %v6468_v48 = vor.u32 %v8582_v26, %v6465_v27  ;;  %v6852_v49 = vor.u32 %v8678_v19, %v6849_v30  ;;  %v9807_v26 = vld [vmem:[#allocation10] sm:$0xff]  ;;  %v7480_v19 = vor.u32 %v8841_v21, %v7479_v13  ;;  %v8793_v13 = vld [vmem:[#allocation8 + $0x704] sm:$0xf0]  ;;  %v7671_v21 = vld [vmem:[#allocation8 + $0x9d8] sm:$0xf] }
 0x188   :  { %v7864_v30 = vor.u32 %v8937_v23, %v7863_v22  ;;  %v8889_v22 = vld [vmem:[#allocation8 + $0xa04] sm:$0xf0] }
 0x189   :  { %3679 = vmatpush.bf16.msrb.mxu0 %v6708_v33  ;;  %3693 = vmatpush.bf16.msrb.mxu1 %v7092_v34  ;;  %v8882_v33 = vld [vmem:[#allocation8 + $0x9d4] sm:$0xf]  ;;  %v7665_v34 = vld [vmem:[#allocation8 + $0xa00] sm:$0xf0] }
 0x18a   :  { %3658 = vmatmul.bf16.vlgmr.msra.gmra.mxu2 %v9783_v50  ;;  %3672 = vmatmul.bf16.vlgmr.msra.gmra.mxu3 %v9785_v16  ;;  %v7668_v36 = vor.u32 %v8882_v33, %v7665_v34  ;;  %v7431_v33 = vld [vmem:[#allocation8 + $0x7f8] sm:$0xf]  ;;  %v8829_v34 = vld [vmem:[#allocation8 + $0x824] sm:$0xf0] }
 0x18b   :  { %3706 = vmatpush.bf16.msrb.mxu2 %v7524_v31  ;;  %3720 = vmatpush.bf16.msrb.mxu3 %v7908_v35  ;;  %v8666_v31 = vld [vmem:[#allocation8 + $0x314] sm:$0xf]  ;;  %v7284_v35 = vor.u32 %v8786_v60, %v7281_v32  ;;  %v6999_v60 = vld [vmem:[#allocation8 + $0x498] sm:$0xf]  ;;  %v8721_v32 = vld [vmem:[#allocation8 + $0x4c4] sm:$0xf0]  ;;  %v7432_v37 = vor.u32 %v8829_v34, %v7431_v33 }
 0x18c   :  { %v8655_v33 = vld [vmem:[#allocation8 + $0x2bc] sm:$0xf]  ;;  %v6761_v34 = vld [vmem:[#allocation8 + $0x2e8] sm:$0xf0] }
 0x18d   :  { %3680 = vmatpush.bf16.msrb.mxu0 %v6660_v17  ;;  %3694 = vmatpush.bf16.msrb.mxu1 %v7044_v42  ;;  %v8774_v17 = vld [vmem:[#allocation8 + $0x674] sm:$0xf]  ;;  %v7233_v42 = vld [vmem:[#allocation8 + $0x6a0] sm:$0xf0] }
 0x18e   :  { %v7236_v45 = vor.u32 %v8774_v17, %v7233_v42  ;;  %v7383_v17 = vld [vmem:[#allocation8 + $0x798] sm:$0xf]  ;;  %v8817_v42 = vld [vmem:[#allocation8 + $0x7c4] sm:$0xf0] }
 0x18f   :  { %3707 = vmatpush.bf16.msrb.mxu2 %v7476_v51  ;;  %3721 = vmatpush.bf16.msrb.mxu3 %v7860_v52  ;;  %v6420_v51 = vor.u32 %v8570_v46, %v6417_v20  ;;  %v6804_v52 = vor.u32 %v8666_v31, %v6801_v10  ;;  %v1454_v46 = vperm.slane %v9807_v26, 0  ;;  %v8613_v10 = vld [vmem:[#allocation8 + $0x164] sm:$0xf0] }
 0x191   :  { %3681 = vmatpush.bf16.msrb.mxu0 %v6612_v54  ;;  %3695 = vmatpush.bf16.msrb.mxu1 %v6996_v55  ;;  %v7620_v54 = vor.u32 %v8870_v18, %v7617_v14  ;;  %v8745_v55 = vld [vmem:[#allocation8 + $0x584] sm:$0xf0]  ;;  %v7767_v18 = vld [vmem:[#allocation8 + $0xa98] sm:$0xf] }
 0x192   :  { %v7096_v2 = vor.u32 %v8745_v55, %v7095_v47  ;;  %v8913_v14 = vld [vmem:[#allocation8 + $0xac4] sm:$0xf0]  ;;  %v7384_v47 = vor.u32 %v8817_v42, %v7383_v17  ;;  %v6764_v42 = vor.u32 %v8655_v33, %v6761_v34  ;;  %v8715_v33 = vld [vmem:[#allocation8 + $0x49c] sm:$0xf]  ;;  %v7001_v34 = vld [vmem:[#allocation8 + $0x4c8] sm:$0xf0] }
 0x193   :  { %3708 = vmatpush.bf16.msrb.mxu2 %v7428_v57  ;;  %3722 = vmatpush.bf16.msrb.mxu3 %v7812_v8  ;;  %v8858_v57 = vld [vmem:[#allocation8 + $0x914] sm:$0xf]  ;;  %v7569_v8 = vld [vmem:[#allocation8 + $0x940] sm:$0xf0]  ;;  %v8697_v55 = vld [vmem:[#allocation8 + $0x404] sm:$0xf0] }
 0x195   :  { %3682 = vmatpush.bf16.msrb.mxu0 %v6564_v3  ;;  %3696 = vmatpush.bf16.msrb.mxu1 %v6948_v4  ;;  %v7188_v3 = vor.u32 %v8762_v56, %v7185_v7  ;;  %v7572_v4 = vor.u32 %v8858_v57, %v7569_v8  ;;  %v7335_v56 = vld [vmem:[#allocation8 + $0x738] sm:$0xf]  ;;  %v8805_v7 = vld [vmem:[#allocation8 + $0x764] sm:$0xf0] }
 0x196   :  { %v7719_v57 = vld [vmem:[#allocation8 + $0xa38] sm:$0xf]  ;;  %v8901_v8 = vld [vmem:[#allocation8 + $0xa64] sm:$0xf0] }
 0x197   :  { %3709 = vmatpush.bf16.msrb.mxu2 %v7380_v40  ;;  %3723 = vmatpush.bf16.msrb.mxu3 %v7764_v6  ;;  %v7528_v40 = vor.u32 %v8853_v62, %v7527_v61  ;;  %v7912_v6 = vor.u32 %v8949_v0, %v7911_v63  ;;  %v6520_v62 = vor.u32 %v8601_v53, %v6519_v44  ;;  %v6471_v0 = vld [vmem:[#allocation8 + $0x78] sm:$0xf]  ;;  %v7097_v53 = vld [vmem:[#allocation8 + $0x588] sm:$0xf0] }
 0x199   :  { %3683 = vmatpush.bf16.msrb.mxu0 %v6516_v24  ;;  %3697 = vmatpush.bf16.msrb.mxu1 %v6900_v25  ;;  %v6664_v24 = vor.u32 %v8637_v5, %v6663_v39  ;;  %v7048_v25 = vor.u32 %v8733_v12, %v7047_v9  ;;  %v7720_v39 = vor.u32 %v8901_v8, %v7719_v57  ;;  %v6855_v5 = vld [vmem:[#allocation8 + $0x378] sm:$0xf]  ;;  %v7529_v8 = vld [vmem:[#allocation8 + $0x8e8] sm:$0xf0] }
 0x19b   :  { %3710 = vmatpush.bf16.msrb.mxu2 %v7332_v28  ;;  %3724 = vmatpush.bf16.msrb.mxu3 %v7716_v58  ;;  %v6615_v28 = vld [vmem:[#allocation8 + $0x198] sm:$0xf]  ;;  %v8625_v58 = vld [vmem:[#allocation8 + $0x1c4] sm:$0xf0] }
 0x19c   :  { %v6616_v31 = vor.u32 %v8625_v58, %v6615_v28  ;;  %v8577_v58 = vld [vmem:[#allocation8 + $0x44] sm:$0xf0] }
 0x19d   :  { %3684 = vmatpush.bf16.msrb.mxu0 %v6468_v48  ;;  %3698 = vmatpush.bf16.msrb.mxu1 %v6852_v49  ;;  %v7815_v48 = vld [vmem:[#allocation8 + $0xaf8] sm:$0xf]  ;;  %v8925_v49 = vld [vmem:[#allocation8 + $0xb24] sm:$0xf0] }
 0x19e   :  { %v7816_v11 = vor.u32 %v8925_v49, %v7815_v48  ;;  %v8751_v48 = vld [vmem:[#allocation8 + $0x5bc] sm:$0xf] }
 0x19f   :  { %3711 = vmatpush.bf16.msrb.mxu2 %v7284_v35  ;;  %3725 = vmatpush.bf16.msrb.mxu3 %v7668_v36  ;;  %v7000_v35 = vor.u32 %v8721_v32, %v6999_v60  ;;  %v6567_v36 = vld [vmem:[#allocation8 + $0x138] sm:$0xf]  ;;  %v7672_v32 = vor.u32 %v8889_v22, %v7671_v21  ;;  %v8931_v22 = vld [vmem:[#allocation8 + $0xb5c] sm:$0xf] }
 0x1a0   :  { %v3407_v27 = vpop.f32.mrf.mxu0  ;;  %v3421_v20 = vpop.f32.mrf.mxu1 }
 0x1a1   :  { %3685 = vmatpush.bf16.msrb.mxu0 %v6420_v51  ;;  %3699 = vmatpush.bf16.msrb.mxu1 %v6804_v52  ;;  %v3408_v51 = vadd.f32 %v3407_v27, %v1454_v46  ;;  %v6568_v52 = vor.u32 %v8613_v10, %v6567_v36  ;;  %v7623_v36 = vld [vmem:[#allocation8 + $0x978] sm:$0xf]  ;;  %v8877_v10 = vld [vmem:[#allocation8 + $0x9a4] sm:$0xf0] }
 0x1a2   :  { %v7624_v44 = vor.u32 %v8877_v10, %v7623_v36  ;;  %v7817_v36 = vld [vmem:[#allocation8 + $0xb28] sm:$0xf0] }
 0x1a3   :  { %3712 = vmatpush.bf16.msrb.mxu2 %v7236_v45  ;;  %3726 = vmatpush.bf16.msrb.mxu3 %v7620_v54  ;;  %v7768_v45 = vor.u32 %v8913_v14, %v7767_v18  ;;  %v6903_v54 = vld [vmem:[#allocation8 + $0x3d8] sm:$0xf]  ;;  %v3422_v61 = vadd.f32 %v3421_v20, %v3408_v51  ;;  %v8643_v14 = vld [vmem:[#allocation8 + $0x25c] sm:$0xf]  ;;  %v6713_v51 = vld [vmem:[#allocation8 + $0x288] sm:$0xf0] }
 0x1a4   :  { %3686 = vmatmul.bf16.vlgmr.msrb.gmra.mxu0 %v9777_v29  ;;  %3700 = vmatmul.bf16.vlgmr.msrb.gmra.mxu1 %v9779_v59  ;;  %v6904_v63 = vor.u32 %v8697_v55, %v6903_v54  ;;  %v7575_v54 = vld [vmem:[#allocation8 + $0x918] sm:$0xf]  ;;  %v8865_v55 = vld [vmem:[#allocation8 + $0x944] sm:$0xf0] }
 0x1a5   :  { %3734 = vmatpush.bf16.msra.mxu0 %v6760_v43  ;;  %3748 = vmatpush.bf16.msra.mxu1 %v7144_v15  ;;  %v6952_v43 = vor.u32 %v8709_v41, %v6951_v38 }
 0x1a7   :  { %3713 = vmatpush.bf16.msrb.mxu2 %v7188_v3  ;;  %3727 = vmatpush.bf16.msrb.mxu3 %v7572_v4  ;;  %v7336_v4 = vor.u32 %v8805_v7, %v7335_v56  ;;  %v8847_v56 = vld [vmem:[#allocation8 + $0x8bc] sm:$0xf] }
 0x1a8   :  { %v3409_v15 = vpop.f32.mrf.mxu0  ;;  %v3423_v9 = vpop.f32.mrf.mxu1 }
 0x1a9   :  { %3735 = vmatpush.bf16.msra.mxu0 %v6712_v1  ;;  %3749 = vmatpush.bf16.msra.mxu1 %v7096_v2  ;;  %v8589_v1 = vld [vmem:[#allocation8 + $0xa4] sm:$0xf0] }
 0x1aa   :  { %3714 = vmatmul.bf16.vlgmr.msrb.gmra.mxu2 %v9783_v50  ;;  %3728 = vmatmul.bf16.vlgmr.msrb.gmra.mxu3 %v9785_v16  ;;  %v6472_v23 = vor.u32 %v8589_v1, %v6471_v0 }
 0x1ab   :  { %3762 = vmatpush.bf16.msra.mxu2 %v7528_v40  ;;  %3776 = vmatpush.bf16.msra.mxu3 %v7912_v6  ;;  %v8685_v40 = vld [vmem:[#allocation8 + $0x3a4] sm:$0xf0]  ;;  %v7287_v6 = vld [vmem:[#allocation8 + $0x6d8] sm:$0xf] }
 0x1ac   :  { %v6856_v28 = vor.u32 %v8685_v40, %v6855_v5  ;;  %v7288_v60 = vor.u32 %v8793_v13, %v7287_v6  ;;  %v7532_v5 = vor.u32 %v8847_v56, %v7529_v8  ;;  %v7049_v6 = vld [vmem:[#allocation8 + $0x528] sm:$0xf0]  ;;  %v8595_v8 = vld [vmem:[#allocation8 + $0xdc] sm:$0xf] }
 0x1ad   :  { %3736 = vmatpush.bf16.msra.mxu0 %v6664_v24  ;;  %3750 = vmatpush.bf16.msra.mxu1 %v7048_v25  ;;  %v3435_v2 = vpop.f32.mrf.mxu2  ;;  %v3449_v3 = vpop.f32.mrf.mxu3  ;;  %v6423_v24 = vld [vmem:[#allocation8 + $0x18] sm:$0xf]  ;;  %v3410_v25 = vadd.f32 %v3409_v15, %v1454_v46 }
 0x1ae   :  { %v3436_v12 = vadd.f32 %v3435_v2, %v3422_v61  ;;  %v7239_v46 = vld [vmem:[#allocation8 + $0x678] sm:$0xf]  ;;  %v8943_v61 = vld [vmem:[#allocation8 + $0xbbc] sm:$0xf]  ;;  %v7576_v2 = vor.u32 %v8865_v55, %v7575_v54 }
 0x1af   :  { %3763 = vmatpush.bf16.msra.mxu2 %v7480_v19  ;;  %3777 = vmatpush.bf16.msra.mxu3 %v7864_v30  ;;  %v6807_v19 = vld [vmem:[#allocation8 + $0x318] sm:$0xf]  ;;  %v8673_v30 = vld [vmem:[#allocation8 + $0x344] sm:$0xf0] }
 0x1b0   :  { %v3450_v27 = vadd.f32 %v3449_v3, %v3436_v12  ;;  %v6808_v38 = vor.u32 %v8673_v30, %v6807_v19  ;;  %v8631_v3 = vld [vmem:[#allocation8 + $0x1fc] sm:$0xf]  ;;  %v7481_v12 = vld [vmem:[#allocation8 + $0x888] sm:$0xf0] }
 0x1b1   :  { %3737 = vmatpush.bf16.msra.mxu0 %v6616_v31  ;;  %3751 = vmatpush.bf16.msra.mxu1 %v7000_v35  ;;  %v9812_v49 = vpop.f32.mrf.mxu0  ;;  %v7145_v31 = vld [vmem:[#allocation8 + $0x5e8] sm:$0xf0]  ;;  %v8781_v35 = vld [vmem:[#allocation8 + $0x6a4] sm:$0xf0]  ;;  %v9818_v7 = vpop.f32.mrf.mxu1  ;;  %v8619_v19 = vld [vmem:[#allocation8 + $0x19c] sm:$0xf] }
 0x1b2   :  { %v9814_v20 = vmul.f32 0.125, %v3450_v27  ;;  %v7148_v18 = vor.u32 %v8751_v48, %v7145_v31  ;;  %v7240_v15 = vor.u32 %v8781_v35, %v7239_v46  ;;  %v10534_v27 = vperm.slane %v9807_v26, 1  ;;  %v6617_v30 = vld [vmem:[#allocation8 + $0x1c8] sm:$0xf0]  ;;  %v8823_v48 = vld [vmem:[#allocation8 + $0x7fc] sm:$0xf] }
 0x1b3   :  { %3764 = vmatpush.bf16.msra.mxu2 %v7432_v37  ;;  %3778 = vmatpush.bf16.msra.mxu3 %v7816_v11  ;;  %v3424_v37 = vadd.f32 %v3423_v9, %v3410_v25  ;;  %v6424_v11 = vor.u32 %v8577_v58, %v6423_v24  ;;  %v8835_v9 = vld [vmem:[#allocation8 + $0x85c] sm:$0xf]  ;;  %v7433_v46 = vld [vmem:[#allocation8 + $0x828] sm:$0xf0] }
 0x1b4   :  { %4172 = vrot.lane.b32.xlu1 %v9814_v20, %s9515_s27  ;;  %v8919_v35 = vld [vmem:[#allocation8 + $0xafc] sm:$0xf] }
 0x1b5   :  { %3738 = vmatpush.bf16.msra.mxu0 %v6568_v52  ;;  %3752 = vmatpush.bf16.msra.mxu1 %v6952_v43  ;;  %v3437_v41 = vpop.f32.mrf.mxu2  ;;  %v3451_v17 = vpop.f32.mrf.mxu3  ;;  %v8739_v52 = vld [vmem:[#allocation8 + $0x55c] sm:$0xf] }
 0x1b6   :  { %v3438_v43 = vadd.f32 %v3437_v41, %v3424_v37  ;;  %v7100_v0 = vor.u32 %v8739_v52, %v7097_v53  ;;  %v6620_v37 = vor.u32 %v8619_v19, %v6617_v30  ;;  %v6569_v41 = vld [vmem:[#allocation8 + $0x168] sm:$0xf0]  ;;  %v10533_v53 = vperm.slane %v9807_v26, 2  ;;  %v8787_v30 = vld [vmem:[#allocation8 + $0x6dc] sm:$0xf] }
 0x1b7   :  { %3765 = vmatpush.bf16.msra.mxu2 %v7384_v47  ;;  %3779 = vmatpush.bf16.msra.mxu3 %v7768_v45  ;;  %v7191_v47 = vld [vmem:[#allocation8 + $0x618] sm:$0xf]  ;;  %v8769_v45 = vld [vmem:[#allocation8 + $0x644] sm:$0xf0]  ;;  %v6857_v19 = vld [vmem:[#allocation8 + $0x3a8] sm:$0xf0] }
 0x1b8   :  { %v3452_v57 = vadd.f32 %v3451_v17, %v3438_v43  ;;  %v7192_v1 = vor.u32 %v8769_v45, %v7191_v47  ;;  %v7436_v17 = vor.u32 %v8823_v48, %v7433_v46  ;;  %v7385_v43 = vld [vmem:[#allocation8 + $0x7c8] sm:$0xf0] }
 0x1b9   :  { %3739 = vmatpush.bf16.msra.mxu0 %v6520_v62  ;;  %3753 = vmatpush.bf16.msra.mxu1 %v6904_v63  ;;  %v7913_v62 = vld [vmem:[#allocation8 + $0xbe8] sm:$0xf0]  ;;  %v6716_v63 = vor.u32 %v8643_v14, %v6713_v51  ;;  %v3465_v13 = vpop.f32.mrf.mxu0  ;;  %v3479_v10 = vpop.f32.mrf.mxu1  ;;  %v8811_v51 = vld [vmem:[#allocation8 + $0x79c] sm:$0xf] }
 0x1ba   :  { %v7916_v40 = vor.u32 %v8943_v61, %v7913_v62  ;;  %v9822_v21 = vmul.f32 0.125, %v3452_v57  ;;  %v3466_v31 = vadd.f32 %v3465_v13, %v10534_v27  ;;  %v6953_v14 = vld [vmem:[#allocation8 + $0x468] sm:$0xf0]  ;;  %v7388_v62 = vor.u32 %v8811_v51, %v7385_v43  ;;  %v8583_v13 = vld [vmem:[#allocation8 + $0x7c] sm:$0xf] }
 0x1bb   :  { %3766 = vmatpush.bf16.msra.mxu2 %v7336_v4  ;;  %3780 = vmatpush.bf16.msra.mxu3 %v7720_v39  ;;  %v6665_v4 = vld [vmem:[#allocation8 + $0x228] sm:$0xf0]  ;;  %v8727_v39 = vld [vmem:[#allocation8 + $0x4fc] sm:$0xf]  ;;  %v7151_v51 = vld [vmem:[#allocation8 + $0x5c0] sm:$0xf] }
 0x1bc   :  { %v7052_v58 = vor.u32 %v8727_v39, %v7049_v6  ;;  %4174 = vrot.lane.b32.xlu1 %v9822_v21, %s9515_s27  ;;  %v3480_v52 = vadd.f32 %v3479_v10, %v3466_v31  ;;  %v6521_v61 = vld [vmem:[#allocation8 + $0x108] sm:$0xf0]  ;;  %v8895_v39 = vld [vmem:[#allocation8 + $0xa3c] sm:$0xf] }
 0x1bd   :  { %3740 = vmatpush.bf16.msra.mxu0 %v6472_v23  ;;  %3754 = vmatpush.bf16.msra.mxu1 %v6856_v28  ;;  %v7865_v23 = vld [vmem:[#allocation8 + $0xb88] sm:$0xf0]  ;;  %v9824_v24 = vpop.f32.mrf.mxu2  ;;  %v9826_v25 = vpop.f32.mrf.mxu3  ;;  %v6668_v28 = vor.u32 %v8631_v3, %v6665_v4  ;;  %v6524_v6 = vor.u32 %v8595_v8, %v6521_v61  ;;  %v8775_v43 = vld [vmem:[#allocation8 + $0x67c] sm:$0xf] }
 0x1be   :  { %v7337_v4 = vld [vmem:[#allocation8 + $0x768] sm:$0xf0] }
 0x1bf   :  { %3767 = vmatpush.bf16.msra.mxu2 %v7288_v60  ;;  %3781 = vmatpush.bf16.msra.mxu3 %v7672_v32  ;;  %v7484_v60 = vor.u32 %v8835_v9, %v7481_v12  ;;  %v7868_v32 = vor.u32 %v8931_v22, %v7865_v23  ;;  %v6473_v22 = vld [vmem:[#allocation8 + $0xa8] sm:$0xf0] }
 0x1c0   :  { %v6476_v46 = vor.u32 %v8583_v13, %v6473_v22  ;;  %v6425_v10 = vld [vmem:[#allocation8 + $0x48] sm:$0xf0]  ;;  %v8950_v13 = vld [vmem:[#allocation8 + $0xbec] sm:$0xf0] }
 0x1c1   :  { %3741 = vmatpush.bf16.msra.mxu0 %v6424_v11  ;;  %3755 = vmatpush.bf16.msra.mxu1 %v6808_v38  ;;  %v7004_v11 = vor.u32 %v8715_v33, %v7001_v34  ;;  %v8607_v38 = vld [vmem:[#allocation8 + $0x13c] sm:$0xf]  ;;  %v3519_v45 = vpop.f32.mrf.mxu0  ;;  %v7673_v34 = vld [vmem:[#allocation8 + $0xa08] sm:$0xf0] }
 0x1c2   :  { %v6572_v56 = vor.u32 %v8607_v38, %v6569_v41  ;;  %v8883_v33 = vld [vmem:[#allocation8 + $0x9dc] sm:$0xf] }
 0x1c3   :  { %3768 = vmatpush.bf16.msra.mxu2 %v7240_v15  ;;  %3782 = vmatpush.bf16.msra.mxu3 %v7624_v44  ;;  %v8907_v15 = vld [vmem:[#allocation8 + $0xa9c] sm:$0xf]  ;;  %v7769_v44 = vld [vmem:[#allocation8 + $0xac8] sm:$0xf0]  ;;  %v7676_v41 = vor.u32 %v8883_v33, %v7673_v34  ;;  %v7055_v33 = vld [vmem:[#allocation8 + $0x500] sm:$0xf] }
 0x1c4   :  { %3742 = vmatmul.bf16.vlgmr.msra.gmra.mxu0 %v9777_v29  ;;  %3756 = vmatmul.bf16.vlgmr.msra.gmra.mxu1 %v9779_v59  ;;  %v8734_v34 = vld [vmem:[#allocation8 + $0x52c] sm:$0xf0] }
 0x1c5   :  { %3790 = vmatpush.bf16.msrb.mxu0 %v6764_v42  ;;  %3804 = vmatpush.bf16.msrb.mxu1 %v7148_v18  ;;  %v7820_v42 = vor.u32 %v8919_v35, %v7817_v36  ;;  %v8703_v18 = vld [vmem:[#allocation8 + $0x43c] sm:$0xf]  ;;  %v3493_v47 = vpop.f32.mrf.mxu2  ;;  %v3507_v55 = vpop.f32.mrf.mxu3 }
 0x1c6   :  { %v3494_v54 = vadd.f32 %v3493_v47, %v3480_v52  ;;  %v6956_v57 = vor.u32 %v8703_v18, %v6953_v14  ;;  %v8571_v36 = vld [vmem:[#allocation8 + $0x1c] sm:$0xf]  ;;  %v8662_v18 = vld [vmem:[#allocation8 + $0x2ec] sm:$0xf0] }
 0x1c7   :  { %3769 = vmatpush.bf16.msra.mxu2 %v7192_v1  ;;  %3783 = vmatpush.bf16.msra.mxu3 %v7576_v2  ;;  %v6905_v1 = vld [vmem:[#allocation8 + $0x408] sm:$0xf0]  ;;  %v8799_v2 = vld [vmem:[#allocation8 + $0x73c] sm:$0xf]  ;;  %v8758_v52 = vld [vmem:[#allocation8 + $0x5ec] sm:$0xf0] }
 0x1c8   :  { %v3508_v3 = vadd.f32 %v3507_v55, %v3494_v54  ;;  %v7340_v23 = vor.u32 %v8799_v2, %v7337_v4  ;;  %v8871_v47 = vld [vmem:[#allocation8 + $0x97c] sm:$0xf]  ;;  %v6428_v54 = vor.u32 %v8571_v36, %v6425_v10  ;;  %v7152_v8 = vor.u32 %v8758_v52, %v7151_v51  ;;  %v8746_v2 = vld [vmem:[#allocation8 + $0x58c] sm:$0xf0]  ;;  %v7193_v4 = vld [vmem:[#allocation8 + $0x648] sm:$0xf0] }
 0x1c9   :  { %3791 = vmatpush.bf16.msrb.mxu0 %v6716_v63  ;;  %3805 = vmatpush.bf16.msrb.mxu1 %v7100_v0  ;;  %v7772_v63 = vor.u32 %v8907_v15, %v7769_v44  ;;  %v8691_v0 = vld [vmem:[#allocation8 + $0x3dc] sm:$0xf]  ;;  %v7241_v44 = vld [vmem:[#allocation8 + $0x6a8] sm:$0xf0]  ;;  %v7056_v10 = vor.u32 %v8734_v34, %v7055_v33  ;;  %v7823_v51 = vld [vmem:[#allocation8 + $0xb00] sm:$0xf] }
 0x1ca   :  { %3770 = vmatmul.bf16.vlgmr.msra.gmra.mxu2 %v9783_v50  ;;  %3784 = vmatmul.bf16.vlgmr.msra.gmra.mxu3 %v9785_v16  ;;  %v6908_v9 = vor.u32 %v8691_v0, %v6905_v1  ;;  %v9838_v12 = vmul.f32 0.125, %v3508_v3  ;;  %v7244_v0 = vor.u32 %v8775_v43, %v7241_v44  ;;  %v8763_v3 = vld [vmem:[#allocation8 + $0x61c] sm:$0xf]  ;;  %v8926_v52 = vld [vmem:[#allocation8 + $0xb2c] sm:$0xf0] }
 0x1cb   :  { %3818 = vmatpush.bf16.msrb.mxu2 %v7532_v5  ;;  %3832 = vmatpush.bf16.msrb.mxu3 %v7916_v40  ;;  %v7721_v5 = vld [vmem:[#allocation8 + $0xa68] sm:$0xf0]  ;;  %v3520_v40 = vadd.f32 %v3519_v45, %v10533_v53  ;;  %v6575_v44 = vld [vmem:[#allocation8 + $0x140] sm:$0xf]  ;;  %v8686_v34 = vld [vmem:[#allocation8 + $0x3ac] sm:$0xf0] }
 0x1cc   :  { %4361 = vrot.lane.b32.xlu1 %v9838_v12, %s9515_s27  ;;  %v7625_v45 = vld [vmem:[#allocation8 + $0x9a8] sm:$0xf0]  ;;  %v6863_v33 = vld [vmem:[#allocation8 + $0x380] sm:$0xf]  ;;  %v7201_v53 = vld [vmem:[#allocation8 + $0x650] sm:$0xf0] }
 0x1cd   :  { %3792 = vmatpush.bf16.msrb.mxu0 %v6668_v28  ;;  %3806 = vmatpush.bf16.msrb.mxu1 %v7052_v58  ;;  %v7724_v28 = vor.u32 %v8895_v39, %v7721_v5  ;;  %v8679_v58 = vld [vmem:[#allocation8 + $0x37c] sm:$0xf]  ;;  %v3547_v31 = vpop.f32.mrf.mxu2  ;;  %v3561_v14 = vpop.f32.mrf.mxu3  ;;  %v7628_v1 = vor.u32 %v8871_v47, %v7625_v45  ;;  %v7577_v5 = vld [vmem:[#allocation8 + $0x948] sm:$0xf0]  ;;  %v8614_v47 = vld [vmem:[#allocation8 + $0x16c] sm:$0xf0] }
 0x1ce   :  { %v6860_v35 = vor.u32 %v8679_v58, %v6857_v19  ;;  %v8859_v39 = vld [vmem:[#allocation8 + $0x91c] sm:$0xf]  ;;  %v6671_v19 = vld [vmem:[#allocation8 + $0x200] sm:$0xf] }
 0x1cf   :  { %3819 = vmatpush.bf16.msrb.mxu2 %v7484_v60  ;;  %3833 = vmatpush.bf16.msrb.mxu3 %v7868_v32  ;;  %v3533_v60 = vpop.f32.mrf.mxu1  ;;  %v7289_v32 = vld [vmem:[#allocation8 + $0x708] sm:$0xf0]  ;;  %v7580_v58 = vor.u32 %v8859_v39, %v7577_v5 }
 0x1d0   :  { %v3534_v48 = vadd.f32 %v3533_v60, %v3520_v40  ;;  %v7292_v38 = vor.u32 %v8787_v30, %v7289_v32  ;;  %v7535_v40 = vld [vmem:[#allocation8 + $0x8c0] sm:$0xf]  ;;  %v8638_v30 = vld [vmem:[#allocation8 + $0x22c] sm:$0xf0] }
 0x1d1   :  { %3793 = vmatpush.bf16.msrb.mxu0 %v6620_v37  ;;  %3807 = vmatpush.bf16.msrb.mxu1 %v7004_v11  ;;  %v8667_v37 = vld [vmem:[#allocation8 + $0x31c] sm:$0xf]  ;;  %v6672_v36 = vor.u32 %v8638_v30, %v6671_v19  ;;  %v6479_v19 = vld [vmem:[#allocation8 + $0x80] sm:$0xf]  ;;  %v8590_v30 = vld [vmem:[#allocation8 + $0xac] sm:$0xf0] }
 0x1d2   :  { %v3548_v11 = vadd.f32 %v3547_v31, %v3534_v48  ;;  %v7487_v48 = vld [vmem:[#allocation8 + $0x860] sm:$0xf]  ;;  %v8842_v31 = vld [vmem:[#allocation8 + $0x88c] sm:$0xf0] }
 0x1d3   :  { %3820 = vmatpush.bf16.msrb.mxu2 %v7436_v17  ;;  %3834 = vmatpush.bf16.msrb.mxu3 %v7820_v42  ;;  %v6809_v17 = vld [vmem:[#allocation8 + $0x348] sm:$0xf0]  ;;  %v6767_v42 = vld [vmem:[#allocation8 + $0x2c0] sm:$0xf] }
 0x1d4   :  { %v3562_v15 = vadd.f32 %v3561_v14, %v3548_v11  ;;  %v6812_v55 = vor.u32 %v8667_v37, %v6809_v17  ;;  %v6623_v37 = vld [vmem:[#allocation8 + $0x1a0] sm:$0xf]  ;;  %v8626_v11 = vld [vmem:[#allocation8 + $0x1cc] sm:$0xf0] }
 0x1d5   :  { %3794 = vmatpush.bf16.msrb.mxu0 %v6572_v56  ;;  %3808 = vmatpush.bf16.msrb.mxu1 %v6956_v57  ;;  %v6719_v56 = vld [vmem:[#allocation8 + $0x260] sm:$0xf]  ;;  %v6768_v57 = vor.u32 %v8662_v18, %v6767_v42  ;;  %v8722_v42 = vld [vmem:[#allocation8 + $0x4cc] sm:$0xf0]  ;;  %v6624_v43 = vor.u32 %v8626_v11, %v6623_v37  ;;  %v6480_v37 = vor.u32 %v8590_v30, %v6479_v19  ;;  %v7921_v19 = vld [vmem:[#allocation8 + $0xbf0] sm:$0xf0] }
 0x1d6   :  { %v9842_v61 = vmul.f32 0.125, %v3562_v15  ;;  %v7007_v17 = vld [vmem:[#allocation8 + $0x4a0] sm:$0xf]  ;;  %v8830_v14 = vld [vmem:[#allocation8 + $0x82c] sm:$0xf0]  ;;  %v6864_v11 = vor.u32 %v8686_v34, %v6863_v33 }
 0x1d7   :  { %3821 = vmatpush.bf16.msrb.mxu2 %v7388_v62  ;;  %3835 = vmatpush.bf16.msrb.mxu3 %v7772_v63  ;;  %v8650_v62 = vld [vmem:[#allocation8 + $0x28c] sm:$0xf0]  ;;  %v7103_v63 = vld [vmem:[#allocation8 + $0x560] sm:$0xf]  ;;  %v7008_v15 = vor.u32 %v8722_v42, %v7007_v17 }
 0x1d8   :  { %10536 = vst [vmem:[#allocation28_spill] sm:$0xff] %v9842_v61  ;;  %4546 = vrot.lane.b32.xlu1 %v9842_v61, %s9515_s27  ;;  %v6720_v22 = vor.u32 %v8650_v62, %v6719_v56  ;;  %v7439_v18 = vld [vmem:[#allocation8 + $0x800] sm:$0xf]  ;;  %v8710_v56 = vld [vmem:[#allocation8 + $0x46c] sm:$0xf0] }
 0x1d9   :  { %3795 = vmatpush.bf16.msrb.mxu0 %v6524_v6  ;;  %3809 = vmatpush.bf16.msrb.mxu1 %v6908_v9  ;;  %v8854_v6 = vld [vmem:[#allocation8 + $0x8ec] sm:$0xf0]  ;;  %v7919_v9 = vld [vmem:[#allocation8 + $0xbc0] sm:$0xf]  ;;  %v7440_v45 = vor.u32 %v8830_v14, %v7439_v18  ;;  %v8860_v61 = vld [vmem:[#allocation8 + $0x924] sm:$0xf] }
 0x1da   :  { %v7536_v60 = vor.u32 %v8854_v6, %v7535_v40  ;;  %v7920_v32 = vor.u32 %v8950_v13, %v7919_v9  ;;  %v7775_v62 = vld [vmem:[#allocation8 + $0xaa0] sm:$0xf]  ;;  %v8698_v6 = vld [vmem:[#allocation8 + $0x40c] sm:$0xf0] }
 0x1db   :  { %3822 = vmatpush.bf16.msrb.mxu2 %v7340_v23  ;;  %3836 = vmatpush.bf16.msrb.mxu3 %v7724_v28  ;;  %v7104_v23 = vor.u32 %v8746_v2, %v7103_v63  ;;  %v7196_v28 = vor.u32 %v8763_v3, %v7193_v4  ;;  %v8914_v63 = vld [vmem:[#allocation8 + $0xacc] sm:$0xf0]  ;;  %v6527_v3 = vld [vmem:[#allocation8 + $0xe0] sm:$0xf] }
 0x1dc   :  { %v8602_v4 = vld [vmem:[#allocation8 + $0x10c] sm:$0xf0]  ;;  %v7776_v5 = vor.u32 %v8914_v63, %v7775_v62  ;;  %v6911_v40 = vld [vmem:[#allocation8 + $0x3e0] sm:$0xf] }
 0x1dd   :  { %3796 = vmatpush.bf16.msrb.mxu0 %v6476_v46  ;;  %3810 = vmatpush.bf16.msrb.mxu1 %v6860_v35  ;;  %v7871_v46 = vld [vmem:[#allocation8 + $0xb60] sm:$0xf]  ;;  %v8938_v35 = vld [vmem:[#allocation8 + $0xb8c] sm:$0xf0] }
 0x1de   :  { %v7343_v9 = vld [vmem:[#allocation8 + $0x740] sm:$0xf]  ;;  %v8806_v13 = vld [vmem:[#allocation8 + $0x76c] sm:$0xf0] }
 0x1df   :  { %3823 = vmatpush.bf16.msrb.mxu2 %v7292_v38  ;;  %3837 = vmatpush.bf16.msrb.mxu3 %v7676_v41  ;;  %v7488_v38 = vor.u32 %v8842_v31, %v7487_v48  ;;  %v7872_v41 = vor.u32 %v8938_v35, %v7871_v46  ;;  %v7295_v48 = vld [vmem:[#allocation8 + $0x6e0] sm:$0xf]  ;;  %v9852_v31 = vpop.f32.mrf.mxu1  ;;  %v8794_v46 = vld [vmem:[#allocation8 + $0x70c] sm:$0xf0] }
 0x1e0   :  { %v7679_v35 = vld [vmem:[#allocation8 + $0x9e0] sm:$0xf]  ;;  %v7296_v42 = vor.u32 %v8794_v46, %v7295_v48  ;;  %v8674_v14 = vld [vmem:[#allocation8 + $0x34c] sm:$0xf0] }
 0x1e1   :  { %3797 = vmatpush.bf16.msrb.mxu0 %v6428_v54  ;;  %3811 = vmatpush.bf16.msrb.mxu1 %v6812_v55  ;;  %v7824_v54 = vor.u32 %v8926_v52, %v7823_v51  ;;  %v6959_v55 = vld [vmem:[#allocation8 + $0x440] sm:$0xf]  ;;  %v8656_v51 = vld [vmem:[#allocation8 + $0x2c4] sm:$0xf]  ;;  %v6769_v52 = vld [vmem:[#allocation8 + $0x2f0] sm:$0xf0] }
 0x1e2   :  { %v6960_v2 = vor.u32 %v8710_v56, %v6959_v55  ;;  %v6815_v17 = vld [vmem:[#allocation8 + $0x320] sm:$0xf]  ;;  %v8878_v56 = vld [vmem:[#allocation8 + $0x9ac] sm:$0xf0]  ;;  %v6772_v62 = vor.u32 %v8656_v51, %v6769_v52 }
 0x1e3   :  { %3824 = vmatpush.bf16.msrb.mxu2 %v7244_v0  ;;  %3838 = vmatpush.bf16.msrb.mxu3 %v7628_v1  ;;  %v9850_v0 = vpop.f32.mrf.mxu0  ;;  %v6576_v1 = vor.u32 %v8614_v47, %v6575_v44  ;;  %v8752_v44 = vld [vmem:[#allocation8 + $0x5c4] sm:$0xf]  ;;  %v7153_v47 = vld [vmem:[#allocation8 + $0x5f0] sm:$0xf0]  ;;  %v7631_v55 = vld [vmem:[#allocation8 + $0x980] sm:$0xf] }
 0x1e4   :  { %3798 = vmatmul.bf16.vlgmr.msrb.gmra.mxu0 %v9777_v29  ;;  %3812 = vmatmul.bf16.vlgmr.msrb.gmra.mxu1 %v9779_v59  ;;  %v7156_v63 = vor.u32 %v8752_v44, %v7153_v47  ;;  %v8620_v44 = vld [vmem:[#allocation8 + $0x1a4] sm:$0xf]  ;;  %v6625_v47 = vld [vmem:[#allocation8 + $0x1d0] sm:$0xf0] }
 0x1e5   :  { %3846 = vmatpush.bf16.msra.mxu0 %v6768_v57  ;;  %3860 = vmatpush.bf16.msra.mxu1 %v7152_v8  ;;  %v7391_v57 = vld [vmem:[#allocation8 + $0x7a0] sm:$0xf]  ;;  %v8818_v8 = vld [vmem:[#allocation8 + $0x7cc] sm:$0xf0] }
 0x1e6   :  { %v7392_v39 = vor.u32 %v8818_v8, %v7391_v57  ;;  %v6816_v8 = vor.u32 %v8674_v14, %v6815_v17  ;;  %v8836_v17 = vld [vmem:[#allocation8 + $0x864] sm:$0xf]  ;;  %v7873_v14 = vld [vmem:[#allocation8 + $0xb90] sm:$0xf0] }
 0x1e7   :  { %3825 = vmatpush.bf16.msrb.mxu2 %v7196_v28  ;;  %3839 = vmatpush.bf16.msrb.mxu3 %v7580_v58  ;;  %v6528_v28 = vor.u32 %v8602_v4, %v6527_v3  ;;  %v6912_v58 = vor.u32 %v8698_v6, %v6911_v40  ;;  %v8740_v3 = vld [vmem:[#allocation8 + $0x564] sm:$0xf]  ;;  %v9860_v4 = vpop.f32.mrf.mxu1  ;;  %v7105_v40 = vld [vmem:[#allocation8 + $0x590] sm:$0xf0]  ;;  %v7199_v6 = vld [vmem:[#allocation8 + $0x620] sm:$0xf] }
 0x1e9   :  { %3847 = vmatpush.bf16.msra.mxu0 %v6720_v22  ;;  %3861 = vmatpush.bf16.msra.mxu1 %v7104_v23  ;;  %v7727_v22 = vld [vmem:[#allocation8 + $0xa40] sm:$0xf]  ;;  %v8902_v23 = vld [vmem:[#allocation8 + $0xa6c] sm:$0xf0] }
 0x1ea   :  { %3826 = vmatmul.bf16.vlgmr.msrb.gmra.mxu2 %v9783_v50  ;;  %3840 = vmatmul.bf16.vlgmr.msrb.gmra.mxu3 %v9785_v16 }
 0x1eb   :  { %3874 = vmatpush.bf16.msra.mxu2 %v7536_v60  ;;  %3888 = vmatpush.bf16.msra.mxu3 %v7920_v32  ;;  %v7344_v60 = vor.u32 %v8806_v13, %v7343_v9  ;;  %v7728_v32 = vor.u32 %v8902_v23, %v7727_v22  ;;  %v8770_v9 = vld [vmem:[#allocation8 + $0x64c] sm:$0xf0]  ;;  %v7583_v13 = vld [vmem:[#allocation8 + $0x920] sm:$0xf]  ;;  %v8848_v23 = vld [vmem:[#allocation8 + $0x8c4] sm:$0xf] }
 0x1ec   :  { %v8866_v22 = vld [vmem:[#allocation8 + $0x94c] sm:$0xf0]  ;;  %v7200_v48 = vor.u32 %v8770_v9, %v7199_v6 }
 0x1ed   :  { %3848 = vmatpush.bf16.msra.mxu0 %v6672_v36  ;;  %3862 = vmatpush.bf16.msra.mxu1 %v7056_v10  ;;  %v8890_v36 = vld [vmem:[#allocation8 + $0xa0c] sm:$0xf0]  ;;  %v9854_v10 = vpop.f32.mrf.mxu0  ;;  %v7584_v46 = vor.u32 %v8866_v22, %v7583_v13  ;;  %v8704_v13 = vld [vmem:[#allocation8 + $0x444] sm:$0xf]  ;;  %v6961_v22 = vld [vmem:[#allocation8 + $0x470] sm:$0xf0] }
 0x1ee   :  { %v7680_v18 = vor.u32 %v8890_v36, %v7679_v35  ;;  %v8632_v35 = vld [vmem:[#allocation8 + $0x204] sm:$0xf]  ;;  %v6673_v36 = vld [vmem:[#allocation8 + $0x230] sm:$0xf0] }
 0x1ef   :  { %3875 = vmatpush.bf16.msra.mxu2 %v7488_v38  ;;  %3889 = vmatpush.bf16.msra.mxu3 %v7872_v41  ;;  %v6431_v38 = vld [vmem:[#allocation8 + $0x20] sm:$0xf]  ;;  %v8578_v41 = vld [vmem:[#allocation8 + $0x4c] sm:$0xf0]  ;;  %v6676_v51 = vor.u32 %v8632_v35, %v6673_v36  ;;  %v8596_v35 = vld [vmem:[#allocation8 + $0xe4] sm:$0xf] }
 0x1f0   :  { %v6432_v57 = vor.u32 %v8578_v41, %v6431_v38  ;;  %v8728_v38 = vld [vmem:[#allocation8 + $0x504] sm:$0xf]  ;;  %v7057_v41 = vld [vmem:[#allocation8 + $0x530] sm:$0xf0] }
 0x1f1   :  { %3849 = vmatpush.bf16.msra.mxu0 %v6624_v43  ;;  %3863 = vmatpush.bf16.msra.mxu1 %v7008_v15  ;;  %v9856_v43 = vpop.f32.mrf.mxu2  ;;  %v9858_v15 = vpop.f32.mrf.mxu3  ;;  %v7060_v52 = vor.u32 %v8728_v38, %v7057_v41  ;;  %v6529_v36 = vld [vmem:[#allocation8 + $0x110] sm:$0xf0]  ;;  %v8692_v38 = vld [vmem:[#allocation8 + $0x3e4] sm:$0xf] }
 0x1f2   :  { %v6913_v41 = vld [vmem:[#allocation8 + $0x410] sm:$0xf0] }
 0x1f3   :  { %3876 = vmatpush.bf16.msra.mxu2 %v7440_v45  ;;  %3890 = vmatpush.bf16.msra.mxu3 %v7824_v54  ;;  %v7247_v45 = vld [vmem:[#allocation8 + $0x680] sm:$0xf]  ;;  %v8782_v54 = vld [vmem:[#allocation8 + $0x6ac] sm:$0xf0] }
 0x1f5   :  { %3850 = vmatpush.bf16.msra.mxu0 %v6576_v1  ;;  %3864 = vmatpush.bf16.msra.mxu1 %v6960_v2  ;;  %v8644_v1 = vld [vmem:[#allocation8 + $0x264] sm:$0xf]  ;;  %v6721_v2 = vld [vmem:[#allocation8 + $0x290] sm:$0xf0]  ;;  %v9862_v30 = vpop.f32.mrf.mxu0 }
 0x1f7   :  { %3877 = vmatpush.bf16.msra.mxu2 %v7392_v39  ;;  %3891 = vmatpush.bf16.msra.mxu3 %v7776_v5  ;;  %v7248_v39 = vor.u32 %v8782_v54, %v7247_v45  ;;  %v7632_v5 = vor.u32 %v8878_v56, %v7631_v55  ;;  %v8716_v55 = vld [vmem:[#allocation8 + $0x4a4] sm:$0xf]  ;;  %v7009_v56 = vld [vmem:[#allocation8 + $0x4d0] sm:$0xf0] }
 0x1f9   :  { %3851 = vmatpush.bf16.msra.mxu0 %v6528_v28  ;;  %3865 = vmatpush.bf16.msra.mxu1 %v6912_v58  ;;  %v7537_v28 = vld [vmem:[#allocation8 + $0x8f0] sm:$0xf0]  ;;  %v8944_v58 = vld [vmem:[#allocation8 + $0xbc4] sm:$0xf]  ;;  %v9864_v33 = vpop.f32.mrf.mxu2  ;;  %v9866_v34 = vpop.f32.mrf.mxu3 }
 0x1fb   :  { %3878 = vmatpush.bf16.msra.mxu2 %v7344_v60  ;;  %3892 = vmatpush.bf16.msra.mxu3 %v7728_v32  ;;  %v6724_v60 = vor.u32 %v8644_v1, %v6721_v2  ;;  %v7108_v32 = vor.u32 %v8740_v3, %v7105_v40  ;;  %v7825_v1 = vld [vmem:[#allocation8 + $0xb30] sm:$0xf0]  ;;  %v6628_v3 = vor.u32 %v8620_v44, %v6625_v47  ;;  %v8584_v47 = vld [vmem:[#allocation8 + $0x84] sm:$0xf] }
 0x1fc   :  { %v6577_v40 = vld [vmem:[#allocation8 + $0x170] sm:$0xf0]  ;;  %v6916_v44 = vor.u32 %v8692_v38, %v6913_v41  ;;  %v8759_v38 = vld [vmem:[#allocation8 + $0x5f4] sm:$0xf0]  ;;  %v8776_v41 = vld [vmem:[#allocation8 + $0x684] sm:$0xf] }
 0x1fd   :  { %3852 = vmatpush.bf16.msra.mxu0 %v6480_v37  ;;  %3866 = vmatpush.bf16.msra.mxu1 %v6864_v11  ;;  %v7540_v37 = vor.u32 %v8848_v23, %v7537_v28  ;;  %v7924_v11 = vor.u32 %v8944_v58, %v7921_v19  ;;  %v8812_v23 = vld [vmem:[#allocation8 + $0x7a4] sm:$0xf]  ;;  %v7393_v19 = vld [vmem:[#allocation8 + $0x7d0] sm:$0xf0] }
 0x1ff   :  { %3879 = vmatpush.bf16.msra.mxu2 %v7296_v42  ;;  %3893 = vmatpush.bf16.msra.mxu3 %v7680_v18  ;;  %v7489_v42 = vld [vmem:[#allocation8 + $0x890] sm:$0xf0]  ;;  %v8932_v18 = vld [vmem:[#allocation8 + $0xb64] sm:$0xf] }
 0x200   :  { %v7492_v45 = vor.u32 %v8836_v17, %v7489_v42  ;;  %v7876_v54 = vor.u32 %v8932_v18, %v7873_v14  ;;  %v8800_v17 = vld [vmem:[#allocation8 + $0x744] sm:$0xf]  ;;  %v7345_v18 = vld [vmem:[#allocation8 + $0x770] sm:$0xf0] }
 0x201   :  { %3853 = vmatpush.bf16.msra.mxu0 %v6432_v57  ;;  %3867 = vmatpush.bf16.msra.mxu1 %v6816_v8  ;;  %v8824_v57 = vld [vmem:[#allocation8 + $0x804] sm:$0xf]  ;;  %v9870_v8 = vpop.f32.mrf.mxu1  ;;  %v9874_v2 = vpop.f32.mrf.mxu0 }
 0x202   :  { %v9876_v28 = vpop.f32.mrf.mxu2  ;;  %v9878_v58 = vpop.f32.mrf.mxu3  ;;  %v8896_v14 = vld [vmem:[#allocation8 + $0xa44] sm:$0xf] }
 0x203   :  { %3880 = vmatpush.bf16.msra.mxu2 %v7248_v39  ;;  %3894 = vmatpush.bf16.msra.mxu3 %v7632_v5  ;;  %v7012_v39 = vor.u32 %v8716_v55, %v7009_v56  ;;  %v8608_v5 = vld [vmem:[#allocation8 + $0x144] sm:$0xf]  ;;  %v7348_v55 = vor.u32 %v8800_v17, %v7345_v18  ;;  %v7249_v17 = vld [vmem:[#allocation8 + $0x6b0] sm:$0xf0] }
 0x204   :  { %3854 = vmatmul.bf16.vlgmr.msra.gmra.mxu0 %v9777_v29  ;;  %3868 = vmatmul.bf16.vlgmr.msra.gmra.mxu1 %v9779_v59  ;;  %v8872_v18 = vld [vmem:[#allocation8 + $0x984] sm:$0xf] }
 0x205   :  { %3902 = vmatpush.bf16.msrb.mxu0 %v6772_v62  ;;  %3916 = vmatpush.bf16.msrb.mxu1 %v7156_v63  ;;  %v7441_v62 = vld [vmem:[#allocation8 + $0x830] sm:$0xf0]  ;;  %v8920_v63 = vld [vmem:[#allocation8 + $0xb04] sm:$0xf] }
 0x206   :  { %v7444_v6 = vor.u32 %v8824_v57, %v7441_v62  ;;  %v7828_v9 = vor.u32 %v8920_v63, %v7825_v1  ;;  %v8680_v57 = vld [vmem:[#allocation8 + $0x384] sm:$0xf]  ;;  %v6865_v62 = vld [vmem:[#allocation8 + $0x3b0] sm:$0xf0] }
 0x207   :  { %3881 = vmatpush.bf16.msra.mxu2 %v7200_v48  ;;  %3895 = vmatpush.bf16.msra.mxu3 %v7584_v46  ;;  %v6580_v48 = vor.u32 %v8608_v5, %v6577_v40  ;;  %v6964_v46 = vor.u32 %v8704_v13, %v6961_v22  ;;  %v8788_v63 = vld [vmem:[#allocation8 + $0x6e4] sm:$0xf]  ;;  %v7681_v40 = vld [vmem:[#allocation8 + $0xa10] sm:$0xf0]  ;;  %v6868_v22 = vor.u32 %v8680_v57, %v6865_v62  ;;  %v7111_v57 = vld [vmem:[#allocation8 + $0x568] sm:$0xf] }
 0x208   :  { %v8884_v5 = vld [vmem:[#allocation8 + $0x9e4] sm:$0xf]  ;;  %v7252_v62 = vor.u32 %v8776_v41, %v7249_v17  ;;  %v8639_v41 = vld [vmem:[#allocation8 + $0x234] sm:$0xf0] }
 0x209   :  { %3903 = vmatpush.bf16.msrb.mxu0 %v6724_v60  ;;  %3917 = vmatpush.bf16.msrb.mxu1 %v7108_v32  ;;  %v8908_v60 = vld [vmem:[#allocation8 + $0xaa4] sm:$0xf]  ;;  %v7777_v32 = vld [vmem:[#allocation8 + $0xad0] sm:$0xf0]  ;;  %v9880_v42 = vpop.f32.mrf.mxu1 }
 0x20a   :  { %3882 = vmatmul.bf16.vlgmr.msra.gmra.mxu2 %v9783_v50  ;;  %3896 = vmatmul.bf16.vlgmr.msra.gmra.mxu3 %v9785_v16 }
 0x20b   :  { %3930 = vmatpush.bf16.msrb.mxu2 %v7540_v37  ;;  %3944 = vmatpush.bf16.msrb.mxu3 %v7924_v11  ;;  %v7396_v37 = vor.u32 %v8812_v23, %v7393_v19  ;;  %v7780_v11 = vor.u32 %v8908_v60, %v7777_v32  ;;  %v8572_v23 = vld [vmem:[#allocation8 + $0x24] sm:$0xf]  ;;  %v6433_v19 = vld [vmem:[#allocation8 + $0x50] sm:$0xf0] }
 0x20c   :  { %v8668_v60 = vld [vmem:[#allocation8 + $0x324] sm:$0xf] }
 0x20d   :  { %3904 = vmatpush.bf16.msrb.mxu0 %v6676_v51  ;;  %3918 = vmatpush.bf16.msrb.mxu1 %v7060_v52  ;;  %v7729_v51 = vld [vmem:[#allocation8 + $0xa70] sm:$0xf0]  ;;  %v6532_v52 = vor.u32 %v8596_v35, %v6529_v36  ;;  %v9882_v1 = vpop.f32.mrf.mxu2  ;;  %v6775_v36 = vld [vmem:[#allocation8 + $0x2c8] sm:$0xf] }
 0x20e   :  { %v7732_v56 = vor.u32 %v8896_v14, %v7729_v51  ;;  %v6817_v35 = vld [vmem:[#allocation8 + $0x350] sm:$0xf0] }
 0x20f   :  { %3931 = vmatpush.bf16.msrb.mxu2 %v7492_v45  ;;  %3945 = vmatpush.bf16.msrb.mxu3 %v7876_v54  ;;  %v6481_v45 = vld [vmem:[#allocation8 + $0xb0] sm:$0xf0]  ;;  %v3633_v54 = vpop.f32.mrf.mxu0 }
 0x210   :  { %v6484_v13 = vor.u32 %v8584_v47, %v6481_v45  ;;  %v7633_v14 = vld [vmem:[#allocation8 + $0x9b0] sm:$0xf0] }
 0x211   :  { %3905 = vmatpush.bf16.msrb.mxu0 %v6628_v3  ;;  %3919 = vmatpush.bf16.msrb.mxu1 %v7012_v39  ;;  %v9884_v3 = vpop.f32.mrf.mxu3  ;;  %v7297_v39 = vld [vmem:[#allocation8 + $0x710] sm:$0xf0]  ;;  %v3647_v51 = vpop.f32.mrf.mxu1 }
 0x213   :  { %3932 = vmatpush.bf16.msrb.mxu2 %v7444_v6  ;;  %3946 = vmatpush.bf16.msrb.mxu3 %v7828_v9  ;;  %v9886_v6 = vld [vmem:[#allocation10] sm:$0xff] }
 0x214   :  { %v1458_v9 = vperm.slane %v9886_v6, 4 }
 0x215   :  { %3906 = vmatpush.bf16.msrb.mxu0 %v6580_v48  ;;  %3920 = vmatpush.bf16.msrb.mxu1 %v6964_v46  ;;  %v7300_v48 = vor.u32 %v8788_v63, %v7297_v39  ;;  %v7684_v46 = vor.u32 %v8884_v5, %v7681_v40  ;;  %v7636_v63 = vor.u32 %v8872_v18, %v7633_v14  ;;  %v3661_v39 = vpop.f32.mrf.mxu2  ;;  %v8747_v5 = vld [vmem:[#allocation8 + $0x594] sm:$0xf0]  ;;  %v8764_v40 = vld [vmem:[#allocation8 + $0x624] sm:$0xf]  ;;  %v7063_v14 = vld [vmem:[#allocation8 + $0x508] sm:$0xf] }
 0x216   :  { %v3634_v32 = vadd.f32 %v3633_v54, %v1458_v9 }
 0x217   :  { %3933 = vmatpush.bf16.msrb.mxu2 %v7396_v37  ;;  %3947 = vmatpush.bf16.msrb.mxu3 %v7780_v11  ;;  %v8663_v37 = vld [vmem:[#allocation8 + $0x2f4] sm:$0xf0]  ;;  %v7159_v11 = vld [vmem:[#allocation8 + $0x5c8] sm:$0xf] }
 0x218   :  { %v3648_v47 = vadd.f32 %v3647_v51, %v3634_v32  ;;  %v6776_v45 = vor.u32 %v8663_v37, %v6775_v36  ;;  %v7160_v54 = vor.u32 %v8759_v38, %v7159_v11  ;;  %v7927_v32 = vld [vmem:[#allocation8 + $0xbc8] sm:$0xf]  ;;  %v7204_v37 = vor.u32 %v8764_v40, %v7201_v53  ;;  %v8735_v51 = vld [vmem:[#allocation8 + $0x534] sm:$0xf0] }
 0x219   :  { %3907 = vmatpush.bf16.msrb.mxu0 %v6532_v52  ;;  %3921 = vmatpush.bf16.msrb.mxu1 %v6916_v44  ;;  %v6436_v52 = vor.u32 %v8572_v23, %v6433_v19  ;;  %v6820_v44 = vor.u32 %v8668_v60, %v6817_v35  ;;  %v3632_v23 = vadd.f32 %v9874_v2, %v1458_v9  ;;  %v3675_v19 = vpop.f32.mrf.mxu3  ;;  %v8855_v60 = vld [vmem:[#allocation8 + $0x8f4] sm:$0xf0]  ;;  %v6679_v38 = vld [vmem:[#allocation8 + $0x208] sm:$0xf]  ;;  %v10537_v2 = vperm.slane %v9807_v26, 1 }
 0x21a   :  { %v3662_v27 = vadd.f32 %v3661_v39, %v3648_v47  ;;  %v7112_v35 = vor.u32 %v8747_v5, %v7111_v57  ;;  %v8843_v53 = vld [vmem:[#allocation8 + $0x894] sm:$0xf0]  ;;  %v6680_v47 = vor.u32 %v8639_v41, %v6679_v38  ;;  %v7447_v39 = vld [vmem:[#allocation8 + $0x808] sm:$0xf] }
 0x21b   :  { %3934 = vmatpush.bf16.msrb.mxu2 %v7348_v55  ;;  %3948 = vmatpush.bf16.msrb.mxu3 %v7732_v56  ;;  %v6727_v55 = vld [vmem:[#allocation8 + $0x268] sm:$0xf]  ;;  %v8651_v56 = vld [vmem:[#allocation8 + $0x294] sm:$0xf0]  ;;  %v3464_v9 = vadd.f32 %v9812_v49, %v10537_v2 }
 0x21c   :  { %v9890_v36 = vadd.f32 %v3675_v19, %v3662_v27  ;;  %v7495_v27 = vld [vmem:[#allocation8 + $0x868] sm:$0xf]  ;;  %v8831_v5 = vld [vmem:[#allocation8 + $0x834] sm:$0xf0] }
 0x21d   :  { %3908 = vmatpush.bf16.msrb.mxu0 %v6484_v13  ;;  %3922 = vmatpush.bf16.msrb.mxu1 %v6868_v22  ;;  %v7585_v13 = vld [vmem:[#allocation8 + $0x950] sm:$0xf0]  ;;  %v7543_v22 = vld [vmem:[#allocation8 + $0x8c8] sm:$0xf] }
 0x21e   :  { %v7588_v11 = vor.u32 %v8860_v61, %v7585_v13  ;;  %v7544_v17 = vor.u32 %v8855_v60, %v7543_v22  ;;  %4178 = vrot.lane.b32.xlu0 %v9890_v36, %s9515_s27  ;;  %v7879_v61 = vld [vmem:[#allocation8 + $0xb68] sm:$0xf]  ;;  %v8927_v13 = vld [vmem:[#allocation8 + $0xb34] sm:$0xf0] }
 0x21f   :  { %3935 = vmatpush.bf16.msrb.mxu2 %v7300_v48  ;;  %3949 = vmatpush.bf16.msrb.mxu3 %v7684_v46  ;;  %v8951_v48 = vld [vmem:[#allocation8 + $0xbf4] sm:$0xf0]  ;;  %v6728_v46 = vor.u32 %v8651_v56, %v6727_v55  ;;  %v3478_v56 = vadd.f32 %v9818_v7, %v3464_v9  ;;  %v7831_v40 = vld [vmem:[#allocation8 + $0xb08] sm:$0xf] }
 0x220   :  { %v7928_v18 = vor.u32 %v8951_v48, %v7927_v32  ;;  %v8627_v55 = vld [vmem:[#allocation8 + $0x1d4] sm:$0xf0]  ;;  %v6583_v60 = vld [vmem:[#allocation8 + $0x148] sm:$0xf]  ;;  %v7448_v48 = vor.u32 %v8831_v5, %v7447_v39 }
 0x221   :  { %3909 = vmatpush.bf16.msrb.mxu0 %v6436_v52  ;;  %3923 = vmatpush.bf16.msrb.mxu1 %v6820_v44  ;;  %v3646_v52 = vadd.f32 %v9880_v42, %v3632_v23  ;;  %v8939_v44 = vld [vmem:[#allocation8 + $0xb94] sm:$0xf0]  ;;  %v7496_v42 = vor.u32 %v8843_v53, %v7495_v27  ;;  %v9905_v22 = vpop.f32.mrf.mxu0  ;;  %v7783_v38 = vld [vmem:[#allocation8 + $0xaa8] sm:$0xf] }
 0x222   :  { %v7880_v57 = vor.u32 %v8939_v44, %v7879_v61  ;;  %v8615_v32 = vld [vmem:[#allocation8 + $0x174] sm:$0xf0]  ;;  %v6919_v27 = vld [vmem:[#allocation8 + $0x3e8] sm:$0xf]  ;;  %v9913_v61 = vpop.f32.mrf.mxu1 }
 0x223   :  { %3936 = vmatpush.bf16.msrb.mxu2 %v7252_v62  ;;  %3950 = vmatpush.bf16.msrb.mxu3 %v7636_v63  ;;  %v3660_v49 = vadd.f32 %v9882_v1, %v3646_v52  ;;  %v7015_v62 = vld [vmem:[#allocation8 + $0x4a8] sm:$0xf]  ;;  %v8723_v63 = vld [vmem:[#allocation8 + $0x4d4] sm:$0xf0]  ;;  %v3492_v1 = vadd.f32 %v9824_v24, %v3478_v56  ;;  %v6584_v2 = vor.u32 %v8615_v32, %v6583_v60  ;;  %v1459_v60 = vperm.slane %v9886_v6, 5 }
 0x224   :  { %3910 = vmatmul.bf16.vlgmr.msrb.gmra.mxu0 %v9777_v29  ;;  %3924 = vmatmul.bf16.vlgmr.msrb.gmra.mxu1 %v9779_v59  ;;  %v7016_v19 = vor.u32 %v8723_v63, %v7015_v62  ;;  %v6967_v24 = vld [vmem:[#allocation8 + $0x448] sm:$0xf]  ;;  %v8699_v52 = vld [vmem:[#allocation8 + $0x414] sm:$0xf0] }
 0x225   :  { %3958 = vmatpush.bf16.msra.mxu0 %v6776_v45  ;;  %3972 = vmatpush.bf16.msra.mxu1 %v7160_v54  ;;  %v7064_v45 = vor.u32 %v8735_v51, %v7063_v14  ;;  %v6631_v54 = vld [vmem:[#allocation8 + $0x1a8] sm:$0xf]  ;;  %v9908_v7 = vadd.f32 %v9884_v3, %v3660_v49  ;;  %v8915_v3 = vld [vmem:[#allocation8 + $0xad4] sm:$0xf0]  ;;  %v3506_v41 = vadd.f32 %v9826_v25, %v3492_v1 }
 0x226   :  { %v6632_v23 = vor.u32 %v8627_v55, %v6631_v54  ;;  %v7784_v51 = vor.u32 %v8915_v3, %v7783_v38  ;;  %v7351_v53 = vld [vmem:[#allocation8 + $0x748] sm:$0xf]  ;;  %v8807_v44 = vld [vmem:[#allocation8 + $0x774] sm:$0xf0] }
 0x227   :  { %3937 = vmatpush.bf16.msrb.mxu2 %v7204_v37  ;;  %3951 = vmatpush.bf16.msrb.mxu3 %v7588_v11  ;;  %v7399_v37 = vld [vmem:[#allocation8 + $0x7a8] sm:$0xf]  ;;  %v8819_v11 = vld [vmem:[#allocation8 + $0x7d4] sm:$0xf0]  ;;  %v9915_v54 = vmul.f32 0.125, %v3506_v41 }
 0x228   :  { %4176 = vrot.lane.b32.xlu0 %v9908_v7, %s9515_s27  ;;  %v7400_v14 = vor.u32 %v8819_v11, %v7399_v37  ;;  %v7735_v49 = vld [vmem:[#allocation8 + $0xa48] sm:$0xf]  ;;  %v8591_v56 = vld [vmem:[#allocation8 + $0xb4] sm:$0xf0]  ;;  %v8657_v41 = vld [vmem:[#allocation8 + $0x2cc] sm:$0xf] }
 0x229   :  { %3959 = vmatpush.bf16.msra.mxu0 %v6728_v46  ;;  %3973 = vmatpush.bf16.msra.mxu1 %v7112_v35  ;;  %v7832_v46 = vor.u32 %v8927_v13, %v7831_v40  ;;  %v8711_v35 = vld [vmem:[#allocation8 + $0x474] sm:$0xf0]  ;;  %v6487_v55 = vld [vmem:[#allocation8 + $0x88] sm:$0xf] }
 0x22a   :  { %3938 = vmatmul.bf16.vlgmr.msrb.gmra.mxu2 %v9783_v50  ;;  %3952 = vmatmul.bf16.vlgmr.msrb.gmra.mxu3 %v9785_v16  ;;  %v6968_v9 = vor.u32 %v8711_v35, %v6967_v24  ;;  %v6871_v63 = vld [vmem:[#allocation8 + $0x388] sm:$0xf]  ;;  %v8687_v39 = vld [vmem:[#allocation8 + $0x3b4] sm:$0xf0]  ;;  %v6488_v32 = vor.u32 %v8591_v56, %v6487_v55  ;;  %v6729_v55 = vld [vmem:[#allocation8 + $0x298] sm:$0xf0] }
 0x22b   :  { %3986 = vmatpush.bf16.msra.mxu2 %v7544_v17  ;;  %4000 = vmatpush.bf16.msra.mxu3 %v7928_v18  ;;  %v6535_v17 = vld [vmem:[#allocation8 + $0xe8] sm:$0xf]  ;;  %v8603_v18 = vld [vmem:[#allocation8 + $0x114] sm:$0xf0]  ;;  %v8741_v56 = vld [vmem:[#allocation8 + $0x56c] sm:$0xf] }
 0x22c   :  { %v6536_v25 = vor.u32 %v8603_v18, %v6535_v17  ;;  %v7303_v5 = vld [vmem:[#allocation8 + $0x6e8] sm:$0xf]  ;;  %v8795_v1 = vld [vmem:[#allocation8 + $0x714] sm:$0xf0]  ;;  %v7161_v17 = vld [vmem:[#allocation8 + $0x5f8] sm:$0xf0] }
 0x22d   :  { %3960 = vmatpush.bf16.msra.mxu0 %v6680_v47  ;;  %3974 = vmatpush.bf16.msra.mxu1 %v7064_v45  ;;  %v8903_v47 = vld [vmem:[#allocation8 + $0xa74] sm:$0xf0]  ;;  %v6920_v45 = vor.u32 %v8699_v52, %v6919_v27  ;;  %v9917_v40 = vpop.f32.mrf.mxu2  ;;  %v9919_v13 = vpop.f32.mrf.mxu3  ;;  %v6823_v35 = vld [vmem:[#allocation8 + $0x328] sm:$0xf]  ;;  %v7304_v11 = vor.u32 %v8795_v1, %v7303_v5 }
 0x22e   :  { %v7736_v62 = vor.u32 %v8903_v47, %v7735_v49  ;;  %v8579_v24 = vld [vmem:[#allocation8 + $0x54] sm:$0xf0]  ;;  %v7255_v18 = vld [vmem:[#allocation8 + $0x688] sm:$0xf]  ;;  %v3703_v52 = vpop.f32.mrf.mxu1 }
 0x22f   :  { %3987 = vmatpush.bf16.msra.mxu2 %v7496_v42  ;;  %4001 = vmatpush.bf16.msra.mxu3 %v7880_v57  ;;  %v3689_v42 = vpop.f32.mrf.mxu0  ;;  %v7352_v57 = vor.u32 %v8807_v44, %v7351_v53  ;;  %v8675_v3 = vld [vmem:[#allocation8 + $0x354] sm:$0xf0] }
 0x230   :  { %4359 = vrot.lane.b32.xlu0 %v9915_v54, %s9515_s27  ;;  %v3690_v37 = vadd.f32 %v3689_v42, %v1459_v60  ;;  %v8879_v27 = vld [vmem:[#allocation8 + $0x9b4] sm:$0xf0]  ;;  %v6824_v44 = vor.u32 %v8675_v3, %v6823_v35  ;;  %v8945_v35 = vld [vmem:[#allocation8 + $0xbcc] sm:$0xf] }
 0x231   :  { %3961 = vmatpush.bf16.msra.mxu0 %v6632_v23  ;;  %3975 = vmatpush.bf16.msra.mxu1 %v7016_v19  ;;  %v7687_v23 = vld [vmem:[#allocation8 + $0x9e8] sm:$0xf]  ;;  %v8891_v19 = vld [vmem:[#allocation8 + $0xa14] sm:$0xf0] }
 0x232   :  { %v7688_v38 = vor.u32 %v8891_v19, %v7687_v23  ;;  %v3704_v49 = vadd.f32 %v3703_v52, %v3690_v37  ;;  %v8771_v5 = vld [vmem:[#allocation8 + $0x654] sm:$0xf0]  ;;  %v7591_v23 = vld [vmem:[#allocation8 + $0x928] sm:$0xf]  ;;  %v7929_v37 = vld [vmem:[#allocation8 + $0xbf8] sm:$0xf0] }
 0x233   :  { %3988 = vmatpush.bf16.msra.mxu2 %v7448_v48  ;;  %4002 = vmatpush.bf16.msra.mxu3 %v7832_v46  ;;  %v6872_v48 = vor.u32 %v8687_v39, %v6871_v63  ;;  %v6439_v46 = vld [vmem:[#allocation8 + $0x28] sm:$0xf]  ;;  %v7113_v63 = vld [vmem:[#allocation8 + $0x598] sm:$0xf0]  ;;  %v8867_v19 = vld [vmem:[#allocation8 + $0x954] sm:$0xf0] }
 0x234   :  { %v6440_v53 = vor.u32 %v8579_v24, %v6439_v46  ;;  %v7207_v39 = vld [vmem:[#allocation8 + $0x628] sm:$0xf]  ;;  %v7545_v24 = vld [vmem:[#allocation8 + $0x8f8] sm:$0xf0] }
 0x235   :  { %3962 = vmatpush.bf16.msra.mxu0 %v6584_v2  ;;  %3976 = vmatpush.bf16.msra.mxu1 %v6968_v9  ;;  %v6777_v2 = vld [vmem:[#allocation8 + $0x2f8] sm:$0xf0]  ;;  %v8753_v9 = vld [vmem:[#allocation8 + $0x5cc] sm:$0xf]  ;;  %v3731_v46 = vpop.f32.mrf.mxu3 }
 0x236   :  { %v6780_v47 = vor.u32 %v8657_v41, %v6777_v2  ;;  %v7208_v41 = vor.u32 %v8771_v5, %v7207_v39  ;;  %v7592_v2 = vor.u32 %v8867_v19, %v7591_v23  ;;  %v7497_v52 = vld [vmem:[#allocation8 + $0x898] sm:$0xf0]  ;;  %v8921_v39 = vld [vmem:[#allocation8 + $0xb0c] sm:$0xf]  ;;  %v1460_v23 = vperm.slane %v9886_v6, 6 }
 0x237   :  { %3989 = vmatpush.bf16.msra.mxu2 %v7400_v14  ;;  %4003 = vmatpush.bf16.msra.mxu3 %v7784_v51  ;;  %v8783_v14 = vld [vmem:[#allocation8 + $0x6b4] sm:$0xf0]  ;;  %v7639_v51 = vld [vmem:[#allocation8 + $0x988] sm:$0xf]  ;;  %v7833_v5 = vld [vmem:[#allocation8 + $0xb38] sm:$0xf0] }
 0x238   :  { %v7256_v42 = vor.u32 %v8783_v14, %v7255_v18  ;;  %v8729_v18 = vld [vmem:[#allocation8 + $0x50c] sm:$0xf]  ;;  %v7065_v14 = vld [vmem:[#allocation8 + $0x538] sm:$0xf0] }
 0x239   :  { %3963 = vmatpush.bf16.msra.mxu0 %v6536_v25  ;;  %3977 = vmatpush.bf16.msra.mxu1 %v6920_v45  ;;  %v7164_v25 = vor.u32 %v8753_v9, %v7161_v17  ;;  %v8645_v45 = vld [vmem:[#allocation8 + $0x26c] sm:$0xf]  ;;  %v6681_v17 = vld [vmem:[#allocation8 + $0x238] sm:$0xf0] }
 0x23a   :  { %v8633_v9 = vld [vmem:[#allocation8 + $0x20c] sm:$0xf] }
 0x23b   :  { %3990 = vmatpush.bf16.msra.mxu2 %v7352_v57  ;;  %4004 = vmatpush.bf16.msra.mxu3 %v7736_v62  ;;  %v7640_v57 = vor.u32 %v8879_v27, %v7639_v51  ;;  %v3717_v62 = vpop.f32.mrf.mxu2  ;;  %v8837_v51 = vld [vmem:[#allocation8 + $0x86c] sm:$0xf] }
 0x23c   :  { %v3718_v1 = vadd.f32 %v3717_v62, %v3704_v49  ;;  %v8825_v62 = vld [vmem:[#allocation8 + $0x80c] sm:$0xf] }
 0x23d   :  { %3964 = vmatpush.bf16.msra.mxu0 %v6488_v32  ;;  %3978 = vmatpush.bf16.msra.mxu1 %v6872_v48  ;;  %v8849_v32 = vld [vmem:[#allocation8 + $0x8cc] sm:$0xf]  ;;  %v3688_v48 = vadd.f32 %v9905_v22, %v1459_v60  ;;  %v7932_v60 = vor.u32 %v8945_v35, %v7929_v37  ;;  %v7836_v35 = vor.u32 %v8921_v39, %v7833_v5  ;;  %v6873_v5 = vld [vmem:[#allocation8 + $0x3b8] sm:$0xf0] }
 0x23e   :  { %v9925_v3 = vadd.f32 %v3731_v46, %v3718_v1  ;;  %v7548_v22 = vor.u32 %v8849_v32, %v7545_v24  ;;  %v6585_v46 = vld [vmem:[#allocation8 + $0x178] sm:$0xf0]  ;;  %v8705_v37 = vld [vmem:[#allocation8 + $0x44c] sm:$0xf] }
 0x23f   :  { %3991 = vmatpush.bf16.msra.mxu2 %v7304_v11  ;;  %4005 = vmatpush.bf16.msra.mxu3 %v7688_v38  ;;  %v6732_v11 = vor.u32 %v8645_v45, %v6729_v55  ;;  %v7116_v38 = vor.u32 %v8741_v56, %v7113_v63  ;;  %v3702_v27 = vadd.f32 %v9913_v61, %v3688_v48  ;;  %v8621_v45 = vld [vmem:[#allocation8 + $0x1ac] sm:$0xf]  ;;  %v6633_v55 = vld [vmem:[#allocation8 + $0x1d8] sm:$0xf0] }
 0x240   :  { %4365 = vrot.lane.b32.xlu2 %v9925_v3, %s9515_s27  ;;  %v7500_v56 = vor.u32 %v8837_v51, %v7497_v52  ;;  %v7449_v63 = vld [vmem:[#allocation8 + $0x838] sm:$0xf0]  ;;  %v6636_v19 = vor.u32 %v8621_v45, %v6633_v55  ;;  %v8609_v48 = vld [vmem:[#allocation8 + $0x14c] sm:$0xf] }
 0x241   :  { %3965 = vmatpush.bf16.msra.mxu0 %v6440_v53  ;;  %3979 = vmatpush.bf16.msra.mxu1 %v6824_v44  ;;  %v8933_v53 = vld [vmem:[#allocation8 + $0xb6c] sm:$0xf]  ;;  %v7881_v44 = vld [vmem:[#allocation8 + $0xb98] sm:$0xf0]  ;;  %v3716_v49 = vadd.f32 %v9917_v40, %v3702_v27  ;;  %v3743_v40 = vpop.f32.mrf.mxu0  ;;  %v7452_v24 = vor.u32 %v8825_v62, %v7449_v63 }
 0x242   :  { %v7884_v61 = vor.u32 %v8933_v53, %v7881_v44  ;;  %v8693_v27 = vld [vmem:[#allocation8 + $0x3ec] sm:$0xf]  ;;  %v6921_v52 = vld [vmem:[#allocation8 + $0x418] sm:$0xf0]  ;;  %v3757_v44 = vpop.f32.mrf.mxu1 }
 0x243   :  { %3992 = vmatpush.bf16.msra.mxu2 %v7256_v42  ;;  %4006 = vmatpush.bf16.msra.mxu3 %v7640_v57  ;;  %v8717_v42 = vld [vmem:[#allocation8 + $0x4ac] sm:$0xf]  ;;  %v7017_v57 = vld [vmem:[#allocation8 + $0x4d8] sm:$0xf0]  ;;  %v9936_v1 = vadd.f32 %v9919_v13, %v3716_v49  ;;  %v6924_v55 = vor.u32 %v8693_v27, %v6921_v52  ;;  %v10538_v52 = vperm.slane %v9807_v26, 2 }
 0x244   :  { %3966 = vmatmul.bf16.vlgmr.msra.gmra.mxu0 %v9777_v29  ;;  %3980 = vmatmul.bf16.vlgmr.msra.gmra.mxu1 %v9779_v59  ;;  %v7020_v32 = vor.u32 %v8717_v42, %v7017_v57  ;;  %v7401_v13 = vld [vmem:[#allocation8 + $0x7d8] sm:$0xf0]  ;;  %v8801_v53 = vld [vmem:[#allocation8 + $0x74c] sm:$0xf] }
 0x245   :  { %4014 = vmatpush.bf16.msrb.mxu0 %v6780_v47  ;;  %4028 = vmatpush.bf16.msrb.mxu1 %v7164_v25  ;;  %v6684_v47 = vor.u32 %v8633_v9, %v6681_v17  ;;  %v7068_v25 = vor.u32 %v8729_v18, %v7065_v14  ;;  %v6588_v9 = vor.u32 %v8609_v48, %v6585_v46  ;;  %v7353_v49 = vld [vmem:[#allocation8 + $0x778] sm:$0xf0]  ;;  %v8681_v42 = vld [vmem:[#allocation8 + $0x38c] sm:$0xf] }
 0x246   :  { %v3744_v18 = vadd.f32 %v3743_v40, %v1460_v23  ;;  %v7356_v63 = vor.u32 %v8801_v53, %v7353_v49  ;;  %v8789_v40 = vld [vmem:[#allocation8 + $0x6ec] sm:$0xf]  ;;  %v7641_v27 = vld [vmem:[#allocation8 + $0x9b8] sm:$0xf0]  ;;  %v3522_v53 = vadd.f32 %v9850_v0, %v10538_v52  ;;  %v1457_v0 = vperm.slane %v9886_v6, 3 }
 0x247   :  { %3993 = vmatpush.bf16.msra.mxu2 %v7208_v41  ;;  %4007 = vmatpush.bf16.msra.mxu3 %v7592_v2  ;;  %v8909_v41 = vld [vmem:[#allocation8 + $0xaac] sm:$0xf]  ;;  %v7785_v2 = vld [vmem:[#allocation8 + $0xad8] sm:$0xf0] }
 0x248   :  { %4363 = vrot.lane.b32.xlu2 %v9936_v1, %s9515_s27  ;;  %v7788_v51 = vor.u32 %v8909_v41, %v7785_v2  ;;  %v3758_v57 = vadd.f32 %v3757_v44, %v3744_v18  ;;  %v8885_v46 = vld [vmem:[#allocation8 + $0x9ec] sm:$0xf]  ;;  %v3536_v26 = vadd.f32 %v9852_v31, %v3522_v53  ;;  %v3576_v31 = vadd.f32 %v9854_v10, %v1457_v0 }
 0x249   :  { %4015 = vmatpush.bf16.msrb.mxu0 %v6732_v11  ;;  %4029 = vmatpush.bf16.msrb.mxu1 %v7116_v38  ;;  %v6969_v11 = vld [vmem:[#allocation8 + $0x478] sm:$0xf0]  ;;  %v8813_v38 = vld [vmem:[#allocation8 + $0x7ac] sm:$0xf]  ;;  %v3745_v62 = vpop.f32.mrf.mxu0 }
 0x24a   :  { %3994 = vmatmul.bf16.vlgmr.msra.gmra.mxu2 %v9783_v50  ;;  %4008 = vmatmul.bf16.vlgmr.msra.gmra.mxu3 %v9785_v16  ;;  %v6972_v17 = vor.u32 %v8705_v37, %v6969_v11  ;;  %v7404_v14 = vor.u32 %v8813_v38, %v7401_v13  ;;  %v6876_v11 = vor.u32 %v8681_v42, %v6873_v5  ;;  %v8573_v13 = vld [vmem:[#allocation8 + $0x2c] sm:$0xf] }
 0x24b   :  { %4042 = vmatpush.bf16.msrb.mxu2 %v7548_v22  ;;  %4056 = vmatpush.bf16.msrb.mxu3 %v7932_v60  ;;  %v8597_v22 = vld [vmem:[#allocation8 + $0xec] sm:$0xf]  ;;  %v6537_v60 = vld [vmem:[#allocation8 + $0x118] sm:$0xf0]  ;;  %v3746_v41 = vadd.f32 %v3745_v62, %v1460_v23  ;;  %v3759_v23 = vpop.f32.mrf.mxu1 }
 0x24c   :  { %v6540_v45 = vor.u32 %v8597_v22, %v6537_v60  ;;  %v8669_v22 = vld [vmem:[#allocation8 + $0x32c] sm:$0xf]  ;;  %v6825_v60 = vld [vmem:[#allocation8 + $0x358] sm:$0xf0] }
 0x24d   :  { %4016 = vmatpush.bf16.msrb.mxu0 %v6684_v47  ;;  %4030 = vmatpush.bf16.msrb.mxu1 %v7068_v25  ;;  %v8897_v47 = vld [vmem:[#allocation8 + $0xa4c] sm:$0xf]  ;;  %v7737_v25 = vld [vmem:[#allocation8 + $0xa78] sm:$0xf0]  ;;  %v3785_v48 = vpop.f32.mrf.mxu3  ;;  %v6828_v49 = vor.u32 %v8669_v22, %v6825_v60 }
 0x24e   :  { %v7740_v39 = vor.u32 %v8897_v47, %v7737_v25  ;;  %v8777_v18 = vld [vmem:[#allocation8 + $0x68c] sm:$0xf]  ;;  %v3760_v47 = vadd.f32 %v3759_v23, %v3746_v41  ;;  %v7593_v62 = vld [vmem:[#allocation8 + $0x958] sm:$0xf0] }
 0x24f   :  { %4043 = vmatpush.bf16.msrb.mxu2 %v7500_v56  ;;  %4057 = vmatpush.bf16.msrb.mxu3 %v7884_v61  ;;  %v8585_v56 = vld [vmem:[#allocation8 + $0x8c] sm:$0xf]  ;;  %v6489_v61 = vld [vmem:[#allocation8 + $0xb8] sm:$0xf0] }
 0x250   :  { %v6492_v37 = vor.u32 %v8585_v56, %v6489_v61  ;;  %v8765_v56 = vld [vmem:[#allocation8 + $0x62c] sm:$0xf]  ;;  %v7209_v61 = vld [vmem:[#allocation8 + $0x658] sm:$0xf0] }
 0x251   :  { %4017 = vmatpush.bf16.msrb.mxu0 %v6636_v19  ;;  %4031 = vmatpush.bf16.msrb.mxu1 %v7020_v32  ;;  %v7305_v19 = vld [vmem:[#allocation8 + $0x718] sm:$0xf0]  ;;  %v3771_v32 = vpop.f32.mrf.mxu2 }
 0x252   :  { %v7308_v38 = vor.u32 %v8789_v40, %v7305_v19  ;;  %v3550_v40 = vadd.f32 %v9856_v43, %v3536_v26  ;;  %v3590_v43 = vadd.f32 %v9860_v4, %v3576_v31 }
 0x253   :  { %4044 = vmatpush.bf16.msrb.mxu2 %v7452_v24  ;;  %4058 = vmatpush.bf16.msrb.mxu3 %v7836_v35  ;;  %v7689_v24 = vld [vmem:[#allocation8 + $0xa18] sm:$0xf0]  ;;  %v3772_v35 = vadd.f32 %v3771_v32, %v3758_v57  ;;  %v8861_v57 = vld [vmem:[#allocation8 + $0x92c] sm:$0xf] }
 0x254   :  { %v7596_v19 = vor.u32 %v8861_v57, %v7593_v62 }
 0x255   :  { %4018 = vmatpush.bf16.msrb.mxu0 %v6588_v9  ;;  %4032 = vmatpush.bf16.msrb.mxu1 %v6972_v17  ;;  %v9941_v2 = vadd.f32 %v3785_v48, %v3772_v35  ;;  %v7692_v9 = vor.u32 %v8885_v46, %v7689_v24  ;;  %v6441_v17 = vld [vmem:[#allocation8 + $0x58] sm:$0xf0] }
 0x256   :  { %v6444_v44 = vor.u32 %v8573_v13, %v6441_v17 }
 0x257   :  { %4045 = vmatpush.bf16.msrb.mxu2 %v7404_v14  ;;  %4059 = vmatpush.bf16.msrb.mxu3 %v7788_v51  ;;  %v7257_v14 = vld [vmem:[#allocation8 + $0x6b8] sm:$0xf0]  ;;  %v8873_v51 = vld [vmem:[#allocation8 + $0x98c] sm:$0xf] }
 0x258   :  { %4550 = vrot.lane.b32.xlu0 %v9941_v2, %s9515_s27  ;;  %v7260_v25 = vor.u32 %v8777_v18, %v7257_v14 }
 0x259   :  { %4019 = vmatpush.bf16.msrb.mxu0 %v6540_v45  ;;  %4033 = vmatpush.bf16.msrb.mxu1 %v6924_v55  ;;  %v7644_v45 = vor.u32 %v8873_v51, %v7641_v27  ;;  %v3773_v55 = vpop.f32.mrf.mxu2 }
 0x25a   :  { %v3774_v42 = vadd.f32 %v3773_v55, %v3760_v47  ;;  %v4173_v55 = vpop.permute.xlu1 %4172 }
 0x25b   :  { %4046 = vmatpush.bf16.msrb.mxu2 %v7356_v63  ;;  %4060 = vmatpush.bf16.msrb.mxu3 %v7740_v39  ;;  %v3787_v63 = vpop.f32.mrf.mxu3  ;;  %v7212_v39 = vor.u32 %v8765_v56, %v7209_v61 }
 0x25c   :  { %v3788_v5 = vadd.f32 %v3787_v63, %v3774_v42 }
 0x25d   :  { %4020 = vmatpush.bf16.msrb.mxu0 %v6492_v37  ;;  %4034 = vmatpush.bf16.msrb.mxu1 %v6876_v11 }
 0x25e   :  { %4552 = vrot.lane.b32.xlu2 %v3788_v5, %s9515_s27 }
 0x25f   :  { %4047 = vmatpush.bf16.msrb.mxu2 %v7308_v38  ;;  %4061 = vmatpush.bf16.msrb.mxu3 %v7692_v9 }
 0x261   :  { %4021 = vmatpush.bf16.msrb.mxu0 %v6444_v44  ;;  %4035 = vmatpush.bf16.msrb.mxu1 %v6828_v49  ;;  %v3813_v32 = vpop.f32.mrf.mxu1 }
 0x262   :  { %v4175_v26 = vpop.permute.xlu1 %4174 }
 0x263   :  { %4048 = vmatpush.bf16.msrb.mxu2 %v7260_v25  ;;  %4062 = vmatpush.bf16.msrb.mxu3 %v7644_v45 }
 0x264   :  { %4022 = vmatmul.bf16.vlgmr.msrb.gmra.mxu0 %v9777_v29  ;;  %4036 = vmatmul.bf16.vlgmr.msrb.gmra.mxu1 %v9779_v59  ;;  %v3799_v29 = vpop.f32.mrf.mxu0  ;;  %v3604_v59 = vadd.f32 %v9864_v33, %v3590_v43 }
 0x265   :  { %7933 = vmatpush.xpose.msk.msra.mxu0 %vm227_vm0, %v9890_v36  ;;  %v3564_v36 = vadd.f32 %v9858_v15, %v3550_v40 }
 0x266   :  { %v3618_v15 = vadd.f32 %v9866_v34, %v3604_v59  ;;  %v3578_v34 = vadd.f32 %v9862_v30, %v1457_v0 }
 0x267   :  { %4049 = vmatpush.bf16.msrb.mxu2 %v7212_v39  ;;  %4063 = vmatpush.bf16.msrb.mxu3 %v7596_v19  ;;  %v4076_v10 = vmul.f32 0.125, %v3564_v36 }
 0x268   :  { %v4073_v4 = vmul.f32 0.125, %v3618_v15  ;;  %v3592_v37 = vadd.f32 %v9870_v8, %v3578_v34 }
 0x269   :  { %7934 = vmatpush.xpose.msk.msra.mxu0 %vm227_vm0, %v9908_v7  ;;  %v1461_v7 = vperm.slane %v9886_v6, 7  ;;  %4548 = vrot.lane.b32.xlu2 %v4076_v10, %s9515_s27  ;;  %v3815_v24 = vpop.f32.mrf.mxu1 }
 0x26a   :  { %4050 = vmatmul.bf16.vlgmr.msrb.gmra.mxu2 %v9783_v50  ;;  %4064 = vmatmul.bf16.vlgmr.msrb.gmra.mxu3 %v9785_v16  ;;  %v3606_v13 = vadd.f32 %v9876_v28, %v3592_v37 }
 0x26c   :  { %v3801_v50 = vpop.f32.mrf.mxu0 }
 0x26d   :  { %7947 = vmatpush.xpose.msk.msrb.mxu0 %vm227_vm0, %v9925_v3  ;;  %v3800_v3 = vadd.f32 %v3799_v29, %v1461_v7  ;;  %v3827_v16 = vpop.f32.mrf.mxu2  ;;  %v3841_v33 = vpop.f32.mrf.mxu3  ;;  %v3802_v6 = vadd.f32 %v3801_v50, %v1461_v7 }
 0x26f   :  { %v3814_v48 = vadd.f32 %v3813_v32, %v3800_v3  ;;  %v3816_v35 = vadd.f32 %v3815_v24, %v3802_v6 }
 0x271   :  { %7948 = vmatpush.xpose.msk.msrb.mxu0 %vm227_vm0, %v9936_v1  ;;  %4733 = vrot.lane.b32.xlu2 %v4073_v4, %s9515_s27  ;;  %v3828_v1 = vadd.f32 %v3827_v16, %v3814_v48 }
 0x273   :  { %v3842_v46 = vadd.f32 %v3841_v33, %v3828_v1 }
 0x274   :  { %7935 = vmatmul.msk.f32.vlgmr.msra.gmra.mxu0 %vm227_vm0, %v9814_v20 }
 0x275   :  { %7961 = vmatpush.xpose.msk.msra.mxu0 %vm227_vm0, %v3788_v5  ;;  %4737 = vrot.lane.b32.xlu1 %v3842_v46, %s9515_s27  ;;  %v3829_v20 = vpop.f32.mrf.mxu2  ;;  %v3843_v38 = vpop.f32.mrf.mxu3 }
 0x276   :  { %v3830_v11 = vadd.f32 %v3829_v20, %v3816_v35 }
 0x278   :  { %v3844_v41 = vadd.f32 %v3843_v38, %v3830_v11 }
 0x279   :  { %7962 = vmatpush.xpose.msk.msra.mxu0 %vm227_vm0, %v9941_v2  ;;  %v3620_v2 = vadd.f32 %v9878_v58, %v3606_v13 }
 0x27a   :  { %4739 = vrot.lane.b32.xlu0 %v3844_v41, %s9515_s27 }
 0x27b   :  { %v4077_v9 = vmul.f32 0.125, %v3620_v2 }
 0x27c   :  { %7936 = vmatmul.msk.f32.gmra.mxu0 %vm227_vm0, %v9822_v21  ;;  %v9992_v21 = vld [vmem:[#allocation10 + $0x8] sm:$0xf] }
 0x27d   :  { %v1462_v28 = vperm.slane %v9992_v21, 0  ;;  %v1463_v61 = vperm.slane %v9992_v21, 1  ;;  %v1464_v50 = vperm.slane %v9992_v21, 2 }
 0x281   :  { %v3855_v30 = vpop.f32.mrf.mxu0  ;;  %v3869_v8 = vpop.f32.mrf.mxu1 }
 0x282   :  { %4735 = vrot.lane.b32.xlu0 %v4077_v9, %s9515_s27  ;;  %v3856_v60 = vadd.f32 %v3855_v30, %v1462_v28  ;;  %v1465_v30 = vperm.slane %v9992_v21, 3 }
 0x284   :  { %7949 = vmatmul.msk.f32.vlgmr.msrb.gmra.mxu0 %vm227_vm0, %v9915_v54  ;;  %v10539_v54 = vld [vmem:[#allocation28_spill] sm:$0xff]  ;;  %v3870_v51 = vadd.f32 %v3869_v8, %v3856_v60  ;;  %v10026_v60 = vld [vmem:[#allocation14] sm:$0xff] }
 0x285   :  { %7975 = vmatpush.xpose.msk.msrb.mxu0 %vm227_vm0, %v3844_v41 }
 0x289   :  { %7976 = vmatpush.xpose.msk.msrb.mxu0 %vm227_vm0, %v3842_v46  ;;  %v3857_v58 = vpop.f32.mrf.mxu0  ;;  %v3871_v14 = vpop.f32.mrf.mxu1 }
 0x28a   :  { %v3858_v18 = vadd.f32 %v3857_v58, %v1462_v28 }
 0x28c   :  { %7950 = vmatmul.msk.f32.gmra.mxu0 %vm227_vm0, %v9838_v12  ;;  %v3872_v27 = vadd.f32 %v3871_v14, %v3858_v18 }
 0x28d   :  { %v3883_v17 = vpop.f32.mrf.mxu2  ;;  %v3897_v22 = vpop.f32.mrf.mxu3 }
 0x28e   :  { %v3884_v53 = vadd.f32 %v3883_v17, %v3870_v51 }
 0x290   :  { %v4179_v23 = vpop.permute.xlu0 %4178  ;;  %v3898_v47 = vadd.f32 %v3897_v22, %v3884_v53 }
 0x291   :  { %7940 = vmatpush.xpose.msk.msra.mxu2 %vm227_vm0, %v4179_v23 }
 0x294   :  { %7963 = vmatmul.msk.f32.vlgmr.msra.gmra.mxu0 %vm227_vm0, %v10539_v54 }
 0x295   :  { %v3885_v52 = vpop.f32.mrf.mxu2  ;;  %v3899_v44 = vpop.f32.mrf.mxu3 }
 0x296   :  { %v3886_v12 = vadd.f32 %v3885_v52, %v3872_v27 }
 0x298   :  { %v3900_v49 = vadd.f32 %v3899_v44, %v3886_v12  ;;  %v10036_v44 = vld [vmem:[#allocation14 + $0x8] sm:$0x3] }
 0x29a   :  { %7937 = vmatpush.msk.msra.mxu1 %vm4145_vm9, %v3900_v49  ;;  %4236 = vrot.lane.b32.xlu2 %v3900_v49, %s9515_s27  ;;  %v4366_v25 = vpop.permute.xlu2 %4365  ;;  %v4177_v45 = vpop.permute.xlu0 %4176 }
 0x29b   :  { %7941 = vmatpush.xpose.msk.msra.mxu2 %vm227_vm0, %v4177_v45 }
 0x29c   :  { %7964 = vmatmul.msk.f32.gmra.mxu0 %vm227_vm0, %v4076_v10  ;;  %4164 = vmatpush.msra.mxu1 %v3898_v47 }
 0x29e   :  { %7942 = vmatmul.msk.f32.vlgmr.msra.gmra.mxu2 %vm227_vm0, %v4173_v55 }
 0x29f   :  { %7954 = vmatpush.xpose.msk.msrb.mxu2 %vm227_vm0, %v4366_v25 }
 0x2a1   :  { %v3911_v56 = vpop.f32.mrf.mxu0  ;;  %v3925_v62 = vpop.f32.mrf.mxu1 }
 0x2a2   :  { %v4364_v42 = vpop.permute.xlu2 %4363  ;;  %v3912_v57 = vadd.f32 %v3911_v56, %v1463_v61  ;;  %v4360_v29 = vpop.permute.xlu0 %4359 }
 0x2a3   :  { %7955 = vmatpush.xpose.msk.msrb.mxu2 %vm227_vm0, %v4364_v42 }
 0x2a4   :  { %7977 = vmatmul.msk.f32.vlgmr.msrb.gmra.mxu0 %vm227_vm0, %v4073_v4  ;;  %v3926_v0 = vadd.f32 %v3925_v62, %v3912_v57  ;;  %v4362_v4 = vpop.permute.xlu1 %4361 }
 0x2a6   :  { %7943 = vmatmul.msk.f32.gmra.mxu2 %vm227_vm0, %v4175_v26 }
 0x2a9   :  { %v3913_v63 = vpop.f32.mrf.mxu0  ;;  %v3927_v43 = vpop.f32.mrf.mxu1 }
 0x2aa   :  { %v3914_v19 = vadd.f32 %v3913_v63, %v1463_v61 }
 0x2ac   :  { %7978 = vmatmul.msk.f32.gmra.mxu0 %vm227_vm0, %v4077_v9  ;;  %v3928_v59 = vadd.f32 %v3927_v43, %v3914_v19  ;;  %v4547_v35 = vpop.permute.xlu1 %4546 }
 0x2ad   :  { %v3939_v39 = vpop.f32.mrf.mxu2  ;;  %v3953_v5 = vpop.f32.mrf.mxu3 }
 0x2ae   :  { %v3940_v40 = vadd.f32 %v3939_v39, %v3926_v0  ;;  %7956 = vmatmul.msk.f32.vlgmr.msrb.gmra.mxu2 %vm227_vm0, %v4360_v29 }
 0x2b0   :  { %v3954_v31 = vadd.f32 %v3953_v5, %v3940_v40 }
 0x2b2   :  { %v9101_v36 = vpack.i.bf16 %v3954_v31, %v3898_v47 }
 0x2b4   :  { %9102 = vrot.lane.b32.xlu1 %v9101_v36, %s9515_s27 }
 0x2b5   :  { %v3941_v10 = vpop.f32.mrf.mxu2  ;;  %v3955_v15 = vpop.f32.mrf.mxu3 }
 0x2b6   :  { %v3942_v7 = vadd.f32 %v3941_v10, %v3928_v59  ;;  %7957 = vmatmul.msk.f32.gmra.mxu2 %vm227_vm0, %v4362_v4 }
 0x2b8   :  { %v3956_v3 = vadd.f32 %v3955_v15, %v3942_v7  ;;  %v4553_v32 = vpop.permute.xlu2 %4552 }
 0x2b9   :  { %7968 = vmatpush.xpose.msk.msra.mxu2 %vm227_vm0, %v4553_v32 }
 0x2ba   :  { %7951 = vmatpush.msk.msrb.mxu1 %vm4145_vm9, %v3956_v3  ;;  %4423 = vrot.lane.b32.xlu0 %v3956_v3, %s9515_s27 }
 0x2bc   :  { %4351 = vmatpush.msrb.mxu1 %v3954_v31 }
 0x2c1   :  { %v3967_v48 = vpop.f32.mrf.mxu0  ;;  %v3981_v33 = vpop.f32.mrf.mxu1 }
 0x2c2   :  { %v3968_v16 = vadd.f32 %v3967_v48, %v1464_v50 }
 0x2c3   :  { %v4549_v41 = vpop.permute.xlu2 %4548 }
 0x2c4   :  { %v3982_v1 = vadd.f32 %v3981_v33, %v3968_v16 }
 0x2c9   :  { %v3969_v46 = vpop.f32.mrf.mxu0  ;;  %v3983_v37 = vpop.f32.mrf.mxu1 }
 0x2ca   :  { %v4551_v6 = vpop.permute.xlu0 %4550  ;;  %v3970_v20 = vadd.f32 %v3969_v46, %v1464_v50 }
 0x2cb   :  { %7969 = vmatpush.xpose.msk.msra.mxu2 %vm227_vm0, %v4551_v6  ;;  %v4734_v14 = vpop.permute.xlu2 %4733 }
 0x2cc   :  { %v3984_v11 = vadd.f32 %v3983_v37, %v3970_v20 }
 0x2cd   :  { %v3995_v34 = vpop.f32.mrf.mxu2 }
 0x2ce   :  { %v10017_v24 = vadd.f32 %v3995_v34, %v3982_v1  ;;  %7970 = vmatmul.msk.f32.vlgmr.msra.gmra.mxu2 %vm227_vm0, %v4547_v35 }
 0x2d5   :  { %v3997_v38 = vpop.f32.mrf.mxu2 }
 0x2d6   :  { %v10020_v13 = vadd.f32 %v3997_v38, %v3984_v11  ;;  %7971 = vmatmul.msk.f32.gmra.mxu2 %vm227_vm0, %v4549_v41 }
 0x2e1   :  { %v4023_v2 = vpop.f32.mrf.mxu0  ;;  %v4037_v8 = vpop.f32.mrf.mxu1 }
 0x2e2   :  { %v4024_v9 = vadd.f32 %v4023_v2, %v1465_v30 }
 0x2e4   :  { %v4038_v58 = vadd.f32 %v4037_v8, %v4024_v9 }
 0x2e7   :  { %v4738_v49 = vpop.permute.xlu1 %4737 }
 0x2e9   :  { %v4025_v28 = vpop.f32.mrf.mxu0  ;;  %v4039_v51 = vpop.f32.mrf.mxu1 }
 0x2ea   :  { %v4026_v54 = vadd.f32 %v4025_v28, %v1465_v30 }
 0x2ec   :  { %v4040_v52 = vadd.f32 %v4039_v51, %v4026_v54  ;;  %v4740_v12 = vpop.permute.xlu0 %4739 }
 0x2ed   :  { %v4051_v17 = vpop.f32.mrf.mxu2  ;;  %7982 = vmatpush.xpose.msk.msrb.mxu2 %vm227_vm0, %v4740_v12 }
 0x2ee   :  { %v10024_v22 = vadd.f32 %v4051_v17, %v4038_v58 }
 0x2f1   :  { %v4109_v18 = vpop.f32.mrf.mxu0  ;;  %7983 = vmatpush.xpose.msk.msrb.mxu2 %vm227_vm0, %v4738_v49 }
 0x2f2   :  { %v10029_v27 = vadd.f32 %v4109_v18, %v10026_v60 }
 0x2f4   :  { %v4116_v21 = vsel %vm4115_vm10, %v10029_v27, -inf  ;;  %v4237_v45 = vpop.permute.xlu2 %4236  ;;  %7984 = vmatmul.msk.f32.vlgmr.msrb.gmra.mxu2 %vm227_vm0, %v4734_v14  ;;  %v4736_v42 = vpop.permute.xlu0 %4735 }
 0x2f5   :  { %v4053_v53 = vpop.f32.mrf.mxu2  ;;  %4117 = vmax.xlane.f32.xlu0 %v4116_v21  ;;  %7944 = vmatpush.msk.msra.mxu3 %vm4145_vm9, %v4237_v45 }
 0x2f6   :  { %v10033_v23 = vadd.f32 %v4053_v53, %v4040_v52 }
 0x2f9   :  { %v4112_v47 = vpop.f32.mrf.mxu0 }
 0x2fa   :  { %v10040_v25 = vadd.f32 %v4112_v47, %v10036_v44 }
 0x2fc   :  { %v4120_v55 = vsel %vm4119_vm11, %v10040_v25, -inf  ;;  %7985 = vmatmul.msk.f32.gmra.mxu2 %vm227_vm0, %v4736_v42 }
 0x2fd   :  { %4121 = vmax.xlane.f32.xlu0 %v4120_v55 }
 0x301   :  { %v4299_v56 = vpop.f32.mrf.mxu0 }
 0x302   :  { %v10047_v61 = vadd.f32 %v4299_v56, %v10026_v60 }
 0x304   :  { %v4305_v57 = vsel %vm4115_vm10, %v10047_v61, -inf }
 0x305   :  { %4306 = vmax.xlane.f32.xlu0 %v4305_v57 }
 0x309   :  { %v4302_v62 = vpop.f32.mrf.mxu0 }
 0x30a   :  { %v10053_v26 = vadd.f32 %v4302_v62, %v10036_v44 }
 0x30c   :  { %v4308_v0 = vsel %vm4119_vm11, %v10053_v26, -inf }
 0x30d   :  { %4309 = vmax.xlane.f32.xlu2 %v4308_v0 }
 0x311   :  { %v4486_v63 = vpop.f32.mrf.mxu0 }
 0x312   :  { %v10058_v39 = vadd.f32 %v4486_v63, %v10026_v60 }
 0x314   :  { %v4492_v5 = vsel %vm4115_vm10, %v10058_v39, -inf }
 0x315   :  { %4493 = vmax.xlane.f32.xlu0 %v4492_v5 }
 0x319   :  { %v4489_v40 = vpop.f32.mrf.mxu0 }
 0x31a   :  { %v10063_v19 = vadd.f32 %v4489_v40, %v10036_v44 }
 0x31c   :  { %v4495_v31 = vsel %vm4119_vm11, %v10063_v19, -inf }
 0x31d   :  { %4496 = vmax.xlane.f32.xlu1 %v4495_v31 }
 0x321   :  { %v4205_v29 = vpop.f32.mrf.mxu2 }
 0x322   :  { %v4206_v59 = vadd.f32 %v4205_v29, %v10026_v60 }
 0x324   :  { %v4211_v10 = vsel %vm4115_vm10, %v4206_v59, -inf }
 0x325   :  { %4212 = vmax.xlane.f32.xlu1 %v4211_v10 }
 0x326   :  { %v9103_v36 = vpop.permute.xlu1 %9102 }
 0x327   :  { %v9104_v43 = vunpack.i.l.bf16 %v9103_v36  ;;  %v9105_v15 = vunpack.i.h.bf16 %v9103_v36 }
 0x329   :  { %4262 = vmatpush.msra.mxu3 %v9104_v43  ;;  %v4208_v3 = vpop.f32.mrf.mxu2  ;;  %v4673_v43 = vpop.f32.mrf.mxu0 }
 0x32a   :  { %v4209_v32 = vadd.f32 %v4208_v3, %v10036_v44  ;;  %v4009_v3 = vpop.f32.mrf.mxu3 }
 0x32c   :  { %v4424_v7 = vpop.permute.xlu0 %4423  ;;  %v4214_v4 = vsel %vm4119_vm11, %v4209_v32, -inf }
 0x32d   :  { %7958 = vmatpush.msk.msrb.mxu3 %vm4145_vm9, %v4424_v7  ;;  %4215 = vmax.xlane.f32.xlu2 %v4214_v4 }
 0x32f   :  { %4449 = vmatpush.msrb.mxu3 %v9105_v15 }
 0x331   :  { %v4392_v48 = vpop.f32.mrf.mxu2 }
 0x332   :  { %v4393_v50 = vadd.f32 %v4392_v48, %v10026_v60  ;;  %v4676_v48 = vpop.f32.mrf.mxu0 }
 0x334   :  { %v4398_v16 = vsel %vm4115_vm10, %v4393_v50, -inf }
 0x335   :  { %4399 = vmax.xlane.f32.xlu0 %v4398_v16  ;;  %v10130_v16 = vadd.f32 %v4676_v48, %v10036_v44 }
 0x339   :  { %v4395_v33 = vpop.f32.mrf.mxu2 }
 0x33a   :  { %v4396_v1 = vadd.f32 %v4395_v33, %v10036_v44 }
 0x33c   :  { %v4401_v6 = vsel %vm4119_vm11, %v4396_v1, -inf }
 0x33d   :  { %4402 = vmax.xlane.f32.xlu2 %v4401_v6  ;;  %v4011_v6 = vpop.f32.mrf.mxu3 }
 0x351   :  { %v4579_v46 = vpop.f32.mrf.mxu2 }
 0x352   :  { %v4580_v34 = vadd.f32 %v4579_v46, %v10026_v60  ;;  %v4682_v46 = vsel %vm4119_vm11, %v10130_v16, -inf }
 0x354   :  { %v4585_v35 = vsel %vm4115_vm10, %v4580_v34, -inf }
 0x355   :  { %4586 = vmax.xlane.f32.xlu1 %v4585_v35 }
 0x359   :  { %v4582_v20 = vpop.f32.mrf.mxu2 }
 0x35a   :  { %v10079_v37 = vadd.f32 %v4582_v20, %v10036_v44 }
 0x35c   :  { %v4588_v11 = vsel %vm4119_vm11, %v10079_v37, -inf }
 0x35d   :  { %4589 = vmax.xlane.f32.xlu2 %v4588_v11  ;;  %v4065_v11 = vpop.f32.mrf.mxu3 }
 0x368   :  { %v4118_v28 = vpop.xlane.xlu0 %4117 }
 0x369   :  { %v4123_v40 = vsub.f32 %v10029_v27, %v4118_v28  ;;  %v10157_v28 = vadd.f32 %v4009_v3, %v10017_v24 }
 0x36b   :  { %v4125_v29 = vmul.f32 1.442695, %v4123_v40 }
 0x370   :  { %v10093_v58 = vpop.xlane.xlu0 %4121 }
 0x377   :  { %v4766_v38 = vpop.f32.mrf.mxu2 }
 0x378   :  { %v10084_v41 = vadd.f32 %v4766_v38, %v10026_v60  ;;  %v10097_v54 = vpop.xlane.xlu0 %4306 }
 0x37a   :  { %v4772_v2 = vsel %vm4115_vm10, %v10084_v41, -inf }
 0x37b   :  { %4773 = vmax.xlane.f32.xlu1 %v4772_v2 }
 0x37f   :  { %v4769_v30 = vpop.f32.mrf.mxu2 }
 0x380   :  { %v10089_v9 = vadd.f32 %v4769_v30, %v10036_v44  ;;  %v10099_v18 = vpop.xlane.xlu2 %4309  ;;  %v10149_v30 = vadd.f32 %v4011_v6, %v10020_v13 }
 0x382   :  { %v4775_v8 = vsel %vm4119_vm11, %v10089_v9, -inf }
 0x383   :  { %4776 = vmax.xlane.f32.xlu1 %v4775_v8  ;;  %v10154_v8 = vadd.f32 %v4065_v11, %v10024_v22  ;;  %v4311_v22 = vsub.f32 %v10047_v61, %v10097_v54 }
 0x388   :  { %v10101_v53 = vpop.xlane.xlu0 %4493 }
 0x389   :  { %v4498_v54 = vsub.f32 %v10058_v39, %v10101_v53 }
 0x390   :  { %v10095_v17 = vpop.xlane.xlu1 %4496 }
 0x398   :  { %v4213_v14 = vpop.xlane.xlu1 %4212 }
 0x399   :  { %v4217_v51 = vsub.f32 %v4206_v59, %v4213_v14  ;;  %v10117_v59 = vadd.f32 %v4673_v43, %v10026_v60 }
 0x39b   :  { %v4219_v52 = vmul.f32 1.442695, %v4217_v51  ;;  %v4679_v7 = vsel %vm4115_vm10, %v10117_v59, -inf }
 0x39d   :  { %9135 = vpow2.f32 %v4219_v52 }
 0x3a0   :  { %v4216_v21 = vpop.xlane.xlu2 %4215 }
 0x3a1   :  { %v4218_v12 = vsub.f32 %v4209_v32, %v4216_v21 }
 0x3a3   :  { %v10103_v49 = vpop.eup %9135  ;;  %v4221_v47 = vmul.f32 1.442695, %v4218_v12 }
 0x3a4   :  { %v4223_v45 = vsel %vm4115_vm10, %v10103_v49, 0.0 }
 0x3a5   :  { %9137 = vpow2.f32 %v4221_v47  ;;  %4224 = vadd.xlane.f32.xlu2 %v4223_v45  ;;  %v4124_v47 = vsub.f32 %v10040_v25, %v10093_v58  ;;  %v4313_v45 = vmul.f32 1.442695, %v4311_v22 }
 0x3a8   :  { %v4400_v55 = vpop.xlane.xlu0 %4399 }
 0x3a9   :  { %v4404_v56 = vsub.f32 %v4393_v50, %v4400_v55 }
 0x3ab   :  { %v10107_v42 = vpop.eup %9137  ;;  %v4406_v57 = vmul.f32 1.442695, %v4404_v56  ;;  %v4127_v56 = vmul.f32 1.442695, %v4124_v47 }
 0x3ac   :  { %v4226_v62 = vsel %vm4119_vm11, %v10107_v42, 0.0 }
 0x3ad   :  { %9139 = vpow2.f32 %v4406_v57  ;;  %4227 = vadd.xlane.f32.xlu0 %v4226_v62  ;;  %v4500_v57 = vmul.f32 1.442695, %v4498_v54 }
 0x3b0   :  { %v4403_v0 = vpop.xlane.xlu2 %4402 }
 0x3b1   :  { %v4405_v63 = vsub.f32 %v4396_v1, %v4403_v0  ;;  %v4499_v0 = vsub.f32 %v10063_v19, %v10095_v17 }
 0x3b3   :  { %v10111_v5 = vpop.eup %9139  ;;  %v4408_v31 = vmul.f32 1.442695, %v4405_v63  ;;  %v4502_v53 = vmul.f32 1.442695, %v4499_v0 }
 0x3b4   :  { %v4410_v36 = vsel %vm4115_vm10, %v10111_v5, 0.0 }
 0x3b5   :  { %4411 = vadd.xlane.f32.xlu0 %v4410_v36  ;;  %9141 = vpow2.f32 %v4408_v31 }
 0x3b6   :  { %9143 = vpow2.f32 %v4125_v29 }
 0x3bb   :  { %v10119_v10 = vpop.eup %9141 }
 0x3bc   :  { %v4413_v27 = vsel %vm4119_vm11, %v10119_v10, 0.0  ;;  %v10125_v15 = vpop.eup %9143 }
 0x3bd   :  { %4680 = vmax.xlane.f32.xlu0 %v4679_v7  ;;  %4414 = vadd.xlane.f32.xlu1 %v4413_v27  ;;  %v4129_v60 = vsel %vm4115_vm10, %v10125_v15, 0.0 }
 0x3c5   :  { %4130 = vadd.xlane.f32.xlu0 %v4129_v60 }
 0x3c8   :  { %v4587_v32 = vpop.xlane.xlu1 %4586 }
 0x3c9   :  { %v4591_v4 = vsub.f32 %v4580_v34, %v4587_v32 }
 0x3cb   :  { %v4593_v50 = vmul.f32 1.442695, %v4591_v4 }
 0x3cd   :  { %9145 = vpow2.f32 %v4593_v50  ;;  %4683 = vmax.xlane.f32.xlu0 %v4682_v46 }
 0x3d0   :  { %v4590_v33 = vpop.xlane.xlu2 %4589 }
 0x3d1   :  { %v4592_v1 = vsub.f32 %v10079_v37, %v4590_v33  ;;  %v4067_v37 = vpop.f32.mrf.mxu3 }
 0x3d2   :  { %v10144_v2 = vadd.f32 %v4067_v37, %v10033_v23  ;;  %v9106_v23 = vpack.i.bf16 %v10154_v8, %v10157_v28 }
 0x3d3   :  { %v10135_v35 = vpop.eup %9145  ;;  %v4595_v34 = vmul.f32 1.442695, %v4592_v1 }
 0x3d4   :  { %v4597_v20 = vsel %vm4115_vm10, %v10135_v35, 0.0 }
 0x3d5   :  { %9147 = vpow2.f32 %v4595_v34  ;;  %4598 = vadd.xlane.f32.xlu2 %v4597_v20 }
 0x3db   :  { %v10139_v38 = vpop.eup %9147 }
 0x3dc   :  { %v4600_v44 = vsel %vm4119_vm11, %v10139_v38, 0.0 }
 0x3dd   :  { %4601 = vadd.xlane.f32.xlu1 %v4600_v44 }
 0x3e1   :  { %4797 = vrot.lane.b32.xlu0 %v10144_v2, %s9515_s27 }
 0x3ed   :  { %4610 = vrot.lane.b32.xlu2 %v10149_v30, %s9515_s27 }
 0x3ee   :  { %v4774_v14 = vpop.xlane.xlu1 %4773 }
 0x3ef   :  { %v4778_v21 = vsub.f32 %v10084_v41, %v4774_v14  ;;  %v4312_v41 = vsub.f32 %v10053_v26, %v10099_v18 }
 0x3f1   :  { %v4780_v12 = vmul.f32 1.442695, %v4778_v21  ;;  %v4315_v25 = vmul.f32 1.442695, %v4312_v41 }
 0x3f6   :  { %9107 = vrot.lane.b32.xlu1 %v9106_v23, %s9515_s27  ;;  %v4777_v51 = vpop.xlane.xlu1 %4776 }
 0x3f7   :  { %v4779_v52 = vsub.f32 %v10089_v9, %v4777_v51 }
 0x3f9   :  { %v4782_v13 = vmul.f32 1.442695, %v4779_v52 }
 0x3fb   :  { %9149 = vpow2.f32 %v4782_v13 }
 0x3fc   :  { %9151 = vpow2.f32 %v4780_v12 }
 0x3fd   :  { %9153 = vpow2.f32 %v4313_v45 }
 0x3fe   :  { %9155 = vpow2.f32 %v4127_v56 }
 0x3ff   :  { %9157 = vpow2.f32 %v4315_v25 }
 0x400   :  { %9159 = vpow2.f32 %v4500_v57 }
 0x401   :  { %v10166_v24 = vpop.eup %9149 }
 0x402   :  { %v4787_v55 = vsel %vm4119_vm11, %v10166_v24, 0.0  ;;  %v10172_v9 = vpop.eup %9151 }
 0x403   :  { %v4784_v61 = vsel %vm4115_vm10, %v10172_v9, 0.0  ;;  %v10180_v58 = vpop.eup %9153 }
 0x404   :  { %v10182_v62 = vpop.eup %9155  ;;  %v4317_v26 = vsel %vm4115_vm10, %v10180_v58, 0.0 }
 0x405   :  { %v4132_v39 = vsel %vm4119_vm11, %v10182_v62, 0.0  ;;  %v10190_v63 = vpop.eup %9157 }
 0x406   :  { %v10192_v40 = vpop.eup %9159  ;;  %v4320_v19 = vsel %vm4119_vm11, %v10190_v63, 0.0 }
 0x407   :  { %v4504_v43 = vsel %vm4115_vm10, %v10192_v40, 0.0 }
 0x40b   :  { %4788 = vadd.xlane.f32.xlu0 %v4787_v55 }
 0x416   :  { %4785 = vadd.xlane.f32.xlu2 %v4784_v61 }
 0x418   :  { %v4225_v18 = vpop.xlane.xlu2 %4224 }
 0x419   :  { %9161 = vrcp.f32 %v4225_v18 }
 0x41a   :  { %9163 = vpow2.f32 %v4502_v53  ;;  %v8103_v53 = vld [vmem:[#allocation11 + $0xe0] sm:$0xf] }
 0x41e   :  { %4318 = vadd.xlane.f32.xlu2 %v4317_v26 }
 0x41f   :  { %v9162_v31 = vpop.eup %9161 }
 0x420   :  { %4133 = vadd.xlane.f32.xlu1 %v4132_v39  ;;  %v4231_v17 = vmul.f32 %v9162_v31, %v10103_v49  ;;  %v4228_v36 = vpop.xlane.xlu0 %4227  ;;  %v10200_v29 = vpop.eup %9163  ;;  %v8982_v31 = vld [vmem:[#allocation11 + $0xec] sm:$0xf0] }
 0x421   :  { %9165 = vrcp.f32 %v4228_v36  ;;  %v4507_v27 = vsel %vm4119_vm11, %v10200_v29, 0.0 }
 0x422   :  { %7945 = vmatmul.msk.f32.vlgmr.msra.gmra.mxu3 %vm4115_vm10, %v4231_v17  ;;  %v8978_v17 = vld [vmem:[#allocation11 + $0xcc] sm:$0xf0] }
 0x426   :  { %4321 = vadd.xlane.f32.xlu2 %v4320_v19  ;;  %v8104_v19 = vor.u32 %v8982_v31, %v8103_v53 }
 0x427   :  { %v9166_v7 = vpop.eup %9165 }
 0x428   :  { %4505 = vadd.xlane.f32.xlu1 %v4504_v43  ;;  %v4412_v3 = vpop.xlane.xlu0 %4411  ;;  %v4232_v32 = vmul.f32 %v9166_v7, %v10107_v42  ;;  %5653 = vmatpush.bf16.msra.mxu0 %v8104_v19  ;;  %v8071_v7 = vld [vmem:[#allocation11 + $0xa0] sm:$0xf] }
 0x429   :  { %9167 = vrcp.f32 %v4412_v3 }
 0x42a   :  { %7946 = vmatmul.msk.f32.gmra.mxu3 %vm4115_vm10, %v4232_v32 }
 0x42e   :  { %4508 = vadd.xlane.f32.xlu2 %v4507_v27  ;;  %v8974_v27 = vld [vmem:[#allocation11 + $0xac] sm:$0xf0] }
 0x42f   :  { %v9168_v49 = vpop.eup %9167  ;;  %v8072_v3 = vor.u32 %v8974_v27, %v8071_v7 }
 0x430   :  { %v4418_v4 = vmul.f32 %v9168_v49, %v10111_v5  ;;  %v4681_v60 = vpop.xlane.xlu0 %4680  ;;  %v4415_v48 = vpop.xlane.xlu1 %4414 }
 0x431   :  { %v4685_v50 = vsub.f32 %v10117_v59, %v4681_v60  ;;  %9169 = vrcp.f32 %v4415_v48 }
 0x432   :  { %7959 = vmatmul.msk.f32.vlgmr.msrb.gmra.mxu3 %vm4115_vm10, %v4418_v4 }
 0x433   :  { %v4687_v33 = vmul.f32 1.442695, %v4685_v50 }
 0x435   :  { %9171 = vpow2.f32 %v4687_v33  ;;  %v8055_v33 = vld [vmem:[#allocation11 + $0x80] sm:$0xf] }
 0x437   :  { %v9170_v1 = vpop.eup %9169 }
 0x438   :  { %v4131_v6 = vpop.xlane.xlu0 %4130  ;;  %v4419_v42 = vmul.f32 %v9170_v1, %v10119_v10  ;;  %v8970_v1 = vld [vmem:[#allocation11 + $0x8c] sm:$0xf0] }
 0x439   :  { %9173 = vrcp.f32 %v4131_v6  ;;  %v8039_v6 = vld [vmem:[#allocation11 + $0x60] sm:$0xf] }
 0x43a   :  { %7960 = vmatmul.msk.f32.gmra.mxu3 %vm4115_vm10, %v4419_v42  ;;  %v8056_v42 = vor.u32 %v8970_v1, %v8055_v33 }
 0x43b   :  { %v10210_v46 = vpop.eup %9171 }
 0x43c   :  { %v4691_v5 = vsel %vm4115_vm10, %v10210_v46, 0.0 }
 0x43d   :  { %4692 = vadd.xlane.f32.xlu1 %v4691_v5 }
 0x43f   :  { %v9174_v34 = vpop.eup %9173 }
 0x440   :  { %v4137_v59 = vmul.f32 %v9174_v34, %v10125_v15  ;;  %v4684_v20 = vpop.xlane.xlu0 %4683  ;;  %v8023_v34 = vld [vmem:[#allocation11 + $0x40] sm:$0xf] }
 0x441   :  { %v4686_v11 = vsub.f32 %v10130_v16, %v4684_v20  ;;  %v8007_v20 = vld [vmem:[#allocation11 + $0x20] sm:$0xf] }
 0x442   :  { %7938 = vmatmul.msk.f32.vlgmr.msra.gmra.mxu1 %vm4115_vm10, %v4137_v59  ;;  %v8962_v59 = vld [vmem:[#allocation11 + $0x4c] sm:$0xf0] }
 0x443   :  { %v4689_v37 = vmul.f32 1.442695, %v4686_v11  ;;  %7965 = vmatpush.msk.msra.mxu1 %vm4145_vm9, %v10149_v30  ;;  %v8958_v11 = vld [vmem:[#allocation11 + $0x2c] sm:$0xf0] }
 0x445   :  { %9175 = vpow2.f32 %v4689_v37  ;;  %4538 = vmatpush.msra.mxu1 %v10157_v28  ;;  %v7991_v37 = vld [vmem:[#allocation11] sm:$0xf] }
 0x448   :  { %v4599_v44 = vpop.xlane.xlu2 %4598 }
 0x449   :  { %9177 = vrcp.f32 %v4599_v44  ;;  %v8008_v44 = vor.u32 %v8958_v11, %v8007_v20  ;;  %v9038_v11 = vld [vmem:[#allocation11 + $0x2ac] sm:$0xf0] }
 0x44b   :  { %v10221_v14 = vpop.eup %9175 }
 0x44c   :  { %v4694_v15 = vsel %vm4119_vm11, %v10221_v14, 0.0 }
 0x44d   :  { %4695 = vadd.xlane.f32.xlu2 %v4694_v15  ;;  %v8980_v15 = vld [vmem:[#allocation11 + $0xe4] sm:$0xf] }
 0x44f   :  { %v9178_v23 = vpop.eup %9177 }
 0x450   :  { %v4611_v10 = vpop.permute.xlu2 %4610  ;;  %v4602_v16 = vpop.xlane.xlu1 %4601  ;;  %v4605_v30 = vmul.f32 %v9178_v23, %v10135_v35 }
 0x451   :  { %7972 = vmatpush.msk.msra.mxu3 %vm4145_vm9, %v4611_v10  ;;  %9179 = vrcp.f32 %v4602_v16  ;;  %v8954_v10 = vld [vmem:[#allocation11 + $0xc] sm:$0xf0]  ;;  %v8105_v16 = vld [vmem:[#allocation11 + $0xf0] sm:$0xf0] }
 0x452   :  { %v7992_v23 = vor.u32 %v8954_v10, %v7991_v37  ;;  %v8063_v10 = vld [vmem:[#allocation11 + $0x88] sm:$0xf] }
 0x453   :  { %v4798_v13 = vpop.permute.xlu0 %4797 }
 0x457   :  { %v9180_v21 = vpop.eup %9179 }
 0x458   :  { %v4606_v12 = vmul.f32 %v9180_v21, %v10139_v38  ;;  %v8073_v21 = vld [vmem:[#allocation11 + $0xb0] sm:$0xf0] }
 0x468   :  { %v9108_v51 = vpop.permute.xlu1 %9107 }
 0x469   :  { %v9109_v52 = vunpack.i.l.bf16 %v9108_v51  ;;  %v9110_v28 = vunpack.i.h.bf16 %v9108_v51  ;;  %v8108_v51 = vor.u32 %v8980_v15, %v8105_v16  ;;  %v8215_v15 = vld [vmem:[#allocation11 + $0x1c0] sm:$0xf]  ;;  %v9010_v16 = vld [vmem:[#allocation11 + $0x1cc] sm:$0xf0] }
 0x46b   :  { %4636 = vmatpush.msra.mxu3 %v9109_v52  ;;  %v8976_v52 = vld [vmem:[#allocation11 + $0xc4] sm:$0xf] }
 0x46c   :  { %7973 = vmatmul.msk.f32.vlgmr.msra.gmra.mxu3 %vm4115_vm10, %v4605_v30  ;;  %v8089_v30 = vld [vmem:[#allocation11 + $0xd0] sm:$0xf0] }
 0x46d   :  { %7986 = vmatpush.msk.msrb.mxu3 %vm4145_vm9, %v4798_v13  ;;  %v8092_v13 = vor.u32 %v8976_v52, %v8089_v30  ;;  %v9034_v52 = vld [vmem:[#allocation11 + $0x28c] sm:$0xf0] }
 0x46f   :  { %4823 = vmatpush.msrb.mxu3 %v9110_v28  ;;  %v8972_v28 = vld [vmem:[#allocation11 + $0xa4] sm:$0xf] }
 0x474   :  { %7974 = vmatmul.msk.f32.gmra.mxu3 %vm4115_vm10, %v4606_v12 }
 0x47e   :  { %v4789_v47 = vpop.xlane.xlu0 %4788 }
 0x489   :  { %v4786_v22 = vpop.xlane.xlu2 %4785 }
 0x48a   :  { %9181 = vrcp.f32 %v4786_v22  ;;  %v8076_v22 = vor.u32 %v8972_v28, %v8073_v21  ;;  %v8047_v28 = vld [vmem:[#allocation11 + $0x68] sm:$0xf]  ;;  %v8967_v21 = vld [vmem:[#allocation11 + $0x74] sm:$0xf0] }
 0x48b   :  { %9183 = vrcp.f32 %v4789_v47  ;;  %v8968_v47 = vld [vmem:[#allocation11 + $0x84] sm:$0xf] }
 0x490   :  { %v9182_v45 = vpop.eup %9181 }
 0x491   :  { %v4792_v35 = vmul.f32 %v9182_v45, %v10172_v9  ;;  %v4319_v56 = vpop.xlane.xlu2 %4318  ;;  %v9184_v41 = vpop.eup %9183  ;;  %v8057_v45 = vld [vmem:[#allocation11 + $0x90] sm:$0xf0] }
 0x492   :  { %v4793_v61 = vmul.f32 %v9184_v41, %v10166_v24  ;;  %v8041_v41 = vld [vmem:[#allocation11 + $0x70] sm:$0xf0] }
 0x493   :  { %v4134_v55 = vpop.xlane.xlu1 %4133  ;;  %7987 = vmatmul.msk.f32.vlgmr.msrb.gmra.mxu3 %vm4115_vm10, %v4792_v35  ;;  %v8060_v35 = vor.u32 %v8968_v47, %v8057_v45  ;;  %v8295_v47 = vld [vmem:[#allocation11 + $0x260] sm:$0xf] }
 0x494   :  { %9185 = vrcp.f32 %v4134_v55 }
 0x495   :  { %9187 = vrcp.f32 %v4319_v56  ;;  %v8964_v56 = vld [vmem:[#allocation11 + $0x64] sm:$0xf] }
 0x499   :  { %v4322_v25 = vpop.xlane.xlu2 %4321 }
 0x49a   :  { %v9186_v54 = vpop.eup %9185  ;;  %9189 = vrcp.f32 %v4322_v25 }
 0x49b   :  { %7988 = vmatmul.msk.f32.gmra.mxu3 %vm4115_vm10, %v4793_v61  ;;  %v4138_v38 = vmul.f32 %v9186_v54, %v10182_v62  ;;  %v9188_v57 = vpop.eup %9187  ;;  %v4506_v0 = vpop.xlane.xlu1 %4505  ;;  %v8960_v61 = vld [vmem:[#allocation11 + $0x44] sm:$0xf]  ;;  %v8044_v54 = vor.u32 %v8964_v56, %v8041_v41  ;;  %v8048_v56 = vor.u32 %v8967_v21, %v8047_v28  ;;  %v8031_v41 = vld [vmem:[#allocation11 + $0x48] sm:$0xf]  ;;  %v9078_v28 = vld [vmem:[#allocation11 + $0x3ec] sm:$0xf0] }
 0x49c   :  { %v4325_v9 = vmul.f32 %v9188_v57, %v10180_v58  ;;  %9191 = vrcp.f32 %v4506_v0  ;;  %v8087_v58 = vld [vmem:[#allocation11 + $0xc0] sm:$0xf]  ;;  %v8956_v57 = vld [vmem:[#allocation11 + $0x24] sm:$0xf] }
 0x49d   :  { %7939 = vmatmul.msk.f32.gmra.mxu1 %vm4115_vm10, %v4138_v38  ;;  %v8088_v43 = vor.u32 %v8978_v17, %v8087_v58  ;;  %v8025_v38 = vld [vmem:[#allocation11 + $0x50] sm:$0xf0]  ;;  %v9008_v21 = vld [vmem:[#allocation11 + $0x1c4] sm:$0xf] }
 0x49e   :  { %v8028_v25 = vor.u32 %v8960_v61, %v8025_v38  ;;  %v8963_v61 = vld [vmem:[#allocation11 + $0x54] sm:$0xf0]  ;;  %v9002_v38 = vld [vmem:[#allocation11 + $0x18c] sm:$0xf0] }
 0x49f   :  { %5654 = vmatpush.bf16.msra.mxu0 %v8088_v43  ;;  %v8111_v43 = vld [vmem:[#allocation11 + $0xe8] sm:$0xf] }
 0x4a0   :  { %v9190_v24 = vpop.eup %9189 }
 0x4a1   :  { %v4326_v62 = vmul.f32 %v9190_v24, %v10190_v63  ;;  %v4509_v18 = vpop.xlane.xlu2 %4508 }
 0x4a2   :  { %v9192_v39 = vpop.eup %9191  ;;  %9193 = vrcp.f32 %v4509_v18  ;;  %v7993_v18 = vld [vmem:[#allocation11 + $0x10] sm:$0xf0] }
 0x4a3   :  { %5655 = vmatpush.bf16.msra.mxu0 %v8072_v3 }
 0x4a5   :  { %7952 = vmatmul.msk.f32.vlgmr.msrb.gmra.mxu1 %vm4115_vm10, %v4325_v9  ;;  %v4264_v26 = vpop.f32.mrf.mxu3  ;;  %v8009_v9 = vld [vmem:[#allocation11 + $0x30] sm:$0xf0] }
 0x4a6   :  { %7979 = vmatpush.msk.msrb.mxu1 %vm4145_vm9, %v10144_v2  ;;  %v4512_v2 = vmul.f32 %v9192_v39, %v10192_v40 }
 0x4a7   :  { %5656 = vmatpush.bf16.msra.mxu0 %v8056_v42 }
 0x4a8   :  { %4725 = vmatpush.msrb.mxu1 %v10154_v8  ;;  %v9194_v32 = vpop.eup %9193 }
 0x4a9   :  { %v4513_v49 = vmul.f32 %v9194_v32, %v10200_v29  ;;  %v8966_v29 = vld [vmem:[#allocation11 + $0x6c] sm:$0xf0] }
 0x4aa   :  { %v8040_v5 = vor.u32 %v8966_v29, %v8039_v6  ;;  %v8079_v29 = vld [vmem:[#allocation11 + $0xa8] sm:$0xf] }
 0x4ac   :  { %5657 = vmatpush.bf16.msra.mxu0 %v8040_v5  ;;  %v8975_v5 = vld [vmem:[#allocation11 + $0xb4] sm:$0xf0] }
 0x4ad   :  { %7953 = vmatmul.msk.f32.gmra.mxu1 %vm4115_vm10, %v4326_v62  ;;  %v4267_v36 = vpop.f32.mrf.mxu3  ;;  %v8952_v62 = vld [vmem:[#allocation11 + $0x4] sm:$0xf]  ;;  %v8080_v37 = vor.u32 %v8975_v5, %v8079_v29  ;;  %v8977_v29 = vld [vmem:[#allocation11 + $0xcc] sm:$0xf]  ;;  %v8097_v5 = vld [vmem:[#allocation11 + $0xd8] sm:$0xf0] }
 0x4ae   :  { %v9116_v8 = vpack.i.bf16 %v4267_v36, %v4264_v26  ;;  %v8012_v26 = vor.u32 %v8956_v57, %v8009_v9  ;;  %v7996_v39 = vor.u32 %v8952_v62, %v7993_v18  ;;  %v9046_v36 = vld [vmem:[#allocation11 + $0x2ec] sm:$0xf0]  ;;  %v8959_v62 = vld [vmem:[#allocation11 + $0x34] sm:$0xf0]  ;;  %v8167_v18 = vld [vmem:[#allocation11 + $0x160] sm:$0xf] }
 0x4af   :  { %v9026_v9 = vld [vmem:[#allocation11 + $0x24c] sm:$0xf0] }
 0x4b0   :  { %9117 = vrot.lane.b32.xlu2 %v9116_v8, %s9515_s27  ;;  %v4693_v63 = vpop.xlane.xlu1 %4692  ;;  %v8983_v8 = vld [vmem:[#allocation11 + $0xf4] sm:$0xf0] }
 0x4b1   :  { %9195 = vrcp.f32 %v4693_v63 }
 0x4b5   :  { %7966 = vmatmul.msk.f32.vlgmr.msra.gmra.mxu1 %vm4115_vm10, %v4512_v2  ;;  %v8359_v2 = vld [vmem:[#allocation11 + $0x2e0] sm:$0xf] }
 0x4b6   :  { %v8360_v7 = vor.u32 %v9046_v36, %v8359_v2  ;;  %v8955_v36 = vld [vmem:[#allocation11 + $0x14] sm:$0xf0] }
 0x4b7   :  { %v9196_v40 = vpop.eup %9195 }
 0x4b8   :  { %v4699_v4 = vmul.f32 %v9196_v40, %v10210_v46  ;;  %v8024_v46 = vor.u32 %v8962_v59, %v8023_v34  ;;  %5681 = vmatpush.bf16.msra.mxu2 %v8360_v7  ;;  %v8095_v40 = vld [vmem:[#allocation11 + $0xc8] sm:$0xf]  ;;  %v8231_v34 = vld [vmem:[#allocation11 + $0x1e0] sm:$0xf]  ;;  %v9014_v59 = vld [vmem:[#allocation11 + $0x1ec] sm:$0xf0] }
 0x4b9   :  { %v8232_v20 = vor.u32 %v9014_v59, %v8231_v34  ;;  %v8151_v7 = vld [vmem:[#allocation11 + $0x140] sm:$0xf]  ;;  %v8345_v59 = vld [vmem:[#allocation11 + $0x2d0] sm:$0xf0] }
 0x4ba   :  { %5658 = vmatpush.bf16.msra.mxu0 %v8024_v46  ;;  %v8327_v46 = vld [vmem:[#allocation11 + $0x2a0] sm:$0xf] }
 0x4bb   :  { %5667 = vmatpush.bf16.msra.mxu1 %v8232_v20  ;;  %v8973_v20 = vld [vmem:[#allocation11 + $0xac] sm:$0xf] }
 0x4bd   :  { %7967 = vmatmul.msk.f32.gmra.mxu1 %vm4115_vm10, %v4513_v49  ;;  %v8112_v49 = vor.u32 %v8983_v8, %v8111_v43  ;;  %v8981_v43 = vld [vmem:[#allocation11 + $0xec] sm:$0xf]  ;;  %v8113_v8 = vld [vmem:[#allocation11 + $0xf8] sm:$0xf0] }
 0x4be   :  { %5659 = vmatpush.bf16.msra.mxu0 %v8008_v44  ;;  %v8328_v44 = vor.u32 %v9038_v11, %v8327_v46  ;;  %v8081_v11 = vld [vmem:[#allocation11 + $0xb8] sm:$0xf0] }
 0x4bf   :  { %v4166_v31 = vpop.f32.mrf.mxu1 }
 0x4c0   :  { %v4696_v60 = vpop.xlane.xlu2 %4695 }
 0x4c1   :  { %9197 = vrcp.f32 %v4696_v60  ;;  %v8979_v60 = vld [vmem:[#allocation11 + $0xd4] sm:$0xf0] }
 0x4c2   :  { %5660 = vmatpush.bf16.msra.mxu0 %v7992_v23  ;;  %v8096_v42 = vor.u32 %v8979_v60, %v8095_v40  ;;  %v8311_v23 = vld [vmem:[#allocation11 + $0x280] sm:$0xf]  ;;  %v8361_v40 = vld [vmem:[#allocation11 + $0x2f0] sm:$0xf0] }
 0x4c3   :  { %v8312_v30 = vor.u32 %v9034_v52, %v8311_v23  ;;  %v9036_v23 = vld [vmem:[#allocation11 + $0x2a4] sm:$0xf] }
 0x4c5   :  { %7980 = vmatmul.msk.f32.vlgmr.msrb.gmra.mxu1 %vm4115_vm10, %v4699_v4 }
 0x4c6   :  { %5709 = vmatpush.bf16.msrb.mxu0 %v8108_v51  ;;  %v8216_v51 = vor.u32 %v9010_v16, %v8215_v15  ;;  %v8233_v16 = vld [vmem:[#allocation11 + $0x1f0] sm:$0xf0] }
 0x4c7   :  { %v9198_v48 = vpop.eup %9197 }
 0x4c8   :  { %v4700_v50 = vmul.f32 %v9198_v48, %v10221_v14  ;;  %v4451_v14 = vpop.f32.mrf.mxu3  ;;  %v8343_v48 = vld [vmem:[#allocation11 + $0x2c0] sm:$0xf]  ;;  %5668 = vmatpush.bf16.msra.mxu1 %v8216_v51  ;;  %v8329_v51 = vld [vmem:[#allocation11 + $0x2b0] sm:$0xf0] }
 0x4ca   :  { %5710 = vmatpush.bf16.msrb.mxu0 %v8092_v13 }
 0x4cd   :  { %7981 = vmatmul.msk.f32.gmra.mxu1 %vm4115_vm10, %v4700_v50  ;;  %v9042_v50 = vld [vmem:[#allocation11 + $0x2cc] sm:$0xf0] }
 0x4ce   :  { %5711 = vmatpush.bf16.msrb.mxu0 %v8076_v22  ;;  %v8344_v33 = vor.u32 %v9042_v50, %v8343_v48  ;;  %v9006_v22 = vld [vmem:[#allocation11 + $0x1ac] sm:$0xf0] }
 0x4d0   :  { %v4454_v12 = vpop.f32.mrf.mxu3  ;;  %5682 = vmatpush.bf16.msra.mxu2 %v8344_v33  ;;  %v8116_v33 = vor.u32 %v8981_v43, %v8113_v8  ;;  %v8281_v43 = vld [vmem:[#allocation11 + $0x250] sm:$0xf0]  ;;  %v8439_v8 = vld [vmem:[#allocation11 + $0x380] sm:$0xf] }
 0x4d1   :  { %v9126_v53 = vpack.i.bf16 %v4454_v12, %v4451_v14  ;;  %v8971_v14 = vld [vmem:[#allocation11 + $0x94] sm:$0xf0]  ;;  %v8199_v12 = vld [vmem:[#allocation11 + $0x1a0] sm:$0xf] }
 0x4d2   :  { %5712 = vmatpush.bf16.msrb.mxu0 %v8060_v35  ;;  %v8064_v13 = vor.u32 %v8971_v14, %v8063_v10  ;;  %v8200_v45 = vor.u32 %v9006_v22, %v8199_v12  ;;  %v9030_v35 = vld [vmem:[#allocation11 + $0x26c] sm:$0xf0]  ;;  %v9012_v10 = vld [vmem:[#allocation11 + $0x1e4] sm:$0xf]  ;;  %v8100_v14 = vor.u32 %v8977_v29, %v8097_v5  ;;  %v8217_v22 = vld [vmem:[#allocation11 + $0x1d0] sm:$0xf0] }
 0x4d3   :  { %v8236_v52 = vor.u32 %v9012_v10, %v8233_v16  ;;  %v8996_v29 = vld [vmem:[#allocation11 + $0x164] sm:$0xf]  ;;  %v8169_v5 = vld [vmem:[#allocation11 + $0x170] sm:$0xf0] }
 0x4d4   :  { %5683 = vmatpush.bf16.msra.mxu2 %v8328_v44  ;;  %5669 = vmatpush.bf16.msra.mxu1 %v8200_v45  ;;  %v8119_v44 = vld [vmem:[#allocation11 + $0x100] sm:$0xf]  ;;  %v8313_v45 = vld [vmem:[#allocation11 + $0x290] sm:$0xf0]  ;;  %v8992_v10 = vld [vmem:[#allocation11 + $0x144] sm:$0xf] }
 0x4d6   :  { %5713 = vmatpush.bf16.msrb.mxu0 %v8044_v54  ;;  %v8183_v54 = vld [vmem:[#allocation11 + $0x180] sm:$0xf] }
 0x4d7   :  { %v8184_v57 = vor.u32 %v9002_v38, %v8183_v54  ;;  %v8220_v54 = vor.u32 %v9008_v21, %v8217_v22  ;;  %v8988_v21 = vld [vmem:[#allocation11 + $0x124] sm:$0xf] }
 0x4d8   :  { %5684 = vmatpush.bf16.msra.mxu2 %v8312_v30  ;;  %v8332_v30 = vor.u32 %v9036_v23, %v8329_v51  ;;  %v8249_v23 = vld [vmem:[#allocation11 + $0x210] sm:$0xf0] }
 0x4d9   :  { %5670 = vmatpush.bf16.msra.mxu1 %v8184_v57  ;;  %v9004_v57 = vld [vmem:[#allocation11 + $0x1a4] sm:$0xf] }
 0x4da   :  { %5714 = vmatpush.bf16.msrb.mxu0 %v8028_v25  ;;  %v8279_v25 = vld [vmem:[#allocation11 + $0x240] sm:$0xf] }
 0x4de   :  { %5715 = vmatpush.bf16.msrb.mxu0 %v8012_v26  ;;  %v8015_v26 = vld [vmem:[#allocation11 + $0x28] sm:$0xf] }
 0x4df   :  { %v8016_v2 = vor.u32 %v8959_v62, %v8015_v26  ;;  %v8455_v26 = vld [vmem:[#allocation11 + $0x3a0] sm:$0xf]  ;;  %v9070_v62 = vld [vmem:[#allocation11 + $0x3ac] sm:$0xf0] }
 0x4e2   :  { %5716 = vmatpush.bf16.msrb.mxu0 %v7996_v39  ;;  %v8998_v39 = vld [vmem:[#allocation11 + $0x16c] sm:$0xf0] }
 0x4ef   :  { %v4638_v55 = vpop.f32.mrf.mxu3 }
 0x4f7   :  { %v4641_v0 = vpop.f32.mrf.mxu3 }
 0x4f8   :  { %v9111_v24 = vpack.i.bf16 %v4641_v0, %v4638_v55  ;;  %v8296_v55 = vor.u32 %v9030_v35, %v8295_v47  ;;  %v8280_v0 = vor.u32 %v9026_v9, %v8279_v25  ;;  %v9032_v47 = vld [vmem:[#allocation11 + $0x284] sm:$0xf]  ;;  %v8471_v35 = vld [vmem:[#allocation11 + $0x3c0] sm:$0xf]  ;;  %v8201_v9 = vld [vmem:[#allocation11 + $0x1b0] sm:$0xf0] }
 0x4f9   :  { %v8316_v38 = vor.u32 %v9032_v47, %v8313_v45  ;;  %v8391_v47 = vld [vmem:[#allocation11 + $0x320] sm:$0xf]  ;;  %v9054_v45 = vld [vmem:[#allocation11 + $0x32c] sm:$0xf0] }
 0x4fa   :  { %9112 = vrot.lane.b32.xlu1 %v9111_v24, %s9515_s27  ;;  %5685 = vmatpush.bf16.msra.mxu2 %v8296_v55  ;;  %v8032_v24 = vor.u32 %v8963_v61, %v8031_v41  ;;  %v9074_v55 = vld [vmem:[#allocation11 + $0x3cc] sm:$0xf0]  ;;  %v8969_v41 = vld [vmem:[#allocation11 + $0x8c] sm:$0xf]  ;;  %v8065_v61 = vld [vmem:[#allocation11 + $0x98] sm:$0xf0] }
 0x4fb   :  { %v8472_v25 = vor.u32 %v9074_v55, %v8471_v35  ;;  %v8392_v55 = vor.u32 %v9054_v45, %v8391_v47  ;;  %v8207_v45 = vld [vmem:[#allocation11 + $0x1a8] sm:$0xf] }
 0x4fe   :  { %5686 = vmatpush.bf16.msra.mxu2 %v8280_v0  ;;  %v9028_v0 = vld [vmem:[#allocation11 + $0x264] sm:$0xf] }
 0x502   :  { %9127 = vrot.lane.b32.xlu1 %v9126_v53, %s9515_s27  ;;  %v8263_v53 = vld [vmem:[#allocation11 + $0x220] sm:$0xf] }
 0x50a   :  { %v9118_v58 = vpop.permute.xlu2 %9117 }
 0x50b   :  { %v9119_v17 = vunpack.i.l.bf16 %v9118_v58  ;;  %v9120_v27 = vunpack.i.h.bf16 %v9118_v58  ;;  %v9022_v58 = vld [vmem:[#allocation11 + $0x22c] sm:$0xf0] }
 0x50d   :  { %v4863_v3 = vsel %vm227_vm0, %v4166_v31, %v9119_v17  ;;  %v8168_v31 = vor.u32 %v8998_v39, %v8167_v18  ;;  %v8264_v17 = vor.u32 %v9022_v58, %v8263_v53  ;;  %v8068_v18 = vor.u32 %v8969_v41, %v8065_v61  ;;  %v8965_v39 = vld [vmem:[#allocation11 + $0x6c] sm:$0xf]  ;;  %v8049_v53 = vld [vmem:[#allocation11 + $0x78] sm:$0xf0]  ;;  %v8121_v41 = vld [vmem:[#allocation11 + $0x110] sm:$0xf0] }
 0x50f   :  { %5671 = vmatpush.bf16.msra.mxu1 %v8168_v31  ;;  %5687 = vmatpush.bf16.msra.mxu2 %v8264_v17  ;;  %v8204_v31 = vor.u32 %v9004_v57, %v8201_v9  ;;  %v9000_v17 = vld [vmem:[#allocation11 + $0x184] sm:$0xf]  ;;  %v8489_v9 = vld [vmem:[#allocation11 + $0x3f0] sm:$0xf0] }
 0x516   :  { %v4825_v19 = vpop.f32.mrf.mxu3 }
 0x51a   :  { %v4169_v63 = vpop.f32.mrf.mxu1 }
 0x51b   :  { %v4864_v32 = vsel %vm227_vm0, %v4169_v63, %v9120_v27  ;;  %v8994_v27 = vld [vmem:[#allocation11 + $0x14c] sm:$0xf0]  ;;  %v8247_v63 = vld [vmem:[#allocation11 + $0x200] sm:$0xf] }
 0x51c   :  { %v10257_v4 = vpack.c.bf16 %v4864_v32, %v4863_v3  ;;  %v8152_v3 = vor.u32 %v8994_v27, %v8151_v7  ;;  %v9018_v32 = vld [vmem:[#allocation11 + $0x20c] sm:$0xf0]  ;;  %v8052_v27 = vor.u32 %v8965_v39, %v8049_v53  ;;  %v8457_v53 = vld [vmem:[#allocation11 + $0x3b0] sm:$0xf0] }
 0x51d   :  { %v8248_v60 = vor.u32 %v9018_v32, %v8247_v63  ;;  %v9066_v7 = vld [vmem:[#allocation11 + $0x38c] sm:$0xf0]  ;;  %v8033_v32 = vld [vmem:[#allocation11 + $0x58] sm:$0xf0] }
 0x51e   :  { %v4828_v1 = vpop.f32.mrf.mxu3  ;;  %5661 = vmatmul.bf16.vlgmr.msra.gmra.mxu0 %v10257_v4  ;;  %5672 = vmatpush.bf16.msra.mxu1 %v8152_v3  ;;  %v8961_v3 = vld [vmem:[#allocation11 + $0x4c] sm:$0xf] }
 0x51f   :  { %v9121_v6 = vpack.i.bf16 %v4828_v1, %v4825_v19  ;;  %5765 = vmatpush.bf16.msra.mxu0 %v8112_v49  ;;  %v7999_v19 = vld [vmem:[#allocation11 + $0x8] sm:$0xf]  ;;  %v9044_v49 = vld [vmem:[#allocation11 + $0x2e4] sm:$0xf]  ;;  %5688 = vmatpush.bf16.msra.mxu2 %v8248_v60  ;;  %v8135_v1 = vld [vmem:[#allocation11 + $0x120] sm:$0xf]  ;;  %v8036_v60 = vor.u32 %v8961_v3, %v8033_v32 }
 0x520   :  { %v8364_v48 = vor.u32 %v9044_v49, %v8361_v40  ;;  %v8000_v50 = vor.u32 %v8955_v36, %v7999_v19  ;;  %v8456_v19 = vor.u32 %v9070_v62, %v8455_v26  ;;  %v9024_v36 = vld [vmem:[#allocation11 + $0x244] sm:$0xf]  ;;  %v8440_v40 = vor.u32 %v9066_v7, %v8439_v8  ;;  %v8473_v26 = vld [vmem:[#allocation11 + $0x3d0] sm:$0xf0] }
 0x521   :  { %9122 = vrot.lane.b32.xlu0 %v9121_v6, %s9515_s27  ;;  %v8990_v6 = vld [vmem:[#allocation11 + $0x12c] sm:$0xf0]  ;;  %v8284_v49 = vor.u32 %v9024_v36, %v8281_v43  ;;  %v8367_v36 = vld [vmem:[#allocation11 + $0x2e8] sm:$0xf]  ;;  %v9047_v43 = vld [vmem:[#allocation11 + $0x2f4] sm:$0xf0] }
 0x522   :  { %v8136_v34 = vor.u32 %v8990_v6, %v8135_v1  ;;  %v8001_v1 = vld [vmem:[#allocation11 + $0x18] sm:$0xf0]  ;;  %v10263_v6 = vpop.f32.mrf.mxu1  ;;  %v8425_v8 = vld [vmem:[#allocation11 + $0x370] sm:$0xf0] }
 0x523   :  { %5766 = vmatpush.bf16.msra.mxu0 %v8096_v42  ;;  %v9040_v42 = vld [vmem:[#allocation11 + $0x2c4] sm:$0xf]  ;;  %5737 = vmatpush.bf16.msrb.mxu2 %v8364_v48  ;;  %v8957_v48 = vld [vmem:[#allocation11 + $0x2c] sm:$0xf] }
 0x524   :  { %v8348_v46 = vor.u32 %v9040_v42, %v8345_v59  ;;  %5673 = vmatpush.bf16.msra.mxu1 %v8136_v34  ;;  %v9020_v34 = vld [vmem:[#allocation11 + $0x224] sm:$0xf]  ;;  %v8172_v59 = vor.u32 %v8996_v29, %v8169_v5  ;;  %v8239_v5 = vld [vmem:[#allocation11 + $0x1e8] sm:$0xf] }
 0x527   :  { %5767 = vmatpush.bf16.msra.mxu0 %v8080_v37  ;;  %v8986_v37 = vld [vmem:[#allocation11 + $0x10c] sm:$0xf0]  ;;  %5738 = vmatpush.bf16.msrb.mxu2 %v8348_v46  ;;  %v8265_v46 = vld [vmem:[#allocation11 + $0x230] sm:$0xf0] }
 0x528   :  { %v8120_v15 = vor.u32 %v8986_v37, %v8119_v44  ;;  %v8268_v44 = vor.u32 %v9020_v34, %v8265_v46  ;;  %v8335_v46 = vld [vmem:[#allocation11 + $0x2a8] sm:$0xf] }
 0x52a   :  { %5674 = vmatpush.bf16.msra.mxu1 %v8120_v15  ;;  %v9016_v15 = vld [vmem:[#allocation11 + $0x204] sm:$0xf]  ;;  %v4356_v35 = vpop.f32.mrf.mxu1 }
 0x52b   :  { %5768 = vmatpush.bf16.msra.mxu0 %v8064_v13  ;;  %v8487_v13 = vld [vmem:[#allocation11 + $0x3e0] sm:$0xf]  ;;  %5739 = vmatpush.bf16.msrb.mxu2 %v8332_v30 }
 0x52c   :  { %v8488_v12 = vor.u32 %v9078_v28, %v8487_v13  ;;  %v8407_v30 = vld [vmem:[#allocation11 + $0x340] sm:$0xf]  ;;  %v9058_v13 = vld [vmem:[#allocation11 + $0x34c] sm:$0xf0] }
 0x52d   :  { %v8408_v28 = vor.u32 %v9058_v13, %v8407_v30  ;;  %v9011_v30 = vld [vmem:[#allocation11 + $0x1d4] sm:$0xf0]  ;;  %v8319_v13 = vld [vmem:[#allocation11 + $0x288] sm:$0xf] }
 0x52e   :  { %5717 = vmatmul.bf16.vlgmr.msrb.gmra.mxu0 %v10257_v4  ;;  %5723 = vmatpush.bf16.msrb.mxu1 %v8236_v52  ;;  %v8252_v52 = vor.u32 %v9016_v15, %v8249_v23  ;;  %v9052_v23 = vld [vmem:[#allocation11 + $0x324] sm:$0xf] }
 0x52f   :  { %5769 = vmatpush.bf16.msra.mxu0 %v8048_v56  ;;  %v8084_v56 = vor.u32 %v8973_v20, %v8081_v11  ;;  %5695 = vmatpush.bf16.msra.mxu3 %v8488_v12  ;;  %v8423_v20 = vld [vmem:[#allocation11 + $0x360] sm:$0xf]  ;;  %v9062_v11 = vld [vmem:[#allocation11 + $0x36c] sm:$0xf0]  ;;  %v8137_v12 = vld [vmem:[#allocation11 + $0x130] sm:$0xf0] }
 0x530   :  { %5740 = vmatpush.bf16.msrb.mxu2 %v8316_v38  ;;  %v8424_v37 = vor.u32 %v9062_v11, %v8423_v20  ;;  %v8140_v22 = vor.u32 %v8988_v21, %v8137_v12  ;;  %v9050_v38 = vld [vmem:[#allocation11 + $0x30c] sm:$0xf0]  ;;  %v9039_v20 = vld [vmem:[#allocation11 + $0x2b4] sm:$0xf0]  ;;  %v9048_v12 = vld [vmem:[#allocation11 + $0x304] sm:$0xf] }
 0x531   :  { %v8336_v15 = vor.u32 %v9039_v20, %v8335_v46  ;;  %v8495_v46 = vld [vmem:[#allocation11 + $0x3e8] sm:$0xf]  ;;  %v9079_v20 = vld [vmem:[#allocation11 + $0x3f4] sm:$0xf0] }
 0x532   :  { %5724 = vmatpush.bf16.msrb.mxu1 %v8220_v54  ;;  %v8375_v54 = vld [vmem:[#allocation11 + $0x300] sm:$0xf]  ;;  %v4540_v39 = vpop.f32.mrf.mxu1 }
 0x533   :  { %5770 = vmatpush.bf16.msra.mxu0 %v8032_v24  ;;  %v8297_v24 = vld [vmem:[#allocation11 + $0x270] sm:$0xf0]  ;;  %5696 = vmatpush.bf16.msra.mxu3 %v8472_v25  ;;  %v9076_v25 = vld [vmem:[#allocation11 + $0x3e4] sm:$0xf]  ;;  %v8376_v57 = vor.u32 %v9050_v38, %v8375_v54  ;;  %v8191_v38 = vld [vmem:[#allocation11 + $0x188] sm:$0xf] }
 0x534   :  { %v8300_v58 = vor.u32 %v9028_v0, %v8297_v24  ;;  %v8492_v0 = vor.u32 %v9076_v25, %v8489_v9  ;;  %v9072_v24 = vld [vmem:[#allocation11 + $0x3c4] sm:$0xf]  ;;  %v9003_v25 = vld [vmem:[#allocation11 + $0x194] sm:$0xf0] }
 0x535   :  { %v8476_v62 = vor.u32 %v9072_v24, %v8473_v26  ;;  %v9027_v9 = vld [vmem:[#allocation11 + $0x254] sm:$0xf0]  ;;  %v8175_v26 = vld [vmem:[#allocation11 + $0x168] sm:$0xf] }
 0x536   :  { %5725 = vmatpush.bf16.msrb.mxu1 %v8204_v31  ;;  %5741 = vmatpush.bf16.msrb.mxu2 %v8300_v58  ;;  %v9064_v31 = vld [vmem:[#allocation11 + $0x384] sm:$0xf]  ;;  %v8441_v58 = vld [vmem:[#allocation11 + $0x390] sm:$0xf0] }
 0x537   :  { %5771 = vmatpush.bf16.msra.mxu0 %v8016_v2  ;;  %v8185_v2 = vld [vmem:[#allocation11 + $0x190] sm:$0xf0]  ;;  %5697 = vmatpush.bf16.msra.mxu3 %v8456_v19  ;;  %v8444_v19 = vor.u32 %v9064_v31, %v8441_v58  ;;  %v8159_v31 = vld [vmem:[#allocation11 + $0x148] sm:$0xf]  ;;  %v8995_v58 = vld [vmem:[#allocation11 + $0x154] sm:$0xf0] }
 0x538   :  { %v8188_v63 = vor.u32 %v9000_v17, %v8185_v2  ;;  %v9060_v17 = vld [vmem:[#allocation11 + $0x364] sm:$0xf] }
 0x539   :  { %v8428_v3 = vor.u32 %v9060_v17, %v8425_v8  ;;  %v9019_v17 = vld [vmem:[#allocation11 + $0x214] sm:$0xf0] }
 0x53a   :  { %5726 = vmatpush.bf16.msrb.mxu1 %v8188_v63  ;;  %5742 = vmatpush.bf16.msrb.mxu2 %v8284_v49  ;;  %v4543_v63 = vpop.f32.mrf.mxu1 }
 0x53b   :  { %5772 = vmatpush.bf16.msra.mxu0 %v8000_v50  ;;  %v8017_v50 = vld [vmem:[#allocation11 + $0x38] sm:$0xf0]  ;;  %5698 = vmatpush.bf16.msra.mxu3 %v8440_v40  ;;  %v8368_v40 = vor.u32 %v9047_v43, %v8367_v36  ;;  %v8160_v43 = vor.u32 %v8995_v58, %v8159_v31  ;;  %v9021_v58 = vld [vmem:[#allocation11 + $0x22c] sm:$0xf] }
 0x53c   :  { %v8020_v42 = vor.u32 %v8957_v48, %v8017_v50  ;;  %v9043_v50 = vld [vmem:[#allocation11 + $0x2d4] sm:$0xf0]  ;;  %v8369_v36 = vld [vmem:[#allocation11 + $0x2f8] sm:$0xf0] }
 0x53d   :  { %v8177_v31 = vld [vmem:[#allocation11 + $0x178] sm:$0xf0] }
 0x53e   :  { %5773 = vmatmul.bf16.vlgmr.msra.gmra.mxu0 %v10257_v4  ;;  %5727 = vmatpush.bf16.msrb.mxu1 %v8172_v59  ;;  %v9015_v59 = vld [vmem:[#allocation11 + $0x1f4] sm:$0xf0] }
 0x53f   :  { %5821 = vmatpush.bf16.msrb.mxu0 %v8116_v33  ;;  %v8953_v33 = vld [vmem:[#allocation11 + $0xc] sm:$0xf]  ;;  %5743 = vmatpush.bf16.msrb.mxu2 %v8268_v44 }
 0x540   :  { %v8004_v51 = vor.u32 %v8953_v33, %v8001_v1  ;;  %5699 = vmatpush.bf16.msra.mxu3 %v8424_v37  ;;  %v9056_v33 = vld [vmem:[#allocation11 + $0x344] sm:$0xf]  ;;  %v8409_v1 = vld [vmem:[#allocation11 + $0x350] sm:$0xf0] }
 0x543   :  { %5822 = vmatpush.bf16.msrb.mxu0 %v8100_v14  ;;  %v8153_v14 = vld [vmem:[#allocation11 + $0x150] sm:$0xf0]  ;;  %5744 = vmatpush.bf16.msrb.mxu2 %v8252_v52 }
 0x544   :  { %v8156_v16 = vor.u32 %v8992_v10, %v8153_v14  ;;  %5700 = vmatpush.bf16.msra.mxu3 %v8408_v28  ;;  %v8240_v14 = vor.u32 %v9015_v59, %v8239_v5  ;;  %v9035_v28 = vld [vmem:[#allocation11 + $0x294] sm:$0xf0]  ;;  %v8337_v5 = vld [vmem:[#allocation11 + $0x2b8] sm:$0xf0] }
 0x545   :  { %v8320_v47 = vor.u32 %v9035_v28, %v8319_v13  ;;  %v8496_v28 = vor.u32 %v9079_v20, %v8495_v46  ;;  %v8129_v46 = vld [vmem:[#allocation11 + $0x118] sm:$0xf0] }
 0x546   :  { %5728 = vmatpush.bf16.msrb.mxu1 %v8156_v16  ;;  %v8223_v16 = vld [vmem:[#allocation11 + $0x1c8] sm:$0xf] }
 0x547   :  { %5823 = vmatpush.bf16.msrb.mxu0 %v8084_v56  ;;  %v8984_v56 = vld [vmem:[#allocation11 + $0x104] sm:$0xf] }
 0x548   :  { %v8124_v61 = vor.u32 %v8984_v56, %v8121_v41  ;;  %5701 = vmatpush.bf16.msra.mxu3 %v8392_v55  ;;  %v9007_v55 = vld [vmem:[#allocation11 + $0x1b4] sm:$0xf0]  ;;  %v8303_v56 = vld [vmem:[#allocation11 + $0x268] sm:$0xf] }
 0x549   :  { %v9031_v41 = vld [vmem:[#allocation11 + $0x274] sm:$0xf0] }
 0x54a   :  { %5729 = vmatpush.bf16.msrb.mxu1 %v8140_v22  ;;  %v8377_v22 = vld [vmem:[#allocation11 + $0x310] sm:$0xf0]  ;;  %v8304_v54 = vor.u32 %v9031_v41, %v8303_v56  ;;  %v8305_v56 = vld [vmem:[#allocation11 + $0x278] sm:$0xf0] }
 0x54b   :  { %5824 = vmatpush.bf16.msrb.mxu0 %v8068_v18  ;;  %v9068_v18 = vld [vmem:[#allocation11 + $0x3a4] sm:$0xf] }
 0x54c   :  { %5702 = vmatpush.bf16.msra.mxu3 %v8376_v57  ;;  %v8287_v57 = vld [vmem:[#allocation11 + $0x248] sm:$0xf] }
 0x54d   :  { %v8288_v24 = vor.u32 %v9027_v9, %v8287_v57  ;;  %v9001_v57 = vld [vmem:[#allocation11 + $0x18c] sm:$0xf]  ;;  %v8193_v9 = vld [vmem:[#allocation11 + $0x198] sm:$0xf0] }
 0x54e   :  { %5730 = vmatpush.bf16.msrb.mxu1 %v8124_v61  ;;  %v8208_v61 = vor.u32 %v9007_v55, %v8207_v45  ;;  %v9005_v45 = vld [vmem:[#allocation11 + $0x1ac] sm:$0xf] }
 0x54f   :  { %5825 = vmatpush.bf16.msrb.mxu0 %v8052_v27  ;;  %v9029_v55 = vld [vmem:[#allocation11 + $0x26c] sm:$0xf] }
 0x550   :  { %5751 = vmatpush.bf16.msrb.mxu3 %v8492_v0  ;;  %v8192_v0 = vor.u32 %v9003_v25, %v8191_v38  ;;  %v8308_v25 = vor.u32 %v9029_v55, %v8305_v56  ;;  %v9057_v55 = vld [vmem:[#allocation11 + $0x34c] sm:$0xf]  ;;  %v8417_v56 = vld [vmem:[#allocation11 + $0x358] sm:$0xf0] }
 0x553   :  { %5826 = vmatpush.bf16.msrb.mxu0 %v8036_v60  ;;  %v8351_v60 = vld [vmem:[#allocation11 + $0x2c8] sm:$0xf] }
 0x554   :  { %5752 = vmatpush.bf16.msrb.mxu3 %v8476_v62  ;;  %v8352_v29 = vor.u32 %v9043_v50, %v8351_v60  ;;  %v8999_v62 = vld [vmem:[#allocation11 + $0x174] sm:$0xf0]  ;;  %v8127_v50 = vld [vmem:[#allocation11 + $0x108] sm:$0xf] }
 0x557   :  { %5827 = vmatpush.bf16.msrb.mxu0 %v8020_v42  ;;  %v8412_v42 = vor.u32 %v9056_v33, %v8409_v1  ;;  %v8987_v33 = vld [vmem:[#allocation11 + $0x114] sm:$0xf0]  ;;  %v9013_v1 = vld [vmem:[#allocation11 + $0x1ec] sm:$0xf] }
 0x558   :  { %v8128_v59 = vor.u32 %v8987_v33, %v8127_v50  ;;  %v8989_v33 = vld [vmem:[#allocation11 + $0x12c] sm:$0xf] }
 0x55b   :  { %5828 = vmatpush.bf16.msrb.mxu0 %v8004_v51  ;;  %v8393_v51 = vld [vmem:[#allocation11 + $0x330] sm:$0xf0] }
 0x55c   :  { %v8396_v21 = vor.u32 %v9052_v23, %v8393_v51  ;;  %v9033_v23 = vld [vmem:[#allocation11 + $0x28c] sm:$0xf]  ;;  %v8321_v51 = vld [vmem:[#allocation11 + $0x298] sm:$0xf0] }
 0x55e   :  { %5829 = vmatmul.bf16.vlgmr.msrb.gmra.mxu0 %v10257_v4  ;;  %v8460_v4 = vor.u32 %v9068_v18, %v8457_v53  ;;  %v8271_v18 = vld [vmem:[#allocation11 + $0x228] sm:$0xf]  ;;  %v8176_v53 = vor.u32 %v8999_v62, %v8175_v26 }
 0x55f   :  { %v8447_v62 = vld [vmem:[#allocation11 + $0x388] sm:$0xf] }
 0x560   :  { %5753 = vmatpush.bf16.msrb.mxu3 %v8460_v4 }
 0x564   :  { %5754 = vmatpush.bf16.msrb.mxu3 %v8444_v19  ;;  %v8255_v19 = vld [vmem:[#allocation11 + $0x208] sm:$0xf] }
 0x565   :  { %v8256_v8 = vor.u32 %v9019_v17, %v8255_v19  ;;  %v8273_v19 = vld [vmem:[#allocation11 + $0x238] sm:$0xf0] }
 0x568   :  { %5755 = vmatpush.bf16.msrb.mxu3 %v8428_v3  ;;  %v4727_v3 = vpop.f32.mrf.mxu1 }
 0x56c   :  { %v9113_v2 = vpop.permute.xlu1 %9112  ;;  %5756 = vmatpush.bf16.msrb.mxu3 %v8412_v42  ;;  %v8241_v42 = vld [vmem:[#allocation11 + $0x1f8] sm:$0xf0] }
 0x56d   :  { %v9115_v7 = vunpack.i.h.bf16 %v9113_v2  ;;  %v9114_v27 = vunpack.i.l.bf16 %v9113_v2  ;;  %v9045_v2 = vld [vmem:[#allocation11 + $0x2ec] sm:$0xf] }
 0x56f   :  { %v4867_v32 = vsel %vm227_vm0, %v4540_v39, %v9114_v27  ;;  %v4868_v49 = vsel %vm227_vm0, %v4543_v63, %v9115_v7  ;;  %v9023_v39 = vld [vmem:[#allocation11 + $0x234] sm:$0xf0]  ;;  %v8372_v7 = vor.u32 %v9045_v2, %v8369_v36  ;;  %v8143_v27 = vld [vmem:[#allocation11 + $0x128] sm:$0xf] }
 0x570   :  { %v10268_v48 = vpack.c.bf16 %v4868_v49, %v4867_v32  ;;  %5757 = vmatpush.bf16.msrb.mxu3 %v8396_v21  ;;  %v8272_v4 = vor.u32 %v9023_v39, %v8271_v18  ;;  %v8991_v63 = vld [vmem:[#allocation11 + $0x134] sm:$0xf0]  ;;  %v9041_v32 = vld [vmem:[#allocation11 + $0x2cc] sm:$0xf]  ;;  %v8353_v49 = vld [vmem:[#allocation11 + $0x2d8] sm:$0xf0]  ;;  %v8196_v39 = vor.u32 %v9001_v57, %v8193_v9 }
 0x571   :  { %v8356_v60 = vor.u32 %v9041_v32, %v8353_v49  ;;  %v9067_v18 = vld [vmem:[#allocation11 + $0x394] sm:$0xf0]  ;;  %v8431_v2 = vld [vmem:[#allocation11 + $0x368] sm:$0xf]  ;;  %v5892_v9 = vld [vmem:[%s10528_s9 + $0x78] sm:$0xff] }
 0x572   :  { %5689 = vmatmul.bf16.vlgmr.msra.gmra.mxu2 %v10268_v48  ;;  %v8448_v17 = vor.u32 %v9067_v18, %v8447_v62  ;;  %v9063_v36 = vld [vmem:[#allocation11 + $0x374] sm:$0xf0]  ;;  %v8415_v49 = vld [vmem:[#allocation11 + $0x348] sm:$0xf]  ;;  %5945 = vmatpush.msra.mxu0 %v5892_v9  ;;  %v5886_v18 = vld [vmem:[%s10528_s9 + $0x48] sm:$0xff] }
 0x573   :  { %5793 = vmatpush.bf16.msra.mxu2 %v8368_v40  ;;  %v8144_v40 = vor.u32 %v8991_v63, %v8143_v27  ;;  %v8161_v27 = vld [vmem:[#allocation11 + $0x158] sm:$0xf0]  ;;  %v9017_v63 = vld [vmem:[#allocation11 + $0x20c] sm:$0xf]  ;;  %v8432_v32 = vor.u32 %v9063_v36, %v8431_v2  ;;  %v5887_v62 = vld [vmem:[%s10528_s9 + $0x50] sm:$0xff] }
 0x574   :  { %v9128_v34 = vpop.permute.xlu1 %9127  ;;  %v5881_v2 = vld [vmem:[%s10528_s9 + $0x20] sm:$0xff] }
 0x575   :  { %v9130_v11 = vunpack.i.h.bf16 %v9128_v34  ;;  %v9129_v44 = vunpack.i.l.bf16 %v9128_v34  ;;  %v5905_v36 = vld [vmem:[%s10528_s9 + $0xe0] sm:$0xff] }
 0x577   :  { %v4865_v37 = vsel %vm227_vm0, %v10263_v6, %v9129_v44  ;;  %v4866_v10 = vsel %vm227_vm0, %v4356_v35, %v9130_v11  ;;  %5794 = vmatpush.bf16.msra.mxu2 %v8352_v29  ;;  %v8224_v6 = vor.u32 %v9011_v30, %v8223_v16  ;;  %v8380_v35 = vor.u32 %v9048_v12, %v8377_v22  ;;  %v9037_v29 = vld [vmem:[#allocation11 + $0x2ac] sm:$0xf]  ;;  %v8225_v16 = vld [vmem:[#allocation11 + $0x1d8] sm:$0xf0]  ;;  %v8479_v12 = vld [vmem:[#allocation11 + $0x3c8] sm:$0xf] }
 0x578   :  { %v10274_v52 = vpack.c.bf16 %v4866_v10, %v4865_v37  ;;  %v8244_v37 = vor.u32 %v9013_v1, %v8241_v42  ;;  %v8340_v10 = vor.u32 %v9037_v29, %v8337_v5  ;;  %v9075_v22 = vld [vmem:[#allocation11 + $0x3d4] sm:$0xf0]  ;;  %v8145_v1 = vld [vmem:[#allocation11 + $0x138] sm:$0xf0]  ;;  %v8399_v29 = vld [vmem:[#allocation11 + $0x328] sm:$0xf] }
 0x579   :  { %5758 = vmatpush.bf16.msrb.mxu3 %v8380_v35  ;;  %v8209_v35 = vld [vmem:[#allocation11 + $0x1b8] sm:$0xf0]  ;;  %v8480_v41 = vor.u32 %v9075_v22, %v8479_v12  ;;  %v9055_v5 = vld [vmem:[#allocation11 + $0x334] sm:$0xf0]  ;;  %v9065_v12 = vld [vmem:[#allocation11 + $0x38c] sm:$0xf] }
 0x57a   :  { %5675 = vmatmul.bf16.vlgmr.msra.gmra.mxu1 %v10274_v52  ;;  %v8212_v38 = vor.u32 %v9005_v45, %v8209_v35  ;;  %v8400_v20 = vor.u32 %v9055_v5, %v8399_v29  ;;  %v8449_v22 = vld [vmem:[#allocation11 + $0x398] sm:$0xf0]  ;;  %v5897_v29 = vld [vmem:[%s10528_s9 + $0xa0] sm:$0xff] }
 0x57b   :  { %5779 = vmatpush.bf16.msra.mxu1 %v8240_v14  ;;  %5795 = vmatpush.bf16.msra.mxu2 %v8336_v15  ;;  %v9009_v14 = vld [vmem:[#allocation11 + $0x1cc] sm:$0xf]  ;;  %v4730_v15 = vpop.f32.mrf.mxu1  ;;  %v8433_v45 = vld [vmem:[#allocation11 + $0x378] sm:$0xf0]  ;;  %v5921_v5 = vld [vmem:[%s10528_s9 + $0x160] sm:$0xff] }
 0x57f   :  { %5780 = vmatpush.bf16.msra.mxu1 %v8224_v6  ;;  %5796 = vmatpush.bf16.msra.mxu2 %v8320_v47  ;;  %v8228_v6 = vor.u32 %v9009_v14, %v8225_v16  ;;  %v8324_v47 = vor.u32 %v9033_v23, %v8321_v51  ;;  %v8497_v14 = vld [vmem:[#allocation11 + $0x3f8] sm:$0xf0]  ;;  %v9073_v23 = vld [vmem:[#allocation11 + $0x3cc] sm:$0xf] }
 0x580   :  { %v8481_v51 = vld [vmem:[#allocation11 + $0x3d8] sm:$0xf0] }
 0x582   :  { %5745 = vmatmul.bf16.vlgmr.msrb.gmra.mxu2 %v10268_v48 }
 0x583   :  { %5781 = vmatpush.bf16.msra.mxu1 %v8208_v61  ;;  %5797 = vmatpush.bf16.msra.mxu2 %v8304_v54  ;;  %v8463_v61 = vld [vmem:[#allocation11 + $0x3a8] sm:$0xf]  ;;  %v9071_v54 = vld [vmem:[#allocation11 + $0x3b4] sm:$0xf0] }
 0x584   :  { %v8464_v26 = vor.u32 %v9071_v54, %v8463_v61  ;;  %v8401_v61 = vld [vmem:[#allocation11 + $0x338] sm:$0xf0] }
 0x587   :  { %5782 = vmatpush.bf16.msra.mxu1 %v8192_v0  ;;  %5798 = vmatpush.bf16.msra.mxu2 %v8288_v24  ;;  %v9025_v0 = vld [vmem:[#allocation11 + $0x24c] sm:$0xf]  ;;  %v8289_v24 = vld [vmem:[#allocation11 + $0x258] sm:$0xf0] }
 0x58a   :  { %5731 = vmatmul.bf16.vlgmr.msrb.gmra.mxu1 %v10274_v52 }
 0x58b   :  { %5783 = vmatpush.bf16.msra.mxu1 %v8176_v53  ;;  %5799 = vmatpush.bf16.msra.mxu2 %v8272_v4  ;;  %v8292_v53 = vor.u32 %v9025_v0, %v8289_v24  ;;  %v8997_v4 = vld [vmem:[#allocation11 + $0x16c] sm:$0xf]  ;;  %v5891_v0 = vld [vmem:[%s10528_s9 + $0x70] sm:$0xff] }
 0x58c   :  { %v5890_v24 = vld [vmem:[%s10528_s9 + $0x68] sm:$0xff]  ;;  %5946 = vmatpush.msra.mxu0 %v5891_v0  ;;  %v5939_v0 = vld [vmem:[%s10528_s9 + $0x1f0] sm:$0xff] }
 0x58e   :  { %5947 = vmatpush.msra.mxu0 %v5890_v24 }
 0x58f   :  { %5784 = vmatpush.bf16.msra.mxu1 %v8160_v43  ;;  %5800 = vmatpush.bf16.msra.mxu2 %v8256_v8  ;;  %v8180_v43 = vor.u32 %v8997_v4, %v8177_v31  ;;  %v8276_v8 = vor.u32 %v9021_v58, %v8273_v19  ;;  %v5908_v4 = vld [vmem:[%s10528_s9 + $0xf8] sm:$0xff]  ;;  %v5883_v31 = vld [vmem:[%s10528_s9 + $0x30] sm:$0xff]  ;;  %v5882_v19 = vld [vmem:[%s10528_s9 + $0x28] sm:$0xff] }
 0x590   :  { %v5907_v58 = vld [vmem:[%s10528_s9 + $0xf0] sm:$0xff] }
 0x592   :  { %5801 = vmatmul.bf16.vlgmr.msra.gmra.mxu2 %v10268_v48 }
 0x593   :  { %5849 = vmatpush.bf16.msrb.mxu2 %v8372_v7  ;;  %5785 = vmatpush.bf16.msra.mxu1 %v8144_v40  ;;  %v9123_v34 = vpop.permute.xlu0 %9122  ;;  %v8993_v7 = vld [vmem:[#allocation11 + $0x14c] sm:$0xf]  ;;  %v9059_v40 = vld [vmem:[#allocation11 + $0x354] sm:$0xf0] }
 0x594   :  { %v9125_v11 = vunpack.i.h.bf16 %v9123_v34  ;;  %v9124_v44 = vunpack.i.l.bf16 %v9123_v34  ;;  %v8416_v42 = vor.u32 %v9059_v40, %v8415_v49  ;;  %v8148_v34 = vor.u32 %v8989_v33, %v8145_v1  ;;  %v5901_v49 = vld [vmem:[%s10528_s9 + $0xc0] sm:$0xff]  ;;  %v5900_v40 = vld [vmem:[%s10528_s9 + $0xb8] sm:$0xff]  ;;  %v5923_v33 = vld [vmem:[%s10528_s9 + $0x170] sm:$0xff] }
 0x595   :  { %v5898_v1 = vld [vmem:[%s10528_s9 + $0xa8] sm:$0xff] }
 0x596   :  { %v4870_v30 = vsel %vm227_vm0, %v4730_v15, %v9125_v11  ;;  %v4869_v13 = vsel %vm227_vm0, %v4727_v3, %v9124_v44  ;;  %v8257_v3 = vld [vmem:[#allocation11 + $0x218] sm:$0xf0]  ;;  %v8383_v11 = vld [vmem:[#allocation11 + $0x308] sm:$0xf]  ;;  %v9051_v44 = vld [vmem:[#allocation11 + $0x314] sm:$0xf0] }
 0x597   :  { %5850 = vmatpush.bf16.msrb.mxu2 %v8356_v60  ;;  %v10282_v21 = vpack.c.bf16 %v4870_v30, %v4869_v13  ;;  %5786 = vmatpush.bf16.msra.mxu1 %v8128_v59  ;;  %v8164_v60 = vor.u32 %v8993_v7, %v8161_v27  ;;  %v8260_v50 = vor.u32 %v9017_v63, %v8257_v3  ;;  %v8985_v59 = vld [vmem:[#allocation11 + $0x10c] sm:$0xf]  ;;  %v5879_v7 = vld [vmem:[%s10528_s9 + $0x10] sm:$0xff] }
 0x598   :  { %v8384_v15 = vor.u32 %v9051_v44, %v8383_v11  ;;  %v8484_v30 = vor.u32 %v9073_v23, %v8481_v51  ;;  %v9069_v13 = vld [vmem:[#allocation11 + $0x3ac] sm:$0xf]  ;;  %v5903_v27 = vld [vmem:[%s10528_s9 + $0xd0] sm:$0xff]  ;;  %v5916_v23 = vld [vmem:[%s10528_s9 + $0x138] sm:$0xff] }
 0x599   :  { %5703 = vmatmul.bf16.vlgmr.msra.gmra.mxu3 %v10282_v21  ;;  %v5878_v63 = vld [vmem:[%s10528_s9 + $0x8] sm:$0xff]  ;;  %v5919_v11 = vld [vmem:[%s10528_s9 + $0x150] sm:$0xff] }
 0x59a   :  { %5807 = vmatpush.bf16.msra.mxu3 %v8496_v28  ;;  %5787 = vmatmul.bf16.vlgmr.msra.gmra.mxu1 %v10274_v52  ;;  %v8465_v28 = vld [vmem:[#allocation11 + $0x3b8] sm:$0xf0]  ;;  %v5902_v3 = vld [vmem:[%s10528_s9 + $0xc8] sm:$0xff] }
 0x59b   :  { %5835 = vmatpush.bf16.msrb.mxu1 %v8244_v37  ;;  %5851 = vmatpush.bf16.msrb.mxu2 %v8340_v10  ;;  %v8132_v37 = vor.u32 %v8985_v59, %v8129_v46  ;;  %v9077_v10 = vld [vmem:[#allocation11 + $0x3ec] sm:$0xf]  ;;  %v5920_v59 = vld [vmem:[%s10528_s9 + $0x158] sm:$0xff]  ;;  %v5662_v46 = vpop.f32.mrf.mxu0 }
 0x59c   :  { %v8500_v16 = vor.u32 %v9077_v10, %v8497_v14  ;;  %v5918_v10 = vld [vmem:[%s10528_s9 + $0x148] sm:$0xff]  ;;  %v5893_v14 = vld [vmem:[%s10528_s9 + $0x80] sm:$0xff] }
 0x59e   :  { %5808 = vmatpush.bf16.msra.mxu3 %v8480_v41  ;;  %v9053_v41 = vld [vmem:[#allocation11 + $0x32c] sm:$0xf] }
 0x59f   :  { %5836 = vmatpush.bf16.msrb.mxu1 %v8228_v6  ;;  %5852 = vmatpush.bf16.msrb.mxu2 %v8324_v47  ;;  %v8452_v6 = vor.u32 %v9065_v12, %v8449_v22  ;;  %v9061_v47 = vld [vmem:[#allocation11 + $0x36c] sm:$0xf]  ;;  %v8404_v54 = vor.u32 %v9053_v41, %v8401_v61 }
 0x5a0   :  { %v8436_v35 = vor.u32 %v9061_v47, %v8433_v45  ;;  %v5914_v22 = vld [vmem:[%s10528_s9 + $0x128] sm:$0xff]  ;;  %v5912_v45 = vld [vmem:[%s10528_s9 + $0x118] sm:$0xff] }
 0x5a2   :  { %5809 = vmatpush.bf16.msra.mxu3 %v8464_v26  ;;  %v5889_v26 = vld [vmem:[%s10528_s9 + $0x60] sm:$0xff] }
 0x5a3   :  { %5837 = vmatpush.bf16.msrb.mxu1 %v8212_v38  ;;  %5853 = vmatpush.bf16.msrb.mxu2 %v8308_v25  ;;  %v9049_v38 = vld [vmem:[#allocation11 + $0x30c] sm:$0xf]  ;;  %v8385_v25 = vld [vmem:[#allocation11 + $0x318] sm:$0xf0] }
 0x5a4   :  { %v8388_v57 = vor.u32 %v9049_v38, %v8385_v25  ;;  %5948 = vmatpush.msra.mxu0 %v5889_v26  ;;  %v5910_v38 = vld [vmem:[%s10528_s9 + $0x108] sm:$0xff]  ;;  %v5940_v25 = vld [vmem:[%s10528_s9 + $0x1f8] sm:$0xff] }
 0x5a5   :  { %v5938_v26 = vld [vmem:[%s10528_s9 + $0x1e8] sm:$0xff] }
 0x5a6   :  { %5810 = vmatpush.bf16.msra.mxu3 %v8448_v17  ;;  %v5906_v17 = vld [vmem:[%s10528_s9 + $0xe8] sm:$0xff] }
 0x5a7   :  { %5838 = vmatpush.bf16.msrb.mxu1 %v8196_v39  ;;  %5854 = vmatpush.bf16.msrb.mxu2 %v8292_v53  ;;  %v5885_v39 = vld [vmem:[%s10528_s9 + $0x40] sm:$0xff]  ;;  %v5884_v53 = vld [vmem:[%s10528_s9 + $0x38] sm:$0xff] }
 0x5a9   :  { %5759 = vmatmul.bf16.vlgmr.msrb.gmra.mxu3 %v10282_v21 }
 0x5aa   :  { %5811 = vmatpush.bf16.msra.mxu3 %v8432_v32  ;;  %v5877_v32 = vld [vmem:[%s10528_s9] sm:$0xff] }
 0x5ab   :  { %5839 = vmatpush.bf16.msrb.mxu1 %v8180_v43  ;;  %5855 = vmatpush.bf16.msrb.mxu2 %v8276_v8  ;;  %v5880_v43 = vld [vmem:[%s10528_s9 + $0x18] sm:$0xff] }
 0x5ac   :  { %v5904_v8 = vld [vmem:[%s10528_s9 + $0xd8] sm:$0xff] }
 0x5ae   :  { %5812 = vmatpush.bf16.msra.mxu3 %v8416_v42  ;;  %v5922_v42 = vld [vmem:[%s10528_s9 + $0x168] sm:$0xff] }
 0x5af   :  { %5840 = vmatpush.bf16.msrb.mxu1 %v8164_v60  ;;  %5856 = vmatpush.bf16.msrb.mxu2 %v8260_v50  ;;  %v5924_v60 = vld [vmem:[%s10528_s9 + $0x178] sm:$0xff]  ;;  %v5899_v50 = vld [vmem:[%s10528_s9 + $0xb0] sm:$0xff] }
 0x5b2   :  { %5857 = vmatmul.bf16.vlgmr.msrb.gmra.mxu2 %v10268_v48  ;;  %5813 = vmatpush.bf16.msra.mxu3 %v8400_v20  ;;  %v8468_v48 = vor.u32 %v9069_v13, %v8465_v28  ;;  %v5895_v20 = vld [vmem:[%s10528_s9 + $0x90] sm:$0xff]  ;;  %v5664_v13 = vpop.f32.mrf.mxu0 }
 0x5b3   :  { %5841 = vmatpush.bf16.msrb.mxu1 %v8148_v34  ;;  %5991 = vmatpush.msra.mxu2 %v5924_v60  ;;  %v5896_v34 = vld [vmem:[%s10528_s9 + $0x98] sm:$0xff]  ;;  %v5915_v28 = vld [vmem:[%s10528_s9 + $0x130] sm:$0xff] }
 0x5b5   :  { %5992 = vmatpush.msra.mxu2 %v5923_v33 }
 0x5b6   :  { %5814 = vmatpush.bf16.msra.mxu3 %v8384_v15  ;;  %v10408_v15 = vld [vmem:[#allocation13] sm:$0xf] }
 0x5b7   :  { %5842 = vmatpush.bf16.msrb.mxu1 %v8132_v37  ;;  %5993 = vmatpush.msra.mxu2 %v5922_v42  ;;  %v5894_v37 = vld [vmem:[%s10528_s9 + $0x88] sm:$0xff]  ;;  %v5929_v42 = vld [vmem:[%s10528_s9 + $0x1a0] sm:$0xff] }
 0x5b9   :  { %5815 = vmatmul.bf16.vlgmr.msra.gmra.mxu3 %v10282_v21  ;;  %5994 = vmatpush.msra.mxu2 %v5921_v5 }
 0x5ba   :  { %5843 = vmatmul.bf16.vlgmr.msrb.gmra.mxu1 %v10274_v52  ;;  %5863 = vmatpush.bf16.msrb.mxu3 %v8500_v16  ;;  %v8420_v52 = vor.u32 %v9057_v55, %v8417_v56  ;;  %v5917_v16 = vld [vmem:[%s10528_s9 + $0x140] sm:$0xff]  ;;  %v5911_v55 = vld [vmem:[%s10528_s9 + $0x110] sm:$0xff] }
 0x5bb   :  { %5968 = vmatpush.msra.mxu1 %v5908_v4  ;;  %5995 = vmatpush.msra.mxu2 %v5920_v59 }
 0x5bd   :  { %5969 = vmatpush.msra.mxu1 %v5907_v58  ;;  %5996 = vmatpush.msra.mxu2 %v5919_v11  ;;  %v5936_v58 = vld [vmem:[%s10528_s9 + $0x1d8] sm:$0xff]  ;;  %v5927_v11 = vld [vmem:[%s10528_s9 + $0x190] sm:$0xff] }
 0x5be   :  { %5864 = vmatpush.bf16.msrb.mxu3 %v8484_v30  ;;  %v5005_v30 = vperm.slane %v10408_v15, 0 }
 0x5bf   :  { %5970 = vmatpush.msra.mxu1 %v5906_v17  ;;  %5997 = vmatpush.msra.mxu2 %v5918_v10 }
 0x5c0   :  { %v5663_v12 = vadd.f32 %v5662_v46, %v5005_v30  ;;  %v5665_v61 = vadd.f32 %v5664_v13, %v5005_v30 }
 0x5c1   :  { %5971 = vmatpush.msra.mxu1 %v5905_v36  ;;  %5998 = vmatpush.msra.mxu2 %v5917_v16  ;;  %v5934_v36 = vld [vmem:[%s10528_s9 + $0x1c8] sm:$0xff]  ;;  %v5925_v16 = vld [vmem:[%s10528_s9 + $0x180] sm:$0xff] }
 0x5c2   :  { %5865 = vmatpush.bf16.msrb.mxu3 %v8468_v48 }
 0x5c3   :  { %5972 = vmatpush.msra.mxu1 %v5904_v8  ;;  %5999 = vmatpush.msra.mxu2 %v5916_v23  ;;  %v5933_v8 = vld [vmem:[%s10528_s9 + $0x1c0] sm:$0xff] }
 0x5c5   :  { %5973 = vmatpush.msra.mxu1 %v5903_v27  ;;  %6000 = vmatpush.msra.mxu2 %v5915_v28  ;;  %v5932_v27 = vld [vmem:[%s10528_s9 + $0x1b8] sm:$0xff] }
 0x5c6   :  { %5866 = vmatpush.bf16.msrb.mxu3 %v8452_v6  ;;  %v5913_v6 = vld [vmem:[%s10528_s9 + $0x120] sm:$0xff] }
 0x5c7   :  { %5974 = vmatpush.msra.mxu1 %v5902_v3  ;;  %6001 = vmatpush.msra.mxu2 %v5914_v22 }
 0x5c9   :  { %5975 = vmatpush.msra.mxu1 %v5901_v49  ;;  %6002 = vmatpush.msra.mxu2 %v5913_v6  ;;  %v5931_v49 = vld [vmem:[%s10528_s9 + $0x1b0] sm:$0xff] }
 0x5ca   :  { %5867 = vmatpush.bf16.msrb.mxu3 %v8436_v35 }
 0x5cb   :  { %5976 = vmatpush.msra.mxu1 %v5900_v40  ;;  %6003 = vmatpush.msra.mxu2 %v5912_v45 }
 0x5cd   :  { %5977 = vmatpush.msra.mxu1 %v5899_v50  ;;  %6004 = vmatpush.msra.mxu2 %v5911_v55  ;;  %v5930_v50 = vld [vmem:[%s10528_s9 + $0x1a8] sm:$0xff] }
 0x5ce   :  { %5868 = vmatpush.bf16.msrb.mxu3 %v8420_v52  ;;  %v5718_v52 = vpop.f32.mrf.mxu0 }
 0x5cf   :  { %5978 = vmatpush.msra.mxu1 %v5898_v1  ;;  %6005 = vmatpush.msra.mxu2 %v5910_v38  ;;  %v5007_v1 = vperm.slane %v10408_v15, 2 }
 0x5d1   :  { %5979 = vmatpush.msra.mxu1 %v5897_v29 }
 0x5d2   :  { %5869 = vmatpush.bf16.msrb.mxu3 %v8404_v54 }
 0x5d3   :  { %5980 = vmatpush.msra.mxu1 %v5896_v34  ;;  %v5928_v34 = vld [vmem:[%s10528_s9 + $0x198] sm:$0xff] }
 0x5d5   :  { %5981 = vmatpush.msra.mxu1 %v5895_v20 }
 0x5d6   :  { %5870 = vmatpush.bf16.msrb.mxu3 %v8388_v57  ;;  %v5909_v57 = vld [vmem:[%s10528_s9 + $0x100] sm:$0xff]  ;;  %v5720_v17 = vpop.f32.mrf.mxu0 }
 0x5d7   :  { %5982 = vmatpush.msra.mxu1 %v5894_v37  ;;  %6006 = vmatpush.msra.mxu2 %v5909_v57 }
 0x5d9   :  { %5871 = vmatmul.bf16.vlgmr.msrb.gmra.mxu3 %v10282_v21  ;;  %v5888_v21 = vld [vmem:[%s10528_s9 + $0x58] sm:$0xff]  ;;  %5983 = vmatpush.msra.mxu1 %v5893_v14  ;;  %v5926_v14 = vld [vmem:[%s10528_s9 + $0x188] sm:$0xff] }
 0x5da   :  { %5949 = vmatpush.msra.mxu0 %v5888_v21  ;;  %6014 = vmatpush.msra.mxu3 %v5940_v25  ;;  %v5006_v21 = vperm.slane %v10408_v15, 1 }
 0x5dc   :  { %5950 = vmatpush.msra.mxu0 %v5887_v62  ;;  %6015 = vmatpush.msra.mxu3 %v5939_v0  ;;  %v5937_v62 = vld [vmem:[%s10528_s9 + $0x1e0] sm:$0xff]  ;;  %v5719_v4 = vadd.f32 %v5718_v52, %v5006_v21  ;;  %v5721_v3 = vadd.f32 %v5720_v17, %v5006_v21 }
 0x5de   :  { %5951 = vmatpush.msra.mxu0 %v5886_v18  ;;  %6016 = vmatpush.msra.mxu3 %v5938_v26  ;;  %v5774_v33 = vpop.f32.mrf.mxu0 }
 0x5df   :  { %v5775_v46 = vadd.f32 %v5774_v33, %v5007_v1 }
 0x5e0   :  { %5952 = vmatpush.msra.mxu0 %v5885_v39  ;;  %6017 = vmatpush.msra.mxu3 %v5937_v62 }
 0x5e2   :  { %5953 = vmatpush.msra.mxu0 %v5884_v53  ;;  %6018 = vmatpush.msra.mxu3 %v5936_v58 }
 0x5e4   :  { %5954 = vmatpush.msra.mxu0 %v5883_v31 }
 0x5e6   :  { %5955 = vmatpush.msra.mxu0 %v5882_v19  ;;  %v5935_v19 = vld [vmem:[%s10528_s9 + $0x1d0] sm:$0xff]  ;;  %v5776_v10 = vpop.f32.mrf.mxu0 }
 0x5e7   :  { %6019 = vmatpush.msra.mxu3 %v5935_v19  ;;  %v5777_v13 = vadd.f32 %v5776_v10, %v5007_v1  ;;  %v6068_v19 = vld [vmem:[%s10530_s11 + $0x10] sm:$0xff] }
 0x5e8   :  { %5956 = vmatpush.msra.mxu0 %v5881_v2 }
 0x5e9   :  { %6020 = vmatpush.msra.mxu3 %v5934_v36  ;;  %v6066_v36 = vld [vmem:[%s10530_s11] sm:$0xff] }
 0x5ea   :  { %5957 = vmatpush.msra.mxu0 %v5880_v43 }
 0x5eb   :  { %6021 = vmatpush.msra.mxu3 %v5933_v8 }
 0x5ec   :  { %5958 = vmatpush.msra.mxu0 %v5879_v7 }
 0x5ed   :  { %6022 = vmatpush.msra.mxu3 %v5932_v27 }
 0x5ee   :  { %5959 = vmatpush.msra.mxu0 %v5878_v63  ;;  %v5830_v45 = vpop.f32.mrf.mxu0 }
 0x5ef   :  { %6023 = vmatpush.msra.mxu3 %v5931_v49 }
 0x5f0   :  { %5960 = vmatpush.msra.mxu0 %v5877_v32 }
 0x5f1   :  { %6024 = vmatpush.msra.mxu3 %v5930_v50 }
 0x5f3   :  { %6025 = vmatpush.msra.mxu3 %v5929_v42 }
 0x5f5   :  { %v5690_v51 = vpop.f32.mrf.mxu2  ;;  %6026 = vmatpush.msra.mxu3 %v5928_v34  ;;  %v6039_v34 = vld [vmem:[#allocation16] sm:$0x3] }
 0x5f7   :  { %v5676_v44 = vpop.f32.mrf.mxu1  ;;  %6027 = vmatpush.msra.mxu3 %v5927_v11 }
 0x5f8   :  { %v5677_v47 = vadd.f32 %v5676_v44, %v5663_v12 }
 0x5f9   :  { %6028 = vmatpush.msra.mxu3 %v5926_v14 }
 0x5fa   :  { %v5691_v56 = vadd.f32 %v5690_v51, %v5677_v47 }
 0x5fb   :  { %6029 = vmatpush.msra.mxu3 %v5925_v16 }
 0x5fd   :  { %v5692_v35 = vpop.f32.mrf.mxu2 }
 0x5ff   :  { %v5678_v48 = vpop.f32.mrf.mxu1 }
 0x600   :  { %v5679_v24 = vadd.f32 %v5678_v48, %v5665_v61  ;;  %v5832_v61 = vpop.f32.mrf.mxu0 }
 0x602   :  { %v5693_v18 = vadd.f32 %v5692_v35, %v5679_v24  ;;  %v5008_v35 = vperm.slane %v10408_v15, 3  ;;  %v6073_v15 = vld [vmem:[%s10530_s11 + $0x38] sm:$0xff] }
 0x603   :  { %6089 = vmatpush.msrb.mxu1 %v6073_v15 }
 0x604   :  { %v5833_v57 = vadd.f32 %v5832_v61, %v5008_v35 }
 0x605   :  { %v5746_v39 = vpop.f32.mrf.mxu2 }
 0x607   :  { %v5732_v9 = vpop.f32.mrf.mxu1 }
 0x608   :  { %v5733_v2 = vadd.f32 %v5732_v9, %v5719_v4 }
 0x60a   :  { %v5747_v7 = vadd.f32 %v5746_v39, %v5733_v2  ;;  %v6071_v39 = vld [vmem:[%s10530_s11 + $0x28] sm:$0xff] }
 0x60b   :  { %v6067_v2 = vld [vmem:[%s10530_s11 + $0x8] sm:$0xff] }
 0x60d   :  { %v5748_v40 = vpop.f32.mrf.mxu2 }
 0x60f   :  { %v5734_v43 = vpop.f32.mrf.mxu1 }
 0x610   :  { %v5735_v60 = vadd.f32 %v5734_v43, %v5721_v3  ;;  %v9131_v43 = vld [vmem:[#allocation17] ss:$0 sm:$0xff] }
 0x612   :  { %v5749_v5 = vadd.f32 %v5748_v40, %v5735_v60 }
 0x615   :  { %v5802_v37 = vpop.f32.mrf.mxu2 }
 0x617   :  { %v5788_v29 = vpop.f32.mrf.mxu1 }
 0x618   :  { %v5789_v44 = vadd.f32 %v5788_v29, %v5775_v46  ;;  %v9132_v46 = vld [vmem:[#allocation19] ss:$0 sm:$0xff] }
 0x61a   :  { %v5803_v23 = vadd.f32 %v5802_v37, %v5789_v44 }
 0x61c   :  { %v5704_v41 = vpop.f32.mrf.mxu3 }
 0x61d   :  { %v5705_v54 = vadd.f32 %v5704_v41, %v5691_v56  ;;  %v5804_v12 = vpop.f32.mrf.mxu2  ;;  %v5831_v56 = vadd.f32 %v5830_v45, %v5008_v35 }
 0x61f   :  { %5961 = vmatmul.f32.vlgmr.msra.gmra.mxu0 %v5705_v54  ;;  %v5790_v51 = vpop.f32.mrf.mxu1 }
 0x620   :  { %v5791_v48 = vadd.f32 %v5790_v51, %v5777_v13 }
 0x622   :  { %v5805_v22 = vadd.f32 %v5804_v12, %v5791_v48 }
 0x624   :  { %v5706_v53 = vpop.f32.mrf.mxu3 }
 0x625   :  { %v5707_v31 = vadd.f32 %v5706_v53, %v5693_v18  ;;  %v6072_v18 = vld [vmem:[%s10530_s11 + $0x30] sm:$0xff]  ;;  %v6070_v53 = vld [vmem:[%s10530_s11 + $0x20] sm:$0xff] }
 0x626   :  { %6090 = vmatpush.msrb.mxu1 %v6072_v18 }
 0x627   :  { %5964 = vmatmul.f32.gmra.mxu0 %v5707_v31  ;;  %v6069_v31 = vld [vmem:[%s10530_s11 + $0x18] sm:$0xff]  ;;  %s9522_s11 = smov [#allocation20]  }
 0x628   :  { %6091 = vmatpush.msrb.mxu1 %v6071_v39  ;;  %s6108_s10 = sshll.u32 %s9522_s11, 4  ;;  %s6109_s10 = int_to_ptr.vmem [resolvable:$true] %s6108_s10 }
 0x62a   :  { %6092 = vmatpush.msrb.mxu1 %v6070_v53 }
 0x62c   :  { %v5760_v63 = vpop.f32.mrf.mxu3  ;;  %6093 = vmatpush.msrb.mxu1 %v6069_v31 }
 0x62d   :  { %v5761_v32 = vadd.f32 %v5760_v63, %v5747_v7 }
 0x62e   :  { %6094 = vmatpush.msrb.mxu1 %v6068_v19 }
 0x62f   :  { %5984 = vmatmul.f32.vlgmr.msra.gmra.mxu1 %v5761_v32 }
 0x630   :  { %6095 = vmatpush.msrb.mxu1 %v6067_v2 }
 0x632   :  { %6096 = vmatpush.msrb.mxu1 %v6066_v36 }
 0x634   :  { %v5762_v59 = vpop.f32.mrf.mxu3 }
 0x635   :  { %v5763_v20 = vadd.f32 %v5762_v59, %v5749_v5  ;;  %v5858_v41 = vpop.f32.mrf.mxu2 }
 0x637   :  { %5987 = vmatmul.f32.gmra.mxu1 %v5763_v20  ;;  %v5844_v55 = vpop.f32.mrf.mxu1 }
 0x638   :  { %v5845_v52 = vadd.f32 %v5844_v55, %v5831_v56 }
 0x63a   :  { %v5859_v54 = vadd.f32 %v5858_v41, %v5845_v52 }
 0x63c   :  { %v5816_v30 = vpop.f32.mrf.mxu3 }
 0x63d   :  { %v5817_v28 = vadd.f32 %v5816_v30, %v5803_v23  ;;  %v5860_v24 = vpop.f32.mrf.mxu2 }
 0x63f   :  { %6007 = vmatmul.f32.vlgmr.msra.gmra.mxu2 %v5817_v28  ;;  %v5846_v38 = vpop.f32.mrf.mxu1 }
 0x640   :  { %v5847_v0 = vadd.f32 %v5846_v38, %v5833_v57 }
 0x642   :  { %v5861_v26 = vadd.f32 %v5860_v24, %v5847_v0 }
 0x644   :  { %v5818_v6 = vpop.f32.mrf.mxu3 }
 0x645   :  { %v5819_v47 = vadd.f32 %v5818_v6, %v5805_v22 }
 0x647   :  { %6010 = vmatmul.f32.gmra.mxu2 %v5819_v47 }
 0x65c   :  { %v5872_v25 = vpop.f32.mrf.mxu3 }
 0x65d   :  { %v5873_v9 = vadd.f32 %v5872_v25, %v5859_v54 }
 0x65f   :  { %6030 = vmatmul.f32.vlgmr.msra.gmra.mxu3 %v5873_v9 }
 0x664   :  { %v5874_v21 = vpop.f32.mrf.mxu3 }
 0x665   :  { %v5875_v62 = vadd.f32 %v5874_v21, %v5861_v26 }
 0x667   :  { %6033 = vmatmul.f32.gmra.mxu3 %v5875_v62 }
 0x69c   :  { %v5962_v4 = vpop.f32.mrf.mxu0 }
 0x69d   :  { %v5963_v63 = vadd.f32 %v9131_v43, %v5962_v4 }
 0x6a4   :  { %v5965_v8 = vpop.f32.mrf.mxu0 }
 0x6a5   :  { %v5966_v3 = vadd.f32 %v9131_v43, %v5965_v8 }
 0x6ac   :  { %v5985_v58 = vpop.f32.mrf.mxu1 }
 0x6ad   :  { %v5986_v49 = vadd.f32 %v5985_v58, %v5963_v63 }
 0x6b4   :  { %v5988_v27 = vpop.f32.mrf.mxu1 }
 0x6b5   :  { %v5989_v40 = vadd.f32 %v5988_v27, %v5966_v3 }
 0x6c2   :  { %v6008_v17 = vpop.f32.mrf.mxu2 }
 0x6c3   :  { %v6009_v60 = vadd.f32 %v6008_v17, %v5986_v49 }
 0x6ca   :  { %v6011_v32 = vpop.f32.mrf.mxu2 }
 0x6cb   :  { %v6012_v50 = vadd.f32 %v6011_v32, %v5989_v40 }
 0x6e2   :  { %v6031_v7 = vpop.f32.mrf.mxu3 }
 0x6e3   :  { %v6032_v1 = vadd.f32 %v6031_v7, %v6009_v60 }
 0x6e5   :  { %v6037_v5 = vmax.f32 %v6032_v1, 0.0 }
 0x6ea   :  { %v6034_v33 = vpop.f32.mrf.mxu3 }
 0x6eb   :  { %v6035_v42 = vadd.f32 %v6034_v33, %v6012_v50 }
 0x6ed   :  { %v6038_v29 = vmax.f32 %v6035_v42, 0.0 }
 0x6ef   :  { %8501 = vmatpush.msk.msrb.mxu0 %vm4145_vm9, %v6038_v29 }
 0x6f1   :  { %6061 = vmatpush.msrb.mxu0 %v6037_v5 }
 0x6f2   :  { %8502 = vmatmul.msk.f32.vlgmr.msrb.gmra.mxu0 %vm4115_vm10, %v6039_v34 }
 0x76f   :  { %v6063_v59 = vpop.f32.mrf.mxu0 }
 0x770   :  { %8503 = vmatmul.msk.f32.vlgmr.msrb.gmra.mxu1 %vm227_vm0, %v6063_v59 }
 0x7ed   :  { %v6098_v20 = vpop.f32.mrf.mxu1 }
 0x7ee   :  { %v6099_v11 = vadd.f32 %v9132_v46, %v6098_v20 }
 0x7f0   :  { %6102 = vst.msk [vmem:[#allocation20] sm:$0x3] %vm6101_vm12, %v6099_v11 }
 0x7f1   :  { %6113 = dma.vmem_to_hbm [thread:$0]  %s6109_s10, 32, %s6111_s3, [#allocation4]  }
 0x7f2   :  { %9500 = dma.done.wait [#allocation4], 32  }
 0x7f3   :  { %9501 = vsyncadd [#allocation4], 4294967264 }
 0x7f4   :  { %6118 = vsyncpa [#allocation3], 1 }
 0x7f5   :  { %6119 = vsyncpa [#allocation6], 1 }
 0x7f6   :  { %6120 = vsyncpa [#allocation9], 1 }
 0x7f7   :  { %6121 = vsyncpa [#allocation12], 1 }
 0x7f8   :  { %6122 = vsyncpa [#allocation15], 1 }
 0x7f9   :  { %6123 = vsyncpa [#allocation18], 1 }
 0x7fa   :  { %6124 = vsyncpa [#allocation4], 1 }

</bundles_post_ra>
